<compile_context>
chip_gen: v6e
topology: v6e:2x2x1
jax: 0.10.0
libtpu: 0.0.40
codegen_flags: <defaults>
</compile_context>

<pallas_src>
import jax
import jax.numpy as jnp
from jax.experimental import pallas as pl
from jax.experimental.pallas import tpu as pltpu

# Synthetic "game": 8x8 board, action_size = 8*8 + 1 (Othello-style).
BX, BY = 8, 8
ACTION_SIZE = BX * BY + 1
NUM_CHANNELS = 16
BN_EPS = 1e-5

IN_PAD = 128                    # flattened board (64) + bias lane, padded to 128
BIAS_LANE = BX * BY             # constant-1 lane carrying conv1's folded shift
OUT_PAD = 128                   # [log_pi (65) | v (1) | zeros]
MATMUL_DTYPE = jnp.bfloat16     # set to jnp.float32 for bit-accurate validation


def _round_up(x, m):
    return ((x + m - 1) // m) * m


# Padded per-layer output widths (all multiples of 128).
H3, W3 = BX - 2, BY - 2
H4, W4 = BX - 4, BY - 4
D_C1 = _round_up(BX * BY * NUM_CHANNELS, 128)    # 1024
D_C2 = _round_up(BX * BY * NUM_CHANNELS, 128)    # 1024
D_C3 = _round_up(H3 * W3 * NUM_CHANNELS, 128)    # 640
D_C4 = _round_up(H4 * W4 * NUM_CHANNELS, 128)    # 256
D_F1 = 128
D_F2 = 128
D_HEAD = OUT_PAD                                 # 128

# Static, 128-aligned offsets into the packed shift/bias slab.
OFF_C2 = 0
OFF_C3 = OFF_C2 + D_C2
OFF_C4 = OFF_C3 + D_C3
OFF_F1 = OFF_C4 + D_C4
OFF_F2 = OFF_F1 + D_F1
OFF_HEAD = OFF_F2 + D_F2
SHIFT_SLAB = OFF_HEAD + D_HEAD                   # 2304


# --------------------------------------------------------------------------
# Pallas kernel: 7 chained lane-dense matmuls + fused BN-shift/ReLU + heads
# --------------------------------------------------------------------------
def alphazero_kernel(x_ref, mc1, mc2, mc3, mc4, mf1, mf2, mh, t_ref, out_ref):
    def layer(h, m_ref, off, width):
        y = jnp.dot(h, m_ref[...], preferred_element_type=jnp.float32)
        t = t_ref[:, off:off + width]            # static, 128-aligned slice
        # Emit next-layer activation directly in bf16 (halves spill traffic).
        return jnp.maximum(y + t, 0.0).astype(MATMUL_DTYPE)

    # Layer 1: BN scale folded into weights; shift folded into the constant-1
    # bias lane of the input -> bare relu(matmul).
    h = jnp.maximum(
        jnp.dot(x_ref[...], mc1[...], preferred_element_type=jnp.float32),
        0.0).astype(MATMUL_DTYPE)
    h = layer(h, mc2, OFF_C2, D_C2)
    h = layer(h, mc3, OFF_C3, D_C3)
    h = layer(h, mc4, OFF_C4, D_C4)
    h = layer(h, mf1, OFF_F1, D_F1)
    h = layer(h, mf2, OFF_F2, D_F2)
    # NOTE: dropout is the identity in eval mode (training=False).

    # Fused policy/value head: one (TB,128) @ (128,128) matmul.
    head = (jnp.dot(h, mh[...], preferred_element_type=jnp.float32)
            + t_ref[:, OFF_HEAD:OFF_HEAD + D_HEAD])              # (TB, 128)

    lane = jax.lax.broadcasted_iota(jnp.int32, head.shape, 1)
    is_pi = lane < ACTION_SIZE                   # lanes 0..64 = policy logits
    pi = jnp.where(is_pi, head, -1e30)
    m = jnp.max(pi, axis=1, keepdims=True)
    e = jnp.exp(pi - m)                          # masked lanes underflow to 0
    lse = jnp.log(jnp.sum(e, axis=1, keepdims=True))
    log_pi = pi - m - lse                        # valid on the first 65 lanes
    v = jnp.tanh(head)                           # valid on lane 65 (EUP slot)

    out_ref[...] = jnp.where(is_pi, log_pi,
                             jnp.where(lane == ACTION_SIZE, v, 0.0))


# --------------------------------------------------------------------------
# Parameter construction (PyTorch layout) and kernel-side preprocessing
# --------------------------------------------------------------------------
def init_raw_params(key):
    """Parameters in PyTorch layout (eval-mode BN running stats)."""
    def nrm(k, shape, s=0.1):
        return s * jax.random.normal(k, shape, jnp.float32)

    def uni(k, shape):
        return jax.random.uniform(k, shape, jnp.float32, minval=0.5, maxval=1.5)

    keys = iter(jax.random.split(key, 64))
    p = {}
    cins = [1, NUM_CHANNELS, NUM_CHANNELS, NUM_CHANNELS]
    for i, cin in enumerate(cins, start=1):
        p[f"conv{i}_w"] = nrm(next(keys), (NUM_CHANNELS, cin, 3, 3))
        p[f"conv{i}_b"] = nrm(next(keys), (NUM_CHANNELS,))
        p[f"bn{i}_g"] = uni(next(keys), (NUM_CHANNELS,))
        p[f"bn{i}_b"] = nrm(next(keys), (NUM_CHANNELS,))
        p[f"bn{i}_m"] = nrm(next(keys), (NUM_CHANNELS,))
        p[f"bn{i}_v"] = uni(next(keys), (NUM_CHANNELS,))

    din = NUM_CHANNELS * (BX - 4) * (BY - 4)
    p["fc1_w"] = nrm(next(keys), (128, din))
    p["fc1_b"] = nrm(next(keys), (128,))
    p["fcbn1_g"] = uni(next(keys), (128,))
    p["fcbn1_b"] = nrm(next(keys), (128,))
    p["fcbn1_m"] = nrm(next(keys), (128,))
    p["fcbn1_v"] = uni(next(keys), (128,))

    p["fc2_w"] = nrm(next(keys), (64, 128))
    p["fc2_b"] = nrm(next(keys), (64,))
    p["fcbn2_g"] = uni(next(keys), (64,))
    p["fcbn2_b"] = nrm(next(keys), (64,))
    p["fcbn2_m"] = nrm(next(keys), (64,))
    p["fcbn2_v"] = uni(next(keys), (64,))

    p["fc3_w"] = nrm(next(keys), (ACTION_SIZE, 64))
    p["fc3_b"] = nrm(next(keys), (ACTION_SIZE,))
    p["fc4_w"] = nrm(next(keys), (1, 64))
    p["fc4_b"] = nrm(next(keys), (1,))
    return p


def _fold_bn(bias, gamma, beta, mean, var):
    scale = gamma / jnp.sqrt(var + BN_EPS)
    shift = (bias - mean) * scale + beta
    return scale, shift


def _pad2(x, rows, cols):
    return jnp.pad(x, ((0, rows - x.shape[0]), (0, cols - x.shape[1])))


def _conv_matrix(w_oihw, hin, win, pad):
    """Dense (Hin*Win*Cin, Hout*Wout*Cout) matrix of a 3x3 conv (HWC flatten)."""
    cout, cin, _, _ = w_oihw.shape
    din = hin * win * cin
    basis = jnp.eye(din, dtype=jnp.float32).reshape(din, hin, win, cin)
    w_hwio = jnp.transpose(w_oihw, (2, 3, 1, 0))
    out = jax.lax.conv_general_dilated(
        basis, w_hwio, window_strides=(1, 1),
        padding=((pad, pad), (pad, pad)),
        dimension_numbers=("NHWC", "HWIO", "NHWC"))
    _, ho, wo, _ = out.shape
    return out.reshape(din, ho * wo * cout), ho, wo


def prepare_params(rp):
    """Fold BN scale into weights, build Toeplitz conv matrices, pack shifts."""
    kp = {}
    shifts = {}

    conv_cfg = [
        ("c1", "conv1", "bn1", BX, BY, 1, IN_PAD, D_C1),
        ("c2", "conv2", "bn2", BX, BY, 1, D_C1, D_C2),
        ("c3", "conv3", "bn3", BX, BY, 0, D_C2, D_C3),
        ("c4", "conv4", "bn4", BX - 2, BY - 2, 0, D_C3, D_C4),
    ]
    for name, cw, bn, hin, win, pad, din_p, dout_p in conv_cfg:
        mat, ho, wo = _conv_matrix(rp[cw + "_w"], hin, win, pad)
        scale, shift = _fold_bn(rp[cw + "_b"], rp[bn + "_g"], rp[bn + "_b"],
                                rp[bn + "_m"], rp[bn + "_v"])
        s_flat = jnp.tile(scale, ho * wo)        # HWC flatten, channel fastest
        t_flat = jnp.tile(shift, ho * wo)
        mat = mat * s_flat[None, :]              # fold BN scale into weights
        kp[name + "_m"] = _pad2(mat, din_p, dout_p)
        shifts[name] = jnp.pad(t_flat, (0, dout_p - t_flat.size))

    # conv1's shift rides on the constant-1 bias lane of the input.
    kp["c1_m"] = kp["c1_m"].at[BIAS_LANE].set(shifts.pop("c1"))

    # fc1: PyTorch weight (128, C*H*W) in (C,H,W) order -> (H,W,C) order.
    wfc1 = rp["fc1_w"].reshape(128, NUM_CHANNELS, H4, W4)
    wfc1 = jnp.transpose(wfc1, (0, 2, 3, 1)).reshape(128, -1).T     # (256, 128)
    s, t = _fold_bn(rp["fc1_b"], rp["fcbn1_g"], rp["fcbn1_b"],
                    rp["fcbn1_m"], rp["fcbn1_v"])
    kp["f1_m"] = _pad2(wfc1 * s[None, :], D_C4, D_F1)
    shifts["f1"] = jnp.pad(t, (0, D_F1 - t.size))

    # fc2: pad output dim 64 -> 128 (zeros) so the activation stays lane-dense.
    s, t = _fold_bn(rp["fc2_b"], rp["fcbn2_g"], rp["fcbn2_b"],
                    rp["fcbn2_m"], rp["fcbn2_v"])
    kp["f2_m"] = _pad2(rp["fc2_w"].T * s[None, :], D_F1, D_F2)
    shifts["f2"] = jnp.pad(t, (0, D_F2 - t.size))

    # Fused policy/value head: [fc3 | fc4] -> (128, 128).
    w_head = jnp.concatenate([rp["fc3_w"].T, rp["fc4_w"].T], axis=1)  # (64, 66)
    b_head = jnp.concatenate([rp["fc3_b"], rp["fc4_b"]])              # (66,)
    kp["head_m"] = _pad2(w_head, D_F2, D_HEAD)
    shifts["head"] = jnp.pad(b_head, (0, D_HEAD - b_head.size))

    for k in ("c1_m", "c2_m", "c3_m", "c4_m", "f1_m", "f2_m", "head_m"):
        kp[k] = kp[k].astype(MATMUL_DTYPE)

    # One packed f32 slab for all remaining shifts + head bias (one DMA).
    kp["shift"] = jnp.concatenate(
        [shifts["c2"], shifts["c3"], shifts["c4"],
         shifts["f1"], shifts["f2"], shifts["head"]]
    ).reshape(1, SHIFT_SLAB).astype(jnp.float32)
    return kp


# --------------------------------------------------------------------------
# Tiling policy (generation-aware, decided at trace time)
# --------------------------------------------------------------------------
def _pick_tile(n):
    try:
        vmem_cap = int(getattr(pltpu.get_tpu_info(), "vmem_capacity_bytes",
                               64 * 1024 * 1024))
    except Exception:
        vmem_cap = 64 * 1024 * 1024              # conservative (v7x-sized)
    big_vmem = vmem_cap >= 96 * 1024 * 1024      # v5e / v6e (128 MiB per TC)
    cap = 1024 if big_vmem else 512
    if n <= 128:
        tb = _round_up(max(n, 8), 8)
    else:
        # >= 2 grid steps so the 'parallel' batch axis can split across the
        # two TensorCores on v7x; larger tiles amortize per-step overhead.
        tb = min(cap, _round_up(pl.cdiv(n, 2), 8))
    vmem_limit = (96 if big_vmem else 48) * 1024 * 1024
    return tb, vmem_limit


# --------------------------------------------------------------------------
# Forward pass (Pallas) and pure-JAX reference
# --------------------------------------------------------------------------
@jax.jit
def model_nn_forward(x, kp):
    """x: (N, BX, BY) float32 -> (log_pi (N, action_size), v (N, 1))."""
    n = x.shape[0]
    tb, vmem_limit = _pick_tile(n)
    n_pad = _round_up(n, tb)                     # no partial / masked grid step

    # bf16 input (board values are exact in bf16), constant-1 bias lane.
    x_flat = x.reshape(n, BX * BY).astype(MATMUL_DTYPE)
    x_in = jnp.pad(x_flat, ((0, n_pad - n), (0, IN_PAD - BX * BY)))
    x_in = x_in.at[:, BIAS_LANE].set(jnp.asarray(1.0, MATMUL_DTYPE))

    weight_args = [kp["c1_m"], kp["c2_m"], kp["c3_m"], kp["c4_m"],
                   kp["f1_m"], kp["f2_m"], kp["head_m"], kp["shift"]]

    grid = (n_pad // tb,)
    in_specs = [pl.BlockSpec((tb, IN_PAD), lambda i: (i, 0))]
    # Constant index maps: weights DMA'd once, resident in VMEM across steps.
    in_specs += [pl.BlockSpec(w.shape, lambda i: (0, 0)) for w in weight_args]
    out_spec = pl.BlockSpec((tb, OUT_PAD), lambda i: (i, 0))

    flops = 2 * n_pad * sum(int(kp[k].shape[0]) * int(kp[k].shape[1])
                            for k in ("c1_m", "c2_m", "c3_m", "c4_m",
                                      "f1_m", "f2_m", "head_m"))
    wbytes = sum(int(w.size) * w.dtype.itemsize for w in weight_args)
    cost = pl.CostEstimate(
        flops=flops,
        transcendentals=n_pad * (2 * OUT_PAD + 1),
        bytes_accessed=wbytes + n_pad * (IN_PAD * 2 + OUT_PAD * 4))

    out = pl.pallas_call(
        alphazero_kernel,
        out_shape=jax.ShapeDtypeStruct((n_pad, OUT_PAD), jnp.float32),
        grid_spec=pltpu.PrefetchScalarGridSpec(
            num_scalar_prefetch=0,
            grid=grid,
            in_specs=in_specs,
            out_specs=out_spec),
        compiler_params=pltpu.CompilerParams(
            dimension_semantics=("parallel",),
            vmem_limit_bytes=vmem_limit),
        cost_estimate=cost,
    )(x_in, *weight_args)

    out = out[:n]
    return out[:, :ACTION_SIZE], out[:, ACTION_SIZE:ACTION_SIZE + 1]


def reference_forward(x, rp):
    """Pure-JAX (f32, NCHW) replica of the PyTorch module in eval mode."""
    n = x.shape[0]
    s = x.astype(jnp.float32).reshape(n, 1, BX, BY)

    def conv_bn_relu(s, w, b, g, beta, mu, var, pad):
        y = jax.lax.conv_general_dilated(
            s, w, window_strides=(1, 1), padding=((pad, pad), (pad, pad)),
            dimension_numbers=("NCHW", "OIHW", "NCHW"))
        y = y + b.reshape(1, -1, 1, 1)
        y = ((y - mu.reshape(1, -1, 1, 1))
             * (g.reshape(1, -1, 1, 1) / jnp.sqrt(var.reshape(1, -1, 1, 1) + BN_EPS))
             + beta.reshape(1, -1, 1, 1))
        return jax.nn.relu(y)

    for i, pad in ((1, 1), (2, 1), (3, 0), (4, 0)):
        s = conv_bn_relu(s, rp[f"conv{i}_w"], rp[f"conv{i}_b"], rp[f"bn{i}_g"],
                         rp[f"bn{i}_b"], rp[f"bn{i}_m"], rp[f"bn{i}_v"], pad)
    flat = s.reshape(n, -1)                        # (C,H,W) flatten, as in torch

    def fc_bn_relu(h, w, b, g, beta, mu, var):
        y = h @ w.T + b
        y = (y - mu) * (g / jnp.sqrt(var + BN_EPS)) + beta
        return jax.nn.relu(y)

    z = fc_bn_relu(flat, rp["fc1_w"], rp["fc1_b"], rp["fcbn1_g"], rp["fcbn1_b"],
                   rp["fcbn1_m"], rp["fcbn1_v"])
    z = fc_bn_relu(z, rp["fc2_w"], rp["fc2_b"], rp["fcbn2_g"], rp["fcbn2_b"],
                   rp["fcbn2_m"], rp["fcbn2_v"])
    pi = z @ rp["fc3_w"].T + rp["fc3_b"]
    v = z @ rp["fc4_w"].T + rp["fc4_b"]
    return jax.nn.log_softmax(pi, axis=1), jnp.tanh(v)


if __name__ == "__main__":
    key = jax.random.PRNGKey(0)
    pkey, xkey = jax.random.split(key)
    raw = init_raw_params(pkey)
    params = prepare_params(raw)

    x = jax.random.normal(xkey, (2, BX, BY), dtype=jnp.float32)

    log_pi, v = model_nn_forward(x, params)
    jax.block_until_ready((log_pi, v))

    assert log_pi.shape == (2, ACTION_SIZE)
    assert v.shape == (2, 1)
    assert bool(jnp.all(jnp.isfinite(log_pi))) and bool(jnp.all(jnp.isfinite(v)))
    # log_softmax sanity: probabilities sum to ~1
    assert bool(jnp.all(jnp.abs(jnp.sum(jnp.exp(log_pi), axis=1) - 1.0) < 1e-4))

    # Numerical check vs. a pure-JAX f32 reference (loose tolerance: kernel
    # matmuls/activations run in bf16 with f32 accumulation).
    ref_log_pi, ref_v = reference_forward(x, raw)
    err_pi = float(jnp.max(jnp.abs(log_pi - ref_log_pi)))
    err_v = float(jnp.max(jnp.abs(v - ref_v)))
    tol_pi, tol_v = (0.5, 0.2) if MATMUL_DTYPE == jnp.bfloat16 else (2e-3, 1e-3)
    assert err_pi < tol_pi and err_v < tol_v, (err_pi, err_v)

    print("KERNEL_OK")
</pallas_src>

<mosaic_0001>
module attributes {stable_mosaic.version = 11 : i64} {
  func.func @alphazero_kernel(%arg0: i32, %arg1: memref<8x128xbf16, #tpu.memory_space<vmem>>, %arg2: memref<128x1024xbf16, #tpu.memory_space<vmem>>, %arg3: memref<1024x1024xbf16, #tpu.memory_space<vmem>>, %arg4: memref<1024x640xbf16, #tpu.memory_space<vmem>>, %arg5: memref<640x256xbf16, #tpu.memory_space<vmem>>, %arg6: memref<256x128xbf16, #tpu.memory_space<vmem>>, %arg7: memref<128x128xbf16, #tpu.memory_space<vmem>>, %arg8: memref<128x128xbf16, #tpu.memory_space<vmem>>, %arg9: memref<1x2304xf32, #tpu.memory_space<vmem>>, %arg10: memref<8x128xf32, #tpu.memory_space<vmem>>) attributes {dimension_semantics = [#tpu.dimension_semantics<parallel>], iteration_bounds = array<i64: 1>, scalar_prefetch = 0 : i64, scratch_operands = 0 : i64, tpu.core_type = #tpu.core_type<tc>, window_params = [{transform_indices = @transform_0, window_bounds = array<i64: 8, 128>}, {pipeline_mode = #tpu.pipeline_mode<synchronous>, transform_indices = @transform_1, window_bounds = array<i64: 128, 1024>}, {pipeline_mode = #tpu.pipeline_mode<synchronous>, transform_indices = @transform_2, window_bounds = array<i64: 1024, 1024>}, {pipeline_mode = #tpu.pipeline_mode<synchronous>, transform_indices = @transform_3, window_bounds = array<i64: 1024, 640>}, {pipeline_mode = #tpu.pipeline_mode<synchronous>, transform_indices = @transform_4, window_bounds = array<i64: 640, 256>}, {pipeline_mode = #tpu.pipeline_mode<synchronous>, transform_indices = @transform_5, window_bounds = array<i64: 256, 128>}, {pipeline_mode = #tpu.pipeline_mode<synchronous>, transform_indices = @transform_6, window_bounds = array<i64: 128, 128>}, {pipeline_mode = #tpu.pipeline_mode<synchronous>, transform_indices = @transform_7, window_bounds = array<i64: 128, 128>}, {pipeline_mode = #tpu.pipeline_mode<synchronous>, transform_indices = @transform_8, window_bounds = array<i64: 1, 2304>}, {transform_indices = @transform_9, window_bounds = array<i64: 8, 128>}]} {
    %c0 = arith.constant 0 : index
    %c0_0 = arith.constant 0 : index
    %0 = vector.load %arg1[%c0, %c0_0] : memref<8x128xbf16, #tpu.memory_space<vmem>>, vector<8x128xbf16>
    %c0_1 = arith.constant 0 : index
    %c0_2 = arith.constant 0 : index
    %1 = vector.load %arg2[%c0_1, %c0_2] : memref<128x1024xbf16, #tpu.memory_space<vmem>>, vector<128x1024xbf16>
    %cst = arith.constant dense<0.000000e+00> : vector<8x1024xf32>
    %2 = tpu.matmul %0, %1, %cst {dimension_numbers = #tpu.dot_dimension_numbers<[1], [0], [0], [1], [0, 0, 1, 1], [], []>} : vector<8x128xbf16>, vector<128x1024xbf16>, vector<8x1024xf32> -> vector<8x1024xf32>
    %cst_3 = arith.constant 0.000000e+00 : f32
    %3 = vector.broadcast %cst_3 : f32 to vector<8x1024xf32>
    %4 = arith.maximumf %2, %3 : vector<8x1024xf32>
    %5 = arith.truncf %4 : vector<8x1024xf32> to vector<8x1024xbf16>
    %c0_4 = arith.constant 0 : index
    %c0_5 = arith.constant 0 : index
    %6 = vector.load %arg3[%c0_4, %c0_5] : memref<1024x1024xbf16, #tpu.memory_space<vmem>>, vector<1024x1024xbf16>
    %cst_6 = arith.constant dense<0.000000e+00> : vector<8x1024xf32>
    %7 = tpu.matmul %5, %6, %cst_6 {dimension_numbers = #tpu.dot_dimension_numbers<[1], [0], [0], [1], [0, 0, 1, 1], [], []>} : vector<8x1024xbf16>, vector<1024x1024xbf16>, vector<8x1024xf32> -> vector<8x1024xf32>
    %c0_7 = arith.constant 0 : index
    %c0_8 = arith.constant 0 : index
    %8 = vector.load %arg9[%c0_7, %c0_8] : memref<1x2304xf32, #tpu.memory_space<vmem>>, vector<1x1024xf32>
    %9 = vector.broadcast %8 : vector<1x1024xf32> to vector<8x1024xf32>
    %10 = arith.addf %7, %9 : vector<8x1024xf32>
    %cst_9 = arith.constant 0.000000e+00 : f32
    %11 = vector.broadcast %cst_9 : f32 to vector<8x1024xf32>
    %12 = arith.maximumf %10, %11 : vector<8x1024xf32>
    %13 = arith.truncf %12 : vector<8x1024xf32> to vector<8x1024xbf16>
    %c0_10 = arith.constant 0 : index
    %c0_11 = arith.constant 0 : index
    %14 = vector.load %arg4[%c0_10, %c0_11] : memref<1024x640xbf16, #tpu.memory_space<vmem>>, vector<1024x640xbf16>
    %cst_12 = arith.constant dense<0.000000e+00> : vector<8x640xf32>
    %15 = tpu.matmul %13, %14, %cst_12 {dimension_numbers = #tpu.dot_dimension_numbers<[1], [0], [0], [1], [0, 0, 1, 1], [], []>} : vector<8x1024xbf16>, vector<1024x640xbf16>, vector<8x640xf32> -> vector<8x640xf32>
    %c0_13 = arith.constant 0 : index
    %c1024 = arith.constant 1024 : index
    %16 = vector.load %arg9[%c0_13, %c1024] : memref<1x2304xf32, #tpu.memory_space<vmem>>, vector<1x640xf32>
    %17 = vector.broadcast %16 : vector<1x640xf32> to vector<8x640xf32>
    %18 = arith.addf %15, %17 : vector<8x640xf32>
    %cst_14 = arith.constant 0.000000e+00 : f32
    %19 = vector.broadcast %cst_14 : f32 to vector<8x640xf32>
    %20 = arith.maximumf %18, %19 : vector<8x640xf32>
    %21 = arith.truncf %20 : vector<8x640xf32> to vector<8x640xbf16>
    %c0_15 = arith.constant 0 : index
    %c0_16 = arith.constant 0 : index
    %22 = vector.load %arg5[%c0_15, %c0_16] : memref<640x256xbf16, #tpu.memory_space<vmem>>, vector<640x256xbf16>
    %cst_17 = arith.constant dense<0.000000e+00> : vector<8x256xf32>
    %23 = tpu.matmul %21, %22, %cst_17 {dimension_numbers = #tpu.dot_dimension_numbers<[1], [0], [0], [1], [0, 0, 1, 1], [], []>} : vector<8x640xbf16>, vector<640x256xbf16>, vector<8x256xf32> -> vector<8x256xf32>
    %c0_18 = arith.constant 0 : index
    %c1664 = arith.constant 1664 : index
    %24 = vector.load %arg9[%c0_18, %c1664] : memref<1x2304xf32, #tpu.memory_space<vmem>>, vector<1x256xf32>
    %25 = vector.broadcast %24 : vector<1x256xf32> to vector<8x256xf32>
    %26 = arith.addf %23, %25 : vector<8x256xf32>
    %cst_19 = arith.constant 0.000000e+00 : f32
    %27 = vector.broadcast %cst_19 : f32 to vector<8x256xf32>
    %28 = arith.maximumf %26, %27 : vector<8x256xf32>
    %29 = arith.truncf %28 : vector<8x256xf32> to vector<8x256xbf16>
    %c0_20 = arith.constant 0 : index
    %c0_21 = arith.constant 0 : index
    %30 = vector.load %arg6[%c0_20, %c0_21] : memref<256x128xbf16, #tpu.memory_space<vmem>>, vector<256x128xbf16>
    %cst_22 = arith.constant dense<0.000000e+00> : vector<8x128xf32>
    %31 = tpu.matmul %29, %30, %cst_22 {dimension_numbers = #tpu.dot_dimension_numbers<[1], [0], [0], [1], [0, 0, 1, 1], [], []>} : vector<8x256xbf16>, vector<256x128xbf16>, vector<8x128xf32> -> vector<8x128xf32>
    %c0_23 = arith.constant 0 : index
    %c1920 = arith.constant 1920 : index
    %32 = vector.load %arg9[%c0_23, %c1920] : memref<1x2304xf32, #tpu.memory_space<vmem>>, vector<1x128xf32>
    %33 = vector.broadcast %32 : vector<1x128xf32> to vector<8x128xf32>
    %34 = arith.addf %31, %33 : vector<8x128xf32>
    %cst_24 = arith.constant 0.000000e+00 : f32
    %35 = vector.broadcast %cst_24 : f32 to vector<8x128xf32>
    %36 = arith.maximumf %34, %35 : vector<8x128xf32>
    %37 = arith.truncf %36 : vector<8x128xf32> to vector<8x128xbf16>
    %c0_25 = arith.constant 0 : index
    %c0_26 = arith.constant 0 : index
    %38 = vector.load %arg7[%c0_25, %c0_26] : memref<128x128xbf16, #tpu.memory_space<vmem>>, vector<128x128xbf16>
    %cst_27 = arith.constant dense<0.000000e+00> : vector<8x128xf32>
    %39 = tpu.matmul %37, %38, %cst_27 {dimension_numbers = #tpu.dot_dimension_numbers<[1], [0], [0], [1], [0, 0, 1, 1], [], []>} : vector<8x128xbf16>, vector<128x128xbf16>, vector<8x128xf32> -> vector<8x128xf32>
    %c0_28 = arith.constant 0 : index
    %c2048 = arith.constant 2048 : index
    %40 = vector.load %arg9[%c0_28, %c2048] : memref<1x2304xf32, #tpu.memory_space<vmem>>, vector<1x128xf32>
    %41 = vector.broadcast %40 : vector<1x128xf32> to vector<8x128xf32>
    %42 = arith.addf %39, %41 : vector<8x128xf32>
    %cst_29 = arith.constant 0.000000e+00 : f32
    %43 = vector.broadcast %cst_29 : f32 to vector<8x128xf32>
    %44 = arith.maximumf %42, %43 : vector<8x128xf32>
    %45 = arith.truncf %44 : vector<8x128xf32> to vector<8x128xbf16>
    %c0_30 = arith.constant 0 : index
    %c0_31 = arith.constant 0 : index
    %46 = vector.load %arg8[%c0_30, %c0_31] : memref<128x128xbf16, #tpu.memory_space<vmem>>, vector<128x128xbf16>
    %cst_32 = arith.constant dense<0.000000e+00> : vector<8x128xf32>
    %47 = tpu.matmul %45, %46, %cst_32 {dimension_numbers = #tpu.dot_dimension_numbers<[1], [0], [0], [1], [0, 0, 1, 1], [], []>} : vector<8x128xbf16>, vector<128x128xbf16>, vector<8x128xf32> -> vector<8x128xf32>
    %c0_33 = arith.constant 0 : index
    %c2176 = arith.constant 2176 : index
    %48 = vector.load %arg9[%c0_33, %c2176] : memref<1x2304xf32, #tpu.memory_space<vmem>>, vector<1x128xf32>
    %49 = vector.broadcast %48 : vector<1x128xf32> to vector<8x128xf32>
    %50 = arith.addf %47, %49 : vector<8x128xf32>
    %51 = tpu.iota {dimensions = array<i32: 1>} : vector<8x128xi32>
    %c65_i32 = arith.constant 65 : i32
    %52 = vector.broadcast %c65_i32 : i32 to vector<8x128xi32>
    %53 = arith.cmpi slt, %51, %52 : vector<8x128xi32>
    %cst_34 = arith.constant -1.000000e+30 : f32
    %54 = vector.broadcast %cst_34 : f32 to vector<8x128xf32>
    %55 = arith.select %53, %50, %54 : vector<8x128xi1>, vector<8x128xf32>
    %cst_35 = arith.constant dense<0xFF800000> : vector<8xf32>
    %56 = vector.multi_reduction <maximumf>, %55, %cst_35 [1] : vector<8x128xf32> to vector<8xf32>
    %57 = vector.shape_cast %56 : vector<8xf32> to vector<8x1xf32>
    %58 = vector.broadcast %57 : vector<8x1xf32> to vector<8x128xf32>
    %59 = arith.subf %55, %58 : vector<8x128xf32>
    %60 = math.exp %59 : vector<8x128xf32>
    %cst_36 = arith.constant dense<0.000000e+00> : vector<8xf32>
    %61 = vector.multi_reduction <add>, %60, %cst_36 [1] : vector<8x128xf32> to vector<8xf32>
    %62 = vector.shape_cast %61 : vector<8xf32> to vector<8x1xf32>
    %63 = math.log %62 : vector<8x1xf32>
    %64 = vector.broadcast %57 : vector<8x1xf32> to vector<8x128xf32>
    %65 = arith.subf %55, %64 : vector<8x128xf32>
    %66 = vector.broadcast %63 : vector<8x1xf32> to vector<8x128xf32>
    %67 = arith.subf %65, %66 : vector<8x128xf32>
    %68 = math.tanh %50 : vector<8x128xf32>
    %c65_i32_37 = arith.constant 65 : i32
    %69 = vector.broadcast %c65_i32_37 : i32 to vector<8x128xi32>
    %70 = arith.cmpi eq, %51, %69 : vector<8x128xi32>
    %cst_38 = arith.constant 0.000000e+00 : f32
    %71 = vector.broadcast %cst_38 : f32 to vector<8x128xf32>
    %72 = arith.select %70, %68, %71 : vector<8x128xi1>, vector<8x128xf32>
    %73 = arith.select %53, %67, %72 : vector<8x128xi1>, vector<8x128xf32>
    %c0_39 = arith.constant 0 : index
    %c0_40 = arith.constant 0 : index
    %74 = vector.load %arg10[%c0_39, %c0_40] : memref<8x128xf32, #tpu.memory_space<vmem>>, vector<8x128xf32>
    tpu.vector_store %arg10[%c0_39, %c0_40], %73 {strides = array<i32>} : memref<8x128xf32, #tpu.memory_space<vmem>>, vector<8x128xf32>,
    return
  }
  func.func @transform_0(%arg0: i32) -> (i32, i32) {
    %c0_i32 = arith.constant 0 : i32
    %c0_i32_0 = arith.constant 0 : i32
    return %arg0, %c0_i32 : i32, i32
  }
  func.func @transform_1(%arg0: i32) -> (i32, i32) {
    %c0_i32 = arith.constant 0 : i32
    %c0_i32_0 = arith.constant 0 : i32
    %c0_i32_1 = arith.constant 0 : i32
    return %c0_i32, %c0_i32_0 : i32, i32
  }
  func.func @transform_2(%arg0: i32) -> (i32, i32) {
    %c0_i32 = arith.constant 0 : i32
    %c0_i32_0 = arith.constant 0 : i32
    %c0_i32_1 = arith.constant 0 : i32
    return %c0_i32, %c0_i32_0 : i32, i32
  }
  func.func @transform_3(%arg0: i32) -> (i32, i32) {
    %c0_i32 = arith.constant 0 : i32
    %c0_i32_0 = arith.constant 0 : i32
    %c0_i32_1 = arith.constant 0 : i32
    return %c0_i32, %c0_i32_0 : i32, i32
  }
  func.func @transform_4(%arg0: i32) -> (i32, i32) {
    %c0_i32 = arith.constant 0 : i32
    %c0_i32_0 = arith.constant 0 : i32
    %c0_i32_1 = arith.constant 0 : i32
    return %c0_i32, %c0_i32_0 : i32, i32
  }
  func.func @transform_5(%arg0: i32) -> (i32, i32) {
    %c0_i32 = arith.constant 0 : i32
    %c0_i32_0 = arith.constant 0 : i32
    %c0_i32_1 = arith.constant 0 : i32
    return %c0_i32, %c0_i32_0 : i32, i32
  }
  func.func @transform_6(%arg0: i32) -> (i32, i32) {
    %c0_i32 = arith.constant 0 : i32
    %c0_i32_0 = arith.constant 0 : i32
    %c0_i32_1 = arith.constant 0 : i32
    return %c0_i32, %c0_i32_0 : i32, i32
  }
  func.func @transform_7(%arg0: i32) -> (i32, i32) {
    %c0_i32 = arith.constant 0 : i32
    %c0_i32_0 = arith.constant 0 : i32
    %c0_i32_1 = arith.constant 0 : i32
    return %c0_i32, %c0_i32_0 : i32, i32
  }
  func.func @transform_8(%arg0: i32) -> (i32, i32) {
    %c0_i32 = arith.constant 0 : i32
    %c0_i32_0 = arith.constant 0 : i32
    %c0_i32_1 = arith.constant 0 : i32
    return %c0_i32, %c0_i32_0 : i32, i32
  }
  func.func @transform_9(%arg0: i32) -> (i32, i32) {
    %c0_i32 = arith.constant 0 : i32
    %c0_i32_0 = arith.constant 0 : i32
    return %arg0, %c0_i32 : i32, i32
  }
}

</mosaic_0001>

<bundles_post_ra>
// kernel: model_nn_forward.1
= control target key start
LH: loop header
LB: loop body
LE: loop exit
PB: predicated region body
PF: predicated region fallthrough
CT: control target
= control target key end

     0   :  { %14 = vsyncpa [#allocation3], 0  ;;  %s10473_s0 = inlined_call_operand.vmem [shape: bf16[8,128], index: 0, kind: input, shape index: {}]   ;;  %s10474_s1 = inlined_call_operand.hbm [shape: bf16[128,1024], index: 1, kind: input, shape index: {}]   ;;  %s10475_s2 = inlined_call_operand.hbm [shape: bf16[1024,1024], index: 2, kind: input, shape index: {}]   ;;  %s10476_s3 = inlined_call_operand.hbm [shape: bf16[1024,640], index: 3, kind: input, shape index: {}]   ;;  %s10477_s4 = inlined_call_operand.hbm [shape: bf16[640,256], index: 4, kind: input, shape index: {}]   ;;  %s10478_s5 = inlined_call_operand.hbm [shape: bf16[256,128], index: 5, kind: input, shape index: {}]   ;;  %s10479_s6 = inlined_call_operand.hbm [shape: bf16[128,128], index: 6, kind: input, shape index: {}]   ;;  %s10480_s7 = inlined_call_operand.hbm [shape: bf16[128,128], index: 7, kind: input, shape index: {}]   ;;  %s10481_s8 = inlined_call_operand.hbm [shape: f32[1,2304], index: 8, kind: input, shape index: {}]   ;;  %s10482_s9 = inlined_call_operand.vmem [shape: f32[8,128], index: 9, kind: output, shape index: {}]  }
   0x1   :  { %15 = vsyncpa [#allocation5], 0 }
   0x2   :  { %16 = vsyncpa [#allocation8], 0 }
   0x3   :  { %17 = vsyncpa [#allocation11], 0 }
   0x4   :  { %18 = vsyncpa [#allocation14], 0  ;;  %s10087_s30 = smov [#allocation4]   ;;  %s10088_s11 = smov [#allocation7]  }
   0x5   :  { %s38_s10 = sshll.u32 %s10087_s30, 4  ;;  %s62_s12 = sshll.u32 %s10088_s11, 4  ;;  %s39_s10 = int_to_ptr.vmem [resolvable:$true] %s38_s10  ;;  %s63_s12 = int_to_ptr.vmem [resolvable:$true] %s62_s12 }
   0x6   :  { %s9925_s13 = scalar_lea.vmem %s39_s10, 65536  ;;  %p9930_p1 = scmp.lt.s32.totalorder %s39_s10, %s39_s10 }
   0x7   :  { %p9926_p0 = scmp.ne.s32.totalorder %s39_s10, %s9925_s13  ;;  %p9931_p2 = scmp.lt.s32.totalorder %s9925_s13, %s9925_s13 }
   0x9   :  { %p9932_p3 = por %p9931_p2, %p9930_p1 }
   0xb   :  { %p9933_p4 = pnand %p9932_p3, %p9926_p0 }
   0xd   :  { %9936 = shalt.err (!%p9933_p4)
}
   0xe   :  { %s10089_s14 = smov 512   ;;  %s10090_s15 = smov 32  }
   0xf   :  { %44 = dma.hbm_to_vmem [thread:$0]  %s10475_s2, 65536, %s39_s10, [#allocation5], %s10089_s14, %s10089_s14, %s10090_s15  }
  0x10   :  { %s9945_s18 = scalar_lea.vmem %s63_s12, 10240  ;;  %p9950_p6 = scmp.lt.s32.totalorder %s63_s12, %s63_s12 }
  0x11   :  { %p9946_p5 = scmp.ne.s32.totalorder %s63_s12, %s9945_s18  ;;  %p9951_p7 = scmp.lt.s32.totalorder %s9945_s18, %s9945_s18 }
  0x13   :  { %p9952_p8 = por %p9951_p7, %p9950_p6 }
  0x15   :  { %p9953_p9 = pnand %p9952_p8, %p9946_p5 }
  0x17   :  { %9956 = shalt.err (!%p9953_p9)
}
  0x18   :  { %s10091_s19 = smov 128   ;;  %s10092_s20 = smov 8  }
  0x19   :  { %68 = dma.hbm_to_vmem [thread:$0]  %s10477_s4, 10240, %s63_s12, [#allocation8], %s10091_s19, %s10091_s19, %s10092_s20  }
  0x1a   :  { %s10093_s23 = smov [#allocation10]   ;;  %s10094_s25 = smov [#allocation2]  }
  0x1b   :  { %s86_s24 = sshll.u32 %s10093_s23, 4  ;;  %s26_s26 = sshll.u32 %s10094_s25, 4  ;;  %s87_s24 = int_to_ptr.vmem [resolvable:$true] %s86_s24  ;;  %s27_s26 = int_to_ptr.vmem [resolvable:$true] %s26_s26 }
  0x1c   :  { %s9965_s2 = scalar_lea.vmem %s87_s24, 1024  ;;  %p9970_p11 = scmp.lt.s32.totalorder %s87_s24, %s87_s24 }
  0x1d   :  { %p9966_p10 = scmp.ne.s32.totalorder %s87_s24, %s9965_s2  ;;  %p9971_p12 = scmp.lt.s32.totalorder %s9965_s2, %s9965_s2 }
  0x1f   :  { %p9972_p13 = por %p9971_p12, %p9970_p11 }
  0x21   :  { %p9973_p0 = pnand %p9972_p13, %p9966_p10 }
  0x23   :  { %9976 = shalt.err (!%p9973_p0)
}
  0x24   :  { %s10095_s27 = smov 64   ;;  %s10096_s28 = smov 4  }
  0x25   :  { %92 = dma.hbm_to_vmem [thread:$0]  %s10479_s6, 1024, %s87_s24, [#allocation11], %s10095_s27, %s10095_s27, %s10096_s28  }
  0x26   :  { %s9985_s30 = scalar_lea.vmem %s27_s26, 8192  ;;  %p9990_p2 = scmp.lt.s32.totalorder %s27_s26, %s27_s26 }
  0x27   :  { %p9986_p1 = scmp.ne.s32.totalorder %s27_s26, %s9985_s30  ;;  %p9991_p3 = scmp.lt.s32.totalorder %s9985_s30, %s9985_s30 }
  0x29   :  { %p9992_p4 = por %p9991_p3, %p9990_p2 }
  0x2b   :  { %p9993_p5 = pnand %p9992_p4, %p9986_p1 }
  0x2d   :  { %9996 = shalt.err (!%p9993_p5)
}
  0x2e   :  { %32 = dma.hbm_to_vmem [thread:$0]  %s10474_s1, 8192, %s27_s26, [#allocation3], %s10089_s14, %s10089_s14, %s10090_s15  }
  0x2f   :  { %s10097_s12 = smov [#allocation6]  }
  0x30   :  { %s50_s13 = sshll.u32 %s10097_s12, 4  ;;  %s51_s13 = int_to_ptr.vmem [resolvable:$true] %s50_s13 }
  0x31   :  { %s10005_s16 = scalar_lea.vmem %s51_s13, 40960  ;;  %p10010_p7 = scmp.lt.s32.totalorder %s51_s13, %s51_s13 }
  0x32   :  { %p10006_p6 = scmp.ne.s32.totalorder %s51_s13, %s10005_s16  ;;  %p10011_p8 = scmp.lt.s32.totalorder %s10005_s16, %s10005_s16 }
  0x34   :  { %p10012_p9 = por %p10011_p8, %p10010_p7 }
  0x36   :  { %p10013_p10 = pnand %p10012_p9, %p10006_p6 }
  0x38   :  { %10016 = shalt.err (!%p10013_p10)
}
  0x39   :  { %s10098_s6 = smov 320   ;;  %s10099_s17 = smov 20  }
  0x3a   :  { %56 = dma.hbm_to_vmem [thread:$0]  %s10476_s3, 40960, %s51_s13, [#allocation5], %s10098_s6, %s10098_s6, %s10099_s17  }
  0x3b   :  { %s10100_s20 = smov [#allocation9]   ;;  %s10101_s1 = smov [#allocation12]  }
  0x3c   :  { %s74_s21 = sshll.u32 %s10100_s20, 4  ;;  %s98_s14 = sshll.u32 %s10101_s1, 4  ;;  %s75_s21 = int_to_ptr.vmem [resolvable:$true] %s74_s21  ;;  %s99_s14 = int_to_ptr.vmem [resolvable:$true] %s98_s14 }
  0x3d   :  { %s10025_s15 = scalar_lea.vmem %s75_s21, 2048  ;;  %p10030_p12 = scmp.lt.s32.totalorder %s75_s21, %s75_s21 }
  0x3e   :  { %p10026_p11 = scmp.ne.s32.totalorder %s75_s21, %s10025_s15  ;;  %p10031_p13 = scmp.lt.s32.totalorder %s10025_s15, %s10025_s15 }
  0x40   :  { %p10032_p0 = por %p10031_p13, %p10030_p12 }
  0x42   :  { %p10033_p1 = pnand %p10032_p0, %p10026_p11 }
  0x44   :  { %10036 = shalt.err (!%p10033_p1)
}
  0x45   :  { %80 = dma.hbm_to_vmem [thread:$0]  %s10478_s5, 2048, %s75_s21, [#allocation8], %s10095_s27, %s10095_s27, %s10096_s28  }
  0x46   :  { %s10045_s3 = scalar_lea.vmem %s99_s14, 1024  ;;  %p10050_p3 = scmp.lt.s32.totalorder %s99_s14, %s99_s14 }
  0x47   :  { %p10046_p2 = scmp.ne.s32.totalorder %s99_s14, %s10045_s3  ;;  %p10051_p4 = scmp.lt.s32.totalorder %s10045_s3, %s10045_s3 }
  0x49   :  { %p10052_p5 = por %p10051_p4, %p10050_p3 }
  0x4b   :  { %p10053_p6 = pnand %p10052_p5, %p10046_p2 }
  0x4d   :  { %10056 = shalt.err (!%p10053_p6)
}
  0x4e   :  { %104 = dma.hbm_to_vmem [thread:$0]  %s10480_s7, 1024, %s99_s14, [#allocation11], %s10095_s27, %s10095_s27, %s10096_s28  }
  0x4f   :  { %s10102_s26 = smov [#allocation13]  }
  0x50   :  { %s111_s2 = sshll.u32 %s10102_s26, 4  ;;  %s112_s2 = int_to_ptr.vmem [resolvable:$true] %s111_s2 }
  0x51   :  { %s10065_s29 = scalar_lea.vmem %s112_s2, 288  ;;  %p10070_p8 = scmp.lt.s32.totalorder %s112_s2, %s112_s2 }
  0x52   :  { %p10066_p7 = scmp.ne.s32.totalorder %s112_s2, %s10065_s29  ;;  %p10071_p9 = scmp.lt.s32.totalorder %s10065_s29, %s10065_s29 }
  0x54   :  { %p10072_p10 = por %p10071_p9, %p10070_p8 }
  0x56   :  { %p10073_p11 = pnand %p10072_p10, %p10066_p7 }
  0x58   :  { %10076 = shalt.err (!%p10073_p11)
}
  0x59   :  { %114 = dma.hbm_to_vmem [thread:$0]  %s10481_s8, 288, %s112_s2, [#allocation14]  }
  0x5a   :  { %10077 = dma.done.wait [#allocation3], 8192  }
  0x5b   :  { %10078 = vsyncadd [#allocation3], 4294959104 }
  0x5c   :  { %10079 = dma.done.wait [#allocation5], 106496  }
  0x5d   :  { %10080 = vsyncadd [#allocation5], 4294860800 }
  0x5e   :  { %10081 = dma.done.wait [#allocation8], 12288  }
  0x5f   :  { %10082 = vsyncadd [#allocation8], 4294955008 }
  0x60   :  { %10083 = dma.done.wait [#allocation11], 2048  }
  0x61   :  { %10084 = vsyncadd [#allocation11], 4294965248 }
  0x62   :  { %10085 = dma.done.wait [#allocation14], 288  }
  0x63   :  { %10086 = vsyncadd [#allocation14], 4294967008  ;;  %v10103_v0 = vmov 0   ;;  %v197_v1 = vld [vmem:[#allocation2 + $0x1c0] sm:$0xff]  ;;  %v198_v3 = vld [vmem:[#allocation2 + $0x1c8] sm:$0xff]  ;;  %vm10105_vm0 = vmmov 0  }
  0x64   :  { %557 = vmatprep.mubr.bf16.mxu0 %v10103_v0  ;;  %598 = vmatprep.mubr.bf16.mxu1 %v10103_v0  ;;  %v201_v2 = vld [vmem:[#allocation2 + $0x1e0] sm:$0xff]  ;;  %v202_v5 = vld [vmem:[#allocation2 + $0x1e8] sm:$0xff]  ;;  %v199_v63 = vld [vmem:[#allocation2 + $0x1d0] sm:$0xff] }
  0x65   :  { %v8169_v4 = vcombine.high %v197_v1, %v201_v2  ;;  %v8168_v6 = vcombine.low %v197_v1, %v201_v2  ;;  %v189_v7 = vld [vmem:[#allocation2 + $0x180] sm:$0xff]  ;;  %v8171_v9 = vcombine.high %v198_v3, %v202_v5  ;;  %v8170_v10 = vcombine.low %v198_v3, %v202_v5  ;;  %v190_v12 = vld [vmem:[#allocation2 + $0x188] sm:$0xff]  ;;  %v203_v1 = vld [vmem:[#allocation2 + $0x1f0] sm:$0xff] }
  0x66   :  { %v193_v8 = vld [vmem:[#allocation2 + $0x1a0] sm:$0xff]  ;;  %v194_v13 = vld [vmem:[#allocation2 + $0x1a8] sm:$0xff]  ;;  %v200_v2 = vld [vmem:[#allocation2 + $0x1d8] sm:$0xff] }
  0x67   :  { %v8161_v11 = vcombine.high %v189_v7, %v193_v8  ;;  %v181_v14 = vld [vmem:[#allocation2 + $0x140] sm:$0xff]  ;;  %525 = vmatprep.subr.bf16.mxu0 %v8169_v4  ;;  %v8163_v15 = vcombine.high %v190_v12, %v194_v13  ;;  %v182_v17 = vld [vmem:[#allocation2 + $0x148] sm:$0xff]  ;;  %566 = vmatprep.subr.bf16.mxu1 %v8171_v9  ;;  %v8160_v19 = vcombine.low %v189_v7, %v193_v8  ;;  %v204_v3 = vld [vmem:[#allocation2 + $0x1f8] sm:$0xff] }
  0x68   :  { %v185_v16 = vld [vmem:[#allocation2 + $0x160] sm:$0xff]  ;;  %v186_v18 = vld [vmem:[#allocation2 + $0x168] sm:$0xff]  ;;  %526 = vmatpush1.bf16.msra.mxu0 %v8168_v6  ;;  %567 = vmatpush1.bf16.msra.mxu1 %v8170_v10  ;;  %v8162_v20 = vcombine.low %v190_v12, %v194_v13  ;;  %v8173_v6 = vcombine.high %v199_v63, %v203_v1  ;;  %v8175_v7 = vcombine.high %v200_v2, %v204_v3  ;;  %v191_v8 = vld [vmem:[#allocation2 + $0x190] sm:$0xff] }
  0x69   :  { %527 = vmatprep.subr.bf16.mxu0 %v8161_v11  ;;  %v8153_v21 = vcombine.high %v181_v14, %v185_v16  ;;  %568 = vmatprep.subr.bf16.mxu1 %v8163_v15  ;;  %v8155_v22 = vcombine.high %v182_v17, %v186_v18  ;;  %v173_v23 = vld [vmem:[#allocation2 + $0x100] sm:$0xff]  ;;  %v174_v25 = vld [vmem:[#allocation2 + $0x108] sm:$0xff]  ;;  %v8152_v27 = vcombine.low %v181_v14, %v185_v16  ;;  %v195_v9 = vld [vmem:[#allocation2 + $0x1b0] sm:$0xff] }
  0x6a   :  { %v177_v24 = vld [vmem:[#allocation2 + $0x120] sm:$0xff]  ;;  %v178_v26 = vld [vmem:[#allocation2 + $0x128] sm:$0xff]  ;;  %v8154_v28 = vcombine.low %v182_v17, %v186_v18  ;;  %v192_v10 = vld [vmem:[#allocation2 + $0x198] sm:$0xff]  ;;  %v8172_v13 = vcombine.low %v199_v63, %v203_v1  ;;  %v8174_v14 = vcombine.low %v200_v2, %v204_v3  ;;  %v8165_v15 = vcombine.high %v191_v8, %v195_v9 }
  0x6b   :  { %v8145_v29 = vcombine.high %v173_v23, %v177_v24  ;;  %v8147_v30 = vcombine.high %v174_v25, %v178_v26  ;;  %v165_v31 = vld [vmem:[#allocation2 + $0xc0] sm:$0xff]  ;;  %v166_v33 = vld [vmem:[#allocation2 + $0xc8] sm:$0xff]  ;;  %v8144_v35 = vcombine.low %v173_v23, %v177_v24  ;;  %v8146_v36 = vcombine.low %v174_v25, %v178_v26  ;;  %v196_v11 = vld [vmem:[#allocation2 + $0x1b8] sm:$0xff] }
  0x6c   :  { %528 = vmatpush1.bf16.msra.mxu0 %v8160_v19  ;;  %569 = vmatpush1.bf16.msra.mxu1 %v8162_v20  ;;  %v169_v32 = vld [vmem:[#allocation2 + $0xe0] sm:$0xff]  ;;  %v170_v34 = vld [vmem:[#allocation2 + $0xe8] sm:$0xff]  ;;  %v8167_v16 = vcombine.high %v192_v10, %v196_v11  ;;  %v183_v17 = vld [vmem:[#allocation2 + $0x150] sm:$0xff] }
  0x6d   :  { %529 = vmatprep.subr.bf16.mxu0 %v8153_v21  ;;  %570 = vmatprep.subr.bf16.mxu1 %v8155_v22  ;;  %v8137_v37 = vcombine.high %v165_v31, %v169_v32  ;;  %v8139_v38 = vcombine.high %v166_v33, %v170_v34  ;;  %v157_v39 = vld [vmem:[#allocation2 + $0x80] sm:$0xff]  ;;  %v158_v41 = vld [vmem:[#allocation2 + $0x88] sm:$0xff]  ;;  %v8136_v43 = vcombine.low %v165_v31, %v169_v32  ;;  %v187_v18 = vld [vmem:[#allocation2 + $0x170] sm:$0xff] }
  0x6e   :  { %v161_v40 = vld [vmem:[#allocation2 + $0xa0] sm:$0xff]  ;;  %v162_v42 = vld [vmem:[#allocation2 + $0xa8] sm:$0xff]  ;;  %v8138_v44 = vcombine.low %v166_v33, %v170_v34  ;;  %v184_v19 = vld [vmem:[#allocation2 + $0x158] sm:$0xff]  ;;  %v8164_v21 = vcombine.low %v191_v8, %v195_v9  ;;  %v8166_v22 = vcombine.low %v192_v10, %v196_v11  ;;  %v8157_v23 = vcombine.high %v183_v17, %v187_v18 }
  0x6f   :  { %v8129_v45 = vcombine.high %v157_v39, %v161_v40  ;;  %v8131_v46 = vcombine.high %v158_v41, %v162_v42  ;;  %v149_v47 = vld [vmem:[#allocation2 + $0x40] sm:$0xff]  ;;  %v150_v49 = vld [vmem:[#allocation2 + $0x48] sm:$0xff]  ;;  %v8128_v51 = vcombine.low %v157_v39, %v161_v40  ;;  %v8130_v52 = vcombine.low %v158_v41, %v162_v42  ;;  %v188_v20 = vld [vmem:[#allocation2 + $0x178] sm:$0xff] }
  0x70   :  { %530 = vmatpush1.bf16.msra.mxu0 %v8152_v27  ;;  %571 = vmatpush1.bf16.msra.mxu1 %v8154_v28  ;;  %v153_v48 = vld [vmem:[#allocation2 + $0x60] sm:$0xff]  ;;  %v154_v50 = vld [vmem:[#allocation2 + $0x68] sm:$0xff]  ;;  %v8159_v24 = vcombine.high %v184_v19, %v188_v20  ;;  %v175_v25 = vld [vmem:[#allocation2 + $0x110] sm:$0xff]  ;;  %v8158_v32 = vcombine.low %v184_v19, %v188_v20 }
  0x71   :  { %531 = vmatprep.subr.bf16.mxu0 %v8145_v29  ;;  %572 = vmatprep.subr.bf16.mxu1 %v8147_v30  ;;  %v8121_v53 = vcombine.high %v149_v47, %v153_v48  ;;  %v8123_v54 = vcombine.high %v150_v49, %v154_v50  ;;  %v141_v55 = vld [vmem:[#allocation2] sm:$0xff]  ;;  %v142_v57 = vld [vmem:[#allocation2 + $0x8] sm:$0xff]  ;;  %v8120_v59 = vcombine.low %v149_v47, %v153_v48  ;;  %v179_v26 = vld [vmem:[#allocation2 + $0x130] sm:$0xff] }
  0x72   :  { %v145_v56 = vld [vmem:[#allocation2 + $0x20] sm:$0xff]  ;;  %v146_v58 = vld [vmem:[#allocation2 + $0x28] sm:$0xff]  ;;  %v8122_v60 = vcombine.low %v150_v49, %v154_v50  ;;  %v176_v27 = vld [vmem:[#allocation2 + $0x118] sm:$0xff]  ;;  %v8156_v29 = vcombine.low %v183_v17, %v187_v18  ;;  %v8149_v33 = vcombine.high %v175_v25, %v179_v26 }
  0x73   :  { %v8113_v61 = vcombine.high %v141_v55, %v145_v56  ;;  %v8115_v62 = vcombine.high %v142_v57, %v146_v58  ;;  %v8112_v4 = vcombine.low %v141_v55, %v145_v56  ;;  %v8114_v5 = vcombine.low %v142_v57, %v146_v58  ;;  %v10200_v12 = vld [vmem:[%s10473_s0] sm:$0xf]  ;;  %v180_v28 = vld [vmem:[#allocation2 + $0x138] sm:$0xff]  ;;  %v167_v30 = vld [vmem:[#allocation2 + $0xd0] sm:$0xff] }
  0x74   :  { %532 = vmatpush1.bf16.msra.mxu0 %v8144_v35  ;;  %573 = vmatpush1.bf16.msra.mxu1 %v8146_v36  ;;  %v171_v31 = vld [vmem:[#allocation2 + $0xf0] sm:$0xff]  ;;  %v168_v34 = vld [vmem:[#allocation2 + $0xd8] sm:$0xff]  ;;  %v8151_v36 = vcombine.high %v176_v27, %v180_v28  ;;  %v8150_v40 = vcombine.low %v176_v27, %v180_v28  ;;  %v765_v63 = vld [vmem:[#allocation4 + $0x1e0] sm:$0xff] }
  0x75   :  { %533 = vmatprep.subr.bf16.mxu0 %v8137_v37  ;;  %574 = vmatprep.subr.bf16.mxu1 %v8139_v38  ;;  %v172_v35 = vld [vmem:[#allocation2 + $0xf8] sm:$0xff]  ;;  %v8148_v37 = vcombine.low %v175_v25, %v179_v26  ;;  %v159_v38 = vld [vmem:[#allocation2 + $0x90] sm:$0xff]  ;;  %v8141_v41 = vcombine.high %v167_v30, %v171_v31  ;;  %v889_v3 = vld [vmem:[#allocation4 + $0x5c0] sm:$0xff] }
  0x76   :  { %v163_v39 = vld [vmem:[#allocation2 + $0xb0] sm:$0xff]  ;;  %v160_v42 = vld [vmem:[#allocation2 + $0x98] sm:$0xff]  ;;  %v8142_v48 = vcombine.low %v168_v34, %v172_v35  ;;  %v757_v8 = vld [vmem:[#allocation4 + $0x1a0] sm:$0xff] }
  0x77   :  { %v155_v47 = vld [vmem:[#allocation2 + $0x70] sm:$0xff]  ;;  %v8133_v49 = vcombine.high %v159_v38, %v163_v39  ;;  %v152_v50 = vld [vmem:[#allocation2 + $0x58] sm:$0xff]  ;;  %v881_v11 = vld [vmem:[#allocation4 + $0x580] sm:$0xff] }
  0x78   :  { %534 = vmatpush1.bf16.msra.mxu0 %v8136_v43  ;;  %575 = vmatpush1.bf16.msra.mxu1 %v8138_v44  ;;  %v164_v43 = vld [vmem:[#allocation2 + $0xb8] sm:$0xff]  ;;  %v8143_v44 = vcombine.high %v168_v34, %v172_v35  ;;  %v147_v55 = vld [vmem:[#allocation2 + $0x30] sm:$0xff]  ;;  %v749_v17 = vld [vmem:[#allocation4 + $0x160] sm:$0xff] }
  0x79   :  { %535 = vmatprep.subr.bf16.mxu0 %v8129_v45  ;;  %576 = vmatprep.subr.bf16.mxu1 %v8131_v46  ;;  %v8140_v45 = vcombine.low %v167_v30, %v171_v31  ;;  %v151_v46 = vld [vmem:[#allocation2 + $0x50] sm:$0xff]  ;;  %v8134_v56 = vcombine.low %v160_v42, %v164_v43  ;;  %v144_v58 = vld [vmem:[#allocation2 + $0x18] sm:$0xff]  ;;  %v873_v20 = vld [vmem:[#allocation4 + $0x540] sm:$0xff] }
  0x7a   :  { %v8125_v57 = vcombine.high %v151_v46, %v155_v47  ;;  %v741_v25 = vld [vmem:[#allocation4 + $0x120] sm:$0xff] }
  0x7b   :  { %v865_v28 = vld [vmem:[#allocation4 + $0x500] sm:$0xff] }
  0x7c   :  { %536 = vmatpush1.bf16.msra.mxu0 %v8128_v51  ;;  %577 = vmatpush1.bf16.msra.mxu1 %v8130_v52  ;;  %v156_v51 = vld [vmem:[#allocation2 + $0x78] sm:$0xff]  ;;  %v8135_v52 = vcombine.high %v160_v42, %v164_v43  ;;  %v857_v35 = vld [vmem:[#allocation4 + $0x4c0] sm:$0xff] }
  0x7d   :  { %537 = vmatprep.subr.bf16.mxu0 %v8121_v53  ;;  %578 = vmatprep.subr.bf16.mxu1 %v8123_v54  ;;  %v8132_v53 = vcombine.low %v159_v38, %v163_v39  ;;  %v143_v54 = vld [vmem:[#allocation2 + $0x10] sm:$0xff]  ;;  %v8126_v1 = vcombine.low %v152_v50, %v156_v51  ;;  %v721_v39 = vld [vmem:[#allocation4 + $0x80] sm:$0xff] }
  0x7e   :  { %v8117_v2 = vcombine.high %v143_v54, %v147_v55  ;;  %v849_v43 = vld [vmem:[#allocation4 + $0x480] sm:$0xff] }
  0x80   :  { %538 = vmatpush1.bf16.msra.mxu0 %v8120_v59  ;;  %579 = vmatpush1.bf16.msra.mxu1 %v8122_v60  ;;  %v148_v59 = vld [vmem:[#allocation2 + $0x38] sm:$0xff]  ;;  %v8127_v60 = vcombine.high %v152_v50, %v156_v51  ;;  %v841_v51 = vld [vmem:[#allocation4 + $0x440] sm:$0xff] }
  0x81   :  { %539 = vmatprep.subr.bf16.mxu0 %v8113_v61  ;;  %580 = vmatprep.subr.bf16.mxu1 %v8115_v62  ;;  %v8124_v61 = vcombine.low %v151_v46, %v155_v47  ;;  %v761_v62 = vld [vmem:[#allocation4 + $0x1c0] sm:$0xff]  ;;  %v8118_v9 = vcombine.low %v144_v58, %v148_v59 }
  0x82   :  { %v8233_v10 = vcombine.high %v761_v62, %v765_v63  ;;  %v713_v47 = vld [vmem:[#allocation4 + $0x40] sm:$0xff] }
  0x84   :  { %540 = vmatpush1.bf16.msra.mxu0 %v8112_v4  ;;  %581 = vmatpush1.bf16.msra.mxu1 %v8114_v5  ;;  %v893_v4 = vld [vmem:[#allocation4 + $0x5e0] sm:$0xff]  ;;  %v8119_v5 = vcombine.high %v144_v58, %v148_v59 }
  0x85   :  { %607 = vmatprep.subr.bf16.mxu0 %v8173_v6  ;;  %648 = vmatprep.subr.bf16.mxu1 %v8175_v7  ;;  %v8116_v6 = vcombine.low %v143_v54, %v147_v55  ;;  %v753_v7 = vld [vmem:[#allocation4 + $0x180] sm:$0xff]  ;;  %v8360_v18 = vcombine.low %v889_v3, %v893_v4 }
  0x86   :  { %v8225_v19 = vcombine.high %v753_v7, %v757_v8  ;;  %v705_v55 = vld [vmem:[#allocation4] sm:$0xff] }
  0x87   :  { %558 = vmatmul.mubr.bf16.vlgmr.msra.gmra.mxu0 %v10200_v12  ;;  %599 = vmatmul.mubr.bf16.vlgmr.msra.gmra.mxu1 %v10200_v12  ;;  %v833_v59 = vld [vmem:[#allocation4 + $0x400] sm:$0xff] }
  0x88   :  { %608 = vmatpush1.bf16.msra.mxu0 %v8172_v13  ;;  %649 = vmatpush1.bf16.msra.mxu1 %v8174_v14  ;;  %v885_v13 = vld [vmem:[#allocation4 + $0x5a0] sm:$0xff]  ;;  %v8361_v14 = vcombine.high %v889_v3, %v893_v4 }
  0x89   :  { %609 = vmatprep.subr.bf16.mxu0 %v8165_v15  ;;  %650 = vmatprep.subr.bf16.mxu1 %v8167_v16  ;;  %v8232_v15 = vcombine.low %v761_v62, %v765_v63  ;;  %v745_v16 = vld [vmem:[#allocation4 + $0x140] sm:$0xff]  ;;  %v8352_v26 = vcombine.low %v881_v11, %v885_v13 }
  0x8a   :  { %639 = vmatprep.mubr.bf16.mxu0 %v10103_v0  ;;  %680 = vmatprep.mubr.bf16.mxu1 %v10103_v0  ;;  %v8217_v27 = vcombine.high %v745_v16, %v749_v17  ;;  %v8216_v31 = vcombine.low %v745_v16, %v749_v17  ;;  %v825_v63 = vld [vmem:[#allocation4 + $0x3c0] sm:$0xff] }
  0x8b   :  { %v953_v4 = vld [vmem:[#allocation4 + $0x7c0] sm:$0xff] }
  0x8c   :  { %610 = vmatpush1.bf16.msra.mxu0 %v8164_v21  ;;  %651 = vmatpush1.bf16.msra.mxu1 %v8166_v22  ;;  %v877_v21 = vld [vmem:[#allocation4 + $0x560] sm:$0xff]  ;;  %v8353_v22 = vcombine.high %v881_v11, %v885_v13 }
  0x8d   :  { %611 = vmatprep.subr.bf16.mxu0 %v8157_v23  ;;  %652 = vmatprep.subr.bf16.mxu1 %v8159_v24  ;;  %v8224_v23 = vcombine.low %v753_v7, %v757_v8  ;;  %v737_v24 = vld [vmem:[#allocation4 + $0x100] sm:$0xff]  ;;  %v8345_v30 = vcombine.high %v873_v20, %v877_v21  ;;  %v8344_v34 = vcombine.low %v873_v20, %v877_v21 }
  0x8e   :  { %v8208_v38 = vcombine.low %v737_v24, %v741_v25  ;;  %v817_v8 = vld [vmem:[#allocation4 + $0x380] sm:$0xff] }
  0x8f   :  { %v945_v13 = vld [vmem:[#allocation4 + $0x780] sm:$0xff] }
  0x90   :  { %612 = vmatpush1.bf16.msra.mxu0 %v8156_v29  ;;  %653 = vmatpush1.bf16.msra.mxu1 %v8158_v32  ;;  %v869_v29 = vld [vmem:[#allocation4 + $0x520] sm:$0xff] }
  0x91   :  { %613 = vmatprep.subr.bf16.mxu0 %v8149_v33  ;;  %654 = vmatprep.subr.bf16.mxu1 %v8151_v36  ;;  %v729_v32 = vld [vmem:[#allocation4 + $0xc0] sm:$0xff] }
  0x92   :  { %v733_v33 = vld [vmem:[#allocation4 + $0xe0] sm:$0xff] }
  0x93   :  { %v861_v36 = vld [vmem:[#allocation4 + $0x4e0] sm:$0xff]  ;;  %v8201_v42 = vcombine.high %v729_v32, %v733_v33  ;;  %v8200_v46 = vcombine.low %v729_v32, %v733_v33 }
  0x94   :  { %614 = vmatpush1.bf16.msra.mxu0 %v8148_v37  ;;  %655 = vmatpush1.bf16.msra.mxu1 %v8150_v40  ;;  %v8337_v37 = vcombine.high %v865_v28, %v869_v29  ;;  %v725_v40 = vld [vmem:[#allocation4 + $0xa0] sm:$0xff] }
  0x95   :  { %615 = vmatprep.subr.bf16.mxu0 %v8141_v41  ;;  %656 = vmatprep.subr.bf16.mxu1 %v8143_v44  ;;  %v8336_v41 = vcombine.low %v865_v28, %v869_v29  ;;  %v853_v44 = vld [vmem:[#allocation4 + $0x4a0] sm:$0xff]  ;;  %v8193_v50 = vcombine.high %v721_v39, %v725_v40  ;;  %v8192_v54 = vcombine.low %v721_v39, %v725_v40 }
  0x96   :  { %v809_v17 = vld [vmem:[#allocation4 + $0x340] sm:$0xff] }
  0x97   :  { %v937_v21 = vld [vmem:[#allocation4 + $0x740] sm:$0xff] }
  0x98   :  { %616 = vmatpush1.bf16.msra.mxu0 %v8140_v45  ;;  %657 = vmatpush1.bf16.msra.mxu1 %v8142_v48  ;;  %v8329_v45 = vcombine.high %v857_v35, %v861_v36  ;;  %v717_v48 = vld [vmem:[#allocation4 + $0x60] sm:$0xff] }
  0x99   :  { %617 = vmatprep.subr.bf16.mxu0 %v8133_v49  ;;  %658 = vmatprep.subr.bf16.mxu1 %v8135_v52  ;;  %v8328_v49 = vcombine.low %v857_v35, %v861_v36  ;;  %v845_v52 = vld [vmem:[#allocation4 + $0x460] sm:$0xff]  ;;  %v8185_v58 = vcombine.high %v713_v47, %v717_v48  ;;  %v8184_v62 = vcombine.low %v713_v47, %v717_v48 }
  0x9a   :  { %v929_v29 = vld [vmem:[#allocation4 + $0x700] sm:$0xff] }
  0x9b   :  { %v793_v33 = vld [vmem:[#allocation4 + $0x2c0] sm:$0xff] }
  0x9c   :  { %618 = vmatpush1.bf16.msra.mxu0 %v8132_v53  ;;  %659 = vmatpush1.bf16.msra.mxu1 %v8134_v56  ;;  %v8321_v53 = vcombine.high %v849_v43, %v853_v44  ;;  %v709_v56 = vld [vmem:[#allocation4 + $0x20] sm:$0xff] }
  0x9d   :  { %619 = vmatprep.subr.bf16.mxu0 %v8125_v57  ;;  %660 = vmatprep.subr.bf16.mxu1 %v8127_v60  ;;  %v8320_v57 = vcombine.low %v849_v43, %v853_v44  ;;  %v837_v60 = vld [vmem:[#allocation4 + $0x420] sm:$0xff]  ;;  %v8177_v3 = vcombine.high %v705_v55, %v709_v56  ;;  %v8176_v7 = vcombine.low %v705_v55, %v709_v56 }
  0x9e   :  { %v10210_v35 = vld [vmem:[#allocation4 + $0x9e0] sm:$0xff] }
  0x9f   :  { %v10212_v36 = vld [vmem:[#allocation4 + $0xdc0] sm:$0xff] }
  0xa0   :  { %620 = vmatpush1.bf16.msra.mxu0 %v8124_v61  ;;  %661 = vmatpush1.bf16.msra.mxu1 %v8126_v1  ;;  %v8313_v61 = vcombine.high %v841_v51, %v845_v52  ;;  %v829_v1 = vld [vmem:[#allocation4 + $0x3e0] sm:$0xff] }
  0xa1   :  { %621 = vmatprep.subr.bf16.mxu0 %v8117_v2  ;;  %662 = vmatprep.subr.bf16.mxu1 %v8119_v5  ;;  %v8312_v2 = vcombine.low %v841_v51, %v845_v52  ;;  %v957_v5 = vld [vmem:[#allocation4 + $0x7e0] sm:$0xff]  ;;  %v8297_v11 = vcombine.high %v825_v63, %v829_v1  ;;  %v8296_v16 = vcombine.low %v825_v63, %v829_v1 }
  0xa2   :  { %v921_v39 = vld [vmem:[#allocation4 + $0x6c0] sm:$0xff] }
  0xa3   :  { %v925_v40 = vld [vmem:[#allocation4 + $0x6e0] sm:$0xff] }
  0xa4   :  { %622 = vmatpush1.bf16.msra.mxu0 %v8116_v6  ;;  %663 = vmatpush1.bf16.msra.mxu1 %v8118_v9  ;;  %v8305_v6 = vcombine.high %v833_v59, %v837_v60  ;;  %v821_v9 = vld [vmem:[#allocation4 + $0x3a0] sm:$0xff]  ;;  %v8393_v51 = vcombine.high %v921_v39, %v925_v40 }
  0xa5   :  { %3819 = vmatprep.subr.bf16.mxu0 %v8233_v10  ;;  %3860 = vmatprep.subr.bf16.mxu1 %v8361_v14  ;;  %v8304_v10 = vcombine.low %v833_v59, %v837_v60  ;;  %v949_v14 = vld [vmem:[#allocation4 + $0x7a0] sm:$0xff]  ;;  %v8289_v20 = vcombine.high %v817_v8, %v821_v9 }
  0xa6   :  { %v785_v48 = vld [vmem:[#allocation4 + $0x280] sm:$0xff] }
  0xa7   :  { %640 = vmatmul.mubr.bf16.vlgmr.msra.gmra.mxu0 %v10200_v12  ;;  %681 = vmatmul.mubr.bf16.vlgmr.msra.gmra.mxu1 %v10200_v12  ;;  %v8209_v12 = vcombine.high %v737_v24, %v741_v25  ;;  %v8288_v24 = vcombine.low %v817_v8, %v821_v9  ;;  %v801_v25 = vld [vmem:[#allocation4 + $0x300] sm:$0xff] }
  0xa8   :  { %3820 = vmatpush1.bf16.msra.mxu0 %v8232_v15  ;;  %3861 = vmatpush1.bf16.msra.mxu1 %v8360_v18  ;;  %v8425_v15 = vcombine.high %v953_v4, %v957_v5  ;;  %v813_v18 = vld [vmem:[#allocation4 + $0x360] sm:$0xff] }
  0xa9   :  { %3821 = vmatprep.subr.bf16.mxu0 %v8225_v19  ;;  %3862 = vmatprep.subr.bf16.mxu1 %v8353_v22  ;;  %v8424_v19 = vcombine.low %v953_v4, %v957_v5  ;;  %v941_v22 = vld [vmem:[#allocation4 + $0x760] sm:$0xff]  ;;  %v8281_v28 = vcombine.high %v809_v17, %v813_v18  ;;  %v8280_v32 = vcombine.low %v809_v17, %v813_v18 }
  0xaa   :  { %v917_v52 = vld [vmem:[#allocation4 + $0x6a0] sm:$0xff] }
  0xab   :  { %v777_v56 = vld [vmem:[#allocation4 + $0x240] sm:$0xff] }
  0xac   :  { %3822 = vmatpush1.bf16.msra.mxu0 %v8224_v23  ;;  %3863 = vmatpush1.bf16.msra.mxu1 %v8352_v26  ;;  %v8417_v23 = vcombine.high %v945_v13, %v949_v14  ;;  %v805_v26 = vld [vmem:[#allocation4 + $0x320] sm:$0xff] }
  0xad   :  { %3823 = vmatprep.subr.bf16.mxu0 %v8217_v27  ;;  %3864 = vmatprep.subr.bf16.mxu1 %v8345_v30  ;;  %v8416_v27 = vcombine.low %v945_v13, %v949_v14  ;;  %v933_v30 = vld [vmem:[#allocation4 + $0x720] sm:$0xff] }
  0xae   :  { %v909_v60 = vld [vmem:[#allocation4 + $0x660] sm:$0xff] }
  0xaf   :  { %v769_v1 = vld [vmem:[#allocation4 + $0x200] sm:$0xff] }
  0xb0   :  { %3824 = vmatpush1.bf16.msra.mxu0 %v8216_v31  ;;  %3865 = vmatpush1.bf16.msra.mxu1 %v8344_v34  ;;  %v8409_v31 = vcombine.high %v937_v21, %v941_v22  ;;  %v797_v34 = vld [vmem:[#allocation4 + $0x2e0] sm:$0xff] }
  0xb1   :  { %3825 = vmatprep.subr.bf16.mxu0 %v8209_v12  ;;  %3866 = vmatprep.subr.bf16.mxu1 %v8337_v37  ;;  %v10208_v12 = vld [vmem:[#allocation4 + $0x9c0] sm:$0xff]  ;;  %v8408_v37 = vcombine.low %v937_v21, %v941_v22  ;;  %v8265_v47 = vcombine.high %v793_v33, %v797_v34 }
  0xb2   :  { %v8488_v43 = vcombine.low %v10208_v12, %v10210_v35  ;;  %v901_v5 = vld [vmem:[#allocation4 + $0x620] sm:$0xff]  ;;  %v8489_v13 = vcombine.high %v10208_v12, %v10210_v35 }
  0xb3   :  { %v1013_v21 = vld [vmem:[#allocation4 + $0x9a0] sm:$0xff] }
  0xb4   :  { %3826 = vmatpush1.bf16.msra.mxu0 %v8208_v38  ;;  %3867 = vmatpush1.bf16.msra.mxu1 %v8336_v41  ;;  %v8273_v38 = vcombine.high %v801_v25, %v805_v26  ;;  %v10214_v41 = vld [vmem:[#allocation4 + $0xde0] sm:$0xff] }
  0xb5   :  { %3827 = vmatprep.subr.bf16.mxu0 %v8201_v42  ;;  %3868 = vmatprep.subr.bf16.mxu1 %v8329_v45  ;;  %v8401_v42 = vcombine.high %v929_v29, %v933_v30  ;;  %v8616_v44 = vcombine.low %v10212_v36, %v10214_v41  ;;  %v8272_v45 = vcombine.low %v801_v25, %v805_v26  ;;  %v1137_v22 = vld [vmem:[#allocation4 + $0xd80] sm:$0xff] }
  0xb6   :  { %v8617_v14 = vcombine.high %v10212_v36, %v10214_v41  ;;  %v1141_v25 = vld [vmem:[#allocation4 + $0xda0] sm:$0xff] }
  0xb7   :  { %v1117_v41 = vld [vmem:[#allocation4 + $0xce0] sm:$0xff] }
  0xb8   :  { %3828 = vmatpush1.bf16.msra.mxu0 %v8200_v46  ;;  %3869 = vmatpush1.bf16.msra.mxu1 %v8328_v49  ;;  %v8400_v46 = vcombine.low %v929_v29, %v933_v30  ;;  %v789_v49 = vld [vmem:[#allocation4 + $0x2a0] sm:$0xff] }
  0xb9   :  { %3829 = vmatprep.subr.bf16.mxu0 %v8193_v50  ;;  %3870 = vmatprep.subr.bf16.mxu1 %v8321_v53  ;;  %v913_v50 = vld [vmem:[#allocation4 + $0x680] sm:$0xff]  ;;  %v8264_v53 = vcombine.low %v793_v33, %v797_v34  ;;  %v8257_v55 = vcombine.high %v785_v48, %v789_v49 }
  0xba   :  { %v8385_v59 = vcombine.high %v913_v50, %v917_v52 }
  0xbc   :  { %3830 = vmatpush1.bf16.msra.mxu0 %v8192_v54  ;;  %3871 = vmatpush1.bf16.msra.mxu1 %v8320_v57  ;;  %v8392_v54 = vcombine.low %v921_v39, %v925_v40  ;;  %v781_v57 = vld [vmem:[#allocation4 + $0x260] sm:$0xff] }
  0xbd   :  { %3831 = vmatprep.subr.bf16.mxu0 %v8185_v58  ;;  %3872 = vmatprep.subr.bf16.mxu1 %v8313_v61  ;;  %v905_v58 = vld [vmem:[#allocation4 + $0x640] sm:$0xff]  ;;  %v8256_v61 = vcombine.low %v785_v48, %v789_v49  ;;  %v8249_v63 = vcombine.high %v777_v56, %v781_v57 }
  0xbe   :  { %v8377_v4 = vcombine.high %v905_v58, %v909_v60  ;;  %v1001_v39 = vld [vmem:[#allocation4 + $0x940] sm:$0xff] }
  0xbf   :  { %v1005_v40 = vld [vmem:[#allocation4 + $0x960] sm:$0xff] }
  0xc0   :  { %3832 = vmatpush1.bf16.msra.mxu0 %v8184_v62  ;;  %3873 = vmatpush1.bf16.msra.mxu1 %v8312_v2  ;;  %v8384_v62 = vcombine.low %v913_v50, %v917_v52  ;;  %v773_v2 = vld [vmem:[#allocation4 + $0x220] sm:$0xff]  ;;  %v8473_v48 = vcombine.high %v1001_v39, %v1005_v40 }
  0xc1   :  { %3833 = vmatprep.subr.bf16.mxu0 %v8177_v3  ;;  %3874 = vmatprep.subr.bf16.mxu1 %v8305_v6  ;;  %v897_v3 = vld [vmem:[#allocation4 + $0x600] sm:$0xff]  ;;  %v8248_v6 = vcombine.low %v777_v56, %v781_v57  ;;  %v8241_v8 = vcombine.high %v769_v1, %v773_v2 }
  0xc2   :  { %v8369_v9 = vcombine.high %v897_v3, %v901_v5  ;;  %v993_v50 = vld [vmem:[#allocation4 + $0x900] sm:$0xff] }
  0xc3   :  { %v1121_v52 = vld [vmem:[#allocation4 + $0xd00] sm:$0xff] }
  0xc4   :  { %3834 = vmatpush1.bf16.msra.mxu0 %v8176_v7  ;;  %3875 = vmatpush1.bf16.msra.mxu1 %v8304_v10  ;;  %v8376_v7 = vcombine.low %v905_v58, %v909_v60  ;;  %v8240_v10 = vcombine.low %v769_v1, %v773_v2  ;;  %v1113_v56 = vld [vmem:[#allocation4 + $0xcc0] sm:$0xff] }
  0xc5   :  { %3835 = vmatprep.subr.bf16.mxu0 %v8297_v11  ;;  %3876 = vmatprep.subr.bf16.mxu1 %v8425_v15  ;;  %v8368_v11 = vcombine.low %v897_v3, %v901_v5  ;;  %v981_v60 = vld [vmem:[#allocation4 + $0x8a0] sm:$0xff]  ;;  %v8584_v2 = vcombine.low %v1113_v56, %v1117_v41 }
  0xc6   :  { %v973_v5 = vld [vmem:[#allocation4 + $0x860] sm:$0xff] }
  0xc8   :  { %3836 = vmatpush2.bf16.msra.mxu0 %v8296_v16  ;;  %3877 = vmatpush2.bf16.msra.mxu1 %v8424_v19 }
  0xc9   :  { %3837 = vmatprep.subr.bf16.mxu0 %v8289_v20  ;;  %3878 = vmatprep.subr.bf16.mxu1 %v8417_v23  ;;  %v1009_v20 = vld [vmem:[#allocation4 + $0x980] sm:$0xff] }
  0xca   :  { %v8481_v34 = vcombine.high %v1009_v20, %v1013_v21 }
  0xcc   :  { %3838 = vmatpush2.bf16.msra.mxu0 %v8288_v24  ;;  %3879 = vmatpush2.bf16.msra.mxu1 %v8416_v27 }
  0xcd   :  { %3839 = vmatprep.subr.bf16.mxu0 %v8281_v28  ;;  %3880 = vmatprep.subr.bf16.mxu1 %v8409_v31 }
  0xd0   :  { %3840 = vmatpush2.bf16.msra.mxu0 %v8280_v32  ;;  %3881 = vmatpush2.bf16.msra.mxu1 %v8408_v37 }
  0xd1   :  { %3841 = vmatprep.subr.bf16.mxu0 %v8273_v38  ;;  %3882 = vmatprep.subr.bf16.mxu1 %v8401_v42  ;;  %v8609_v38 = vcombine.high %v1137_v22, %v1141_v25  ;;  %v1129_v42 = vld [vmem:[#allocation4 + $0xd40] sm:$0xff] }
  0xd4   :  { %3842 = vmatpush2.bf16.msra.mxu0 %v8272_v45  ;;  %3883 = vmatpush2.bf16.msra.mxu1 %v8400_v46  ;;  %v1133_v45 = vld [vmem:[#allocation4 + $0xd60] sm:$0xff]  ;;  %v8480_v46 = vcombine.low %v1009_v20, %v1013_v21 }
  0xd5   :  { %3843 = vmatprep.subr.bf16.mxu0 %v8265_v47  ;;  %3884 = vmatprep.subr.bf16.mxu1 %v8393_v51  ;;  %v8608_v47 = vcombine.low %v1137_v22, %v1141_v25  ;;  %v8601_v49 = vcombine.high %v1129_v42, %v1133_v45  ;;  %v997_v51 = vld [vmem:[#allocation4 + $0x920] sm:$0xff]  ;;  %v8600_v12 = vcombine.low %v1129_v42, %v1133_v45 }
  0xd6   :  { %v8465_v35 = vcombine.high %v993_v50, %v997_v51  ;;  %v1081_v21 = vld [vmem:[#allocation4 + $0xbc0] sm:$0xff] }
  0xd7   :  { %v1085_v22 = vld [vmem:[#allocation4 + $0xbe0] sm:$0xff] }
  0xd8   :  { %3844 = vmatpush2.bf16.msra.mxu0 %v8264_v53  ;;  %3885 = vmatpush2.bf16.msra.mxu1 %v8392_v54  ;;  %v1125_v53 = vld [vmem:[#allocation4 + $0xd20] sm:$0xff]  ;;  %v8472_v54 = vcombine.low %v1001_v39, %v1005_v40 }
  0xd9   :  { %3845 = vmatprep.subr.bf16.mxu0 %v8257_v55  ;;  %3886 = vmatprep.subr.bf16.mxu1 %v8385_v59  ;;  %v989_v55 = vld [vmem:[#allocation4 + $0x8e0] sm:$0xff]  ;;  %v8593_v36 = vcombine.high %v1121_v52, %v1125_v53  ;;  %v8592_v57 = vcombine.low %v1121_v52, %v1125_v53 }
  0xda   :  { %v977_v59 = vld [vmem:[#allocation4 + $0x880] sm:$0xff] }
  0xdb   :  { %v8449_v3 = vcombine.high %v977_v59, %v981_v60  ;;  %v1213_v25 = vld [vmem:[#allocation4 + $0xfe0] sm:$0xff] }
  0xdc   :  { %3846 = vmatpush2.bf16.msra.mxu0 %v8256_v61  ;;  %3887 = vmatpush2.bf16.msra.mxu1 %v8384_v62  ;;  %v1105_v61 = vld [vmem:[#allocation4 + $0xc80] sm:$0xff]  ;;  %v8585_v62 = vcombine.high %v1113_v56, %v1117_v41 }
  0xdd   :  { %3847 = vmatprep.subr.bf16.mxu0 %v8249_v63  ;;  %3888 = vmatprep.subr.bf16.mxu1 %v8377_v4  ;;  %v1109_v63 = vld [vmem:[#allocation4 + $0xca0] sm:$0xff] }
  0xde   :  { %v969_v4 = vld [vmem:[#allocation4 + $0x840] sm:$0xff] }
  0xdf   :  { %v1201_v42 = vld [vmem:[#allocation4 + $0xf80] sm:$0xff] }
  0xe0   :  { %3848 = vmatpush2.bf16.msra.mxu0 %v8248_v6  ;;  %3889 = vmatpush2.bf16.msra.mxu1 %v8376_v7  ;;  %v1097_v6 = vld [vmem:[#allocation4 + $0xc40] sm:$0xff]  ;;  %v8577_v7 = vcombine.high %v1105_v61, %v1109_v63 }
  0xe1   :  { %3849 = vmatprep.subr.bf16.mxu0 %v8241_v8  ;;  %3890 = vmatprep.subr.bf16.mxu1 %v8369_v9  ;;  %v1101_v8 = vld [vmem:[#allocation4 + $0xc60] sm:$0xff]  ;;  %v8448_v9 = vcombine.low %v977_v59, %v981_v60 }
  0xe2   :  { %v1197_v41 = vld [vmem:[#allocation4 + $0xf60] sm:$0xff] }
  0xe3   :  { %v1057_v60 = vld [vmem:[#allocation4 + $0xb00] sm:$0xff] }
  0xe4   :  { %3850 = vmatpush2.bf16.msra.mxu0 %v8240_v10  ;;  %3891 = vmatpush2.bf16.msra.mxu1 %v8368_v11  ;;  %v8576_v10 = vcombine.low %v1105_v61, %v1109_v63  ;;  %v8441_v11 = vcombine.high %v969_v4, %v973_v5  ;;  %v1061_v61 = vld [vmem:[#allocation4 + $0xb20] sm:$0xff] }
  0xe5   :  { %3901 = vmatprep.subr.bf16.mxu0 %v8489_v13  ;;  %3942 = vmatprep.subr.bf16.mxu1 %v8617_v14  ;;  %v961_v13 = vld [vmem:[#allocation4 + $0x800] sm:$0xff] }
  0xe6   :  { %v965_v14 = vld [vmem:[#allocation4 + $0x820] sm:$0xff] }
  0xe7   :  { %v8433_v20 = vcombine.high %v961_v13, %v965_v14 }
 0x147   :  { %v559_v15 = vpop.f32.mrf.mxu0  ;;  %v600_v16 = vpop.f32.mrf.mxu1 }
 0x148   :  { %v689_v17 = vmax.f32 %v559_v15, 0.0  ;;  %v691_v18 = vmax.f32 %v600_v16, 0.0  ;;  %v1089_v15 = vld [vmem:[#allocation4 + $0xc00] sm:$0xff]  ;;  %v8569_v16 = vcombine.high %v1097_v6, %v1101_v8 }
 0x149   :  { %v561_v19 = vpop.f32.mrf.mxu0  ;;  %v602_v24 = vpop.f32.mrf.mxu1 }
 0x14a   :  { %v690_v23 = vmax.f32 %v561_v19, 0.0  ;;  %v692_v26 = vmax.f32 %v602_v24, 0.0  ;;  %v10224_v28 = vpack.c.bf16 %v691_v18, %v691_v18  ;;  %v10228_v31 = vpack.c.bf16 %v689_v17, %v689_v17  ;;  %v1093_v17 = vld [vmem:[#allocation4 + $0xc20] sm:$0xff] }
 0x14b   :  { %v563_v27 = vpop.f32.mrf.mxu0  ;;  %v604_v30 = vpop.f32.mrf.mxu1  ;;  %v8440_v18 = vcombine.low %v969_v4, %v973_v5  ;;  %v8568_v19 = vcombine.low %v1097_v6, %v1101_v8  ;;  %v8561_v24 = vcombine.high %v1089_v15, %v1093_v17  ;;  %v8529_v4 = vcombine.high %v1057_v60, %v1061_v61  ;;  %v1049_v5 = vld [vmem:[#allocation4 + $0xac0] sm:$0xff] }
 0x14c   :  { %v10226_v29 = vpack.c.bf16 %v690_v23, %v690_v23  ;;  %v10230_v32 = vpack.c.bf16 %v692_v26, %v692_v26  ;;  %v1209_v23 = vld [vmem:[#allocation4 + $0xfc0] sm:$0xff]  ;;  %v8432_v27 = vcombine.low %v961_v13, %v965_v14 }
 0x14d   :  { %v564_v33 = vpop.f32.mrf.mxu0  ;;  %v605_v37 = vpop.f32.mrf.mxu1  ;;  %v8681_v40 = vcombine.high %v1209_v23, %v1213_v25  ;;  %v8680_v53 = vcombine.low %v1209_v23, %v1213_v25  ;;  %v1053_v6 = vld [vmem:[#allocation4 + $0xae0] sm:$0xff] }
 0x14e   :  { %3851 = vmatprep.mubr.bf16.mxu0 %v10226_v29  ;;  %3892 = vmatprep.mubr.bf16.mxu1 %v10230_v32  ;;  %v8560_v33 = vcombine.low %v1089_v15, %v1093_v17  ;;  %v1073_v37 = vld [vmem:[#allocation4 + $0xb80] sm:$0xff]  ;;  %v8521_v13 = vcombine.high %v1049_v5, %v1053_v6 }
 0x14f   :  { %3852 = vmatmul.mubr.bf16.vlgmr.msra.gmra.mxu0 %v10228_v31  ;;  %3893 = vmatmul.mubr.bf16.vlgmr.msra.gmra.mxu1 %v10224_v28  ;;  %v1041_v15 = vld [vmem:[#allocation4 + $0xa80] sm:$0xff] }
 0x150   :  { %3902 = vmatpush1.bf16.msra.mxu0 %v8488_v43  ;;  %3943 = vmatpush1.bf16.msra.mxu1 %v8616_v44  ;;  %v985_v43 = vld [vmem:[#allocation4 + $0x8c0] sm:$0xff]  ;;  %v8464_v44 = vcombine.low %v993_v50, %v997_v51  ;;  %v8552_v50 = vcombine.low %v1081_v21, %v1085_v22 }
 0x151   :  { %3903 = vmatprep.subr.bf16.mxu0 %v8481_v34  ;;  %3944 = vmatprep.subr.bf16.mxu1 %v8609_v38  ;;  %v8457_v58 = vcombine.high %v985_v43, %v989_v55  ;;  %v8456_v1 = vcombine.low %v985_v43, %v989_v55  ;;  %v8553_v34 = vcombine.high %v1081_v21, %v1085_v22  ;;  %v1077_v38 = vld [vmem:[#allocation4 + $0xba0] sm:$0xff] }
 0x152   :  { %v1193_v43 = vld [vmem:[#allocation4 + $0xf40] sm:$0xff] }
 0x153   :  { %v8665_v63 = vcombine.high %v1193_v43, %v1197_v41  ;;  %v1169_v17 = vld [vmem:[#allocation4 + $0xe80] sm:$0xff] }
 0x154   :  { %3904 = vmatpush1.bf16.msra.mxu0 %v8480_v46  ;;  %3945 = vmatpush1.bf16.msra.mxu1 %v8608_v47  ;;  %v1205_v47 = vld [vmem:[#allocation4 + $0xfa0] sm:$0xff] }
 0x155   :  { %3905 = vmatprep.subr.bf16.mxu0 %v8473_v48  ;;  %3946 = vmatprep.subr.bf16.mxu1 %v8601_v49  ;;  %v1033_v23 = vld [vmem:[#allocation4 + $0xa40] sm:$0xff] }
 0x156   :  { %v1161_v25 = vld [vmem:[#allocation4 + $0xe40] sm:$0xff] }
 0x158   :  { %3906 = vmatpush1.bf16.msra.mxu0 %v8472_v54  ;;  %3947 = vmatpush1.bf16.msra.mxu1 %v8600_v12  ;;  %v8545_v54 = vcombine.high %v1073_v37, %v1077_v38  ;;  %v1065_v12 = vld [vmem:[#allocation4 + $0xb40] sm:$0xff] }
 0x159   :  { %3907 = vmatprep.subr.bf16.mxu0 %v8465_v35  ;;  %3948 = vmatprep.subr.bf16.mxu1 %v8593_v36  ;;  %v1069_v35 = vld [vmem:[#allocation4 + $0xb60] sm:$0xff]  ;;  %v8673_v36 = vcombine.high %v1201_v42, %v1205_v47 }
 0x15a   :  { %v8537_v59 = vcombine.high %v1065_v12, %v1069_v35 }
 0x15c   :  { %3908 = vmatpush1.bf16.msra.mxu0 %v8464_v44  ;;  %3949 = vmatpush1.bf16.msra.mxu1 %v8592_v57  ;;  %v8544_v57 = vcombine.low %v1073_v37, %v1077_v38 }
 0x15d   :  { %3909 = vmatprep.subr.bf16.mxu0 %v8457_v58  ;;  %3950 = vmatprep.subr.bf16.mxu1 %v8585_v62  ;;  %v8672_v58 = vcombine.low %v1201_v42, %v1205_v47  ;;  %v1185_v62 = vld [vmem:[#allocation4 + $0xf00] sm:$0xff] }
 0x15e   :  { %v1153_v42 = vld [vmem:[#allocation4 + $0xe00] sm:$0xff] }
 0x160   :  { %3910 = vmatpush1.bf16.msra.mxu0 %v8456_v1  ;;  %3951 = vmatpush1.bf16.msra.mxu1 %v8584_v2  ;;  %v1189_v1 = vld [vmem:[#allocation4 + $0xf20] sm:$0xff]  ;;  %v8536_v2 = vcombine.low %v1065_v12, %v1069_v35 }
 0x161   :  { %3911 = vmatprep.subr.bf16.mxu0 %v8449_v3  ;;  %3952 = vmatprep.subr.bf16.mxu1 %v8577_v7  ;;  %v8664_v3 = vcombine.low %v1193_v43, %v1197_v41  ;;  %v1177_v7 = vld [vmem:[#allocation4 + $0xec0] sm:$0xff]  ;;  %v8657_v8 = vcombine.high %v1185_v62, %v1189_v1 }
 0x164   :  { %3912 = vmatpush1.bf16.msra.mxu0 %v8448_v9  ;;  %3953 = vmatpush1.bf16.msra.mxu1 %v8576_v10  ;;  %v1181_v9 = vld [vmem:[#allocation4 + $0xee0] sm:$0xff]  ;;  %v8528_v10 = vcombine.low %v1057_v60, %v1061_v61  ;;  %v882_v60 = vld [vmem:[#allocation4 + $0x588] sm:$0xff] }
 0x165   :  { %3913 = vmatprep.subr.bf16.mxu0 %v8441_v11  ;;  %3954 = vmatprep.subr.bf16.mxu1 %v8569_v16  ;;  %v8656_v11 = vcombine.low %v1185_v62, %v1189_v1  ;;  %v8649_v14 = vcombine.high %v1177_v7, %v1181_v9  ;;  %v1045_v16 = vld [vmem:[#allocation4 + $0xaa0] sm:$0xff]  ;;  %v886_v61 = vld [vmem:[#allocation4 + $0x5a8] sm:$0xff] }
 0x166   :  { %v8513_v21 = vcombine.high %v1041_v15, %v1045_v16  ;;  %v750_v1 = vld [vmem:[#allocation4 + $0x168] sm:$0xff] }
 0x167   :  { %v10242_v26 = vpop.f32.mrf.mxu0  ;;  %v10244_v30 = vpop.f32.mrf.mxu1 }
 0x168   :  { %3914 = vmatpush1.bf16.msra.mxu0 %v8440_v18  ;;  %3955 = vmatpush1.bf16.msra.mxu1 %v8568_v19  ;;  %v1173_v18 = vld [vmem:[#allocation4 + $0xea0] sm:$0xff]  ;;  %v8520_v19 = vcombine.low %v1049_v5, %v1053_v6  ;;  %v695_v12 = vmax.f32 %v10244_v30, 0.0  ;;  %v693_v43 = vmax.f32 %v10242_v26, 0.0  ;;  %v8354_v6 = vcombine.low %v882_v60, %v886_v61 }
 0x169   :  { %3915 = vmatprep.subr.bf16.mxu0 %v8433_v20  ;;  %v643_v39 = vpop.f32.mrf.mxu0  ;;  %3956 = vmatprep.subr.bf16.mxu1 %v8561_v24  ;;  %v684_v46 = vpop.f32.mrf.mxu1  ;;  %v8648_v20 = vcombine.low %v1177_v7, %v1181_v9  ;;  %v8641_v22 = vcombine.high %v1169_v17, %v1173_v18  ;;  %v1037_v24 = vld [vmem:[#allocation4 + $0xa60] sm:$0xff]  ;;  %v738_v9 = vld [vmem:[#allocation4 + $0x108] sm:$0xff] }
 0x16a   :  { %v694_v45 = vmax.f32 %v643_v39, 0.0  ;;  %v696_v49 = vmax.f32 %v684_v46, 0.0  ;;  %v8505_v37 = vcombine.high %v1033_v23, %v1037_v24  ;;  %v1025_v39 = vld [vmem:[#allocation4 + $0xa00] sm:$0xff]  ;;  %v8504_v46 = vcombine.low %v1033_v23, %v1037_v24 }
 0x16b   :  { %v645_v48 = vpop.f32.mrf.mxu0  ;;  %v686_v52 = vpop.f32.mrf.mxu1  ;;  %v10256_v62 = vpack.c.bf16 %v693_v43, %v693_v43  ;;  %v838_v43 = vld [vmem:[#allocation4 + $0x428] sm:$0xff] }
 0x16c   :  { %3916 = vmatpush1.bf16.msra.mxu0 %v8432_v27  ;;  %v10246_v51 = vpack.c.bf16 %v694_v45, %v694_v45  ;;  %3957 = vmatpush1.bf16.msra.mxu1 %v8560_v33  ;;  %v10248_v55 = vpack.c.bf16 %v696_v49, %v696_v49  ;;  %v1165_v27 = vld [vmem:[#allocation4 + $0xe60] sm:$0xff]  ;;  %v8512_v33 = vcombine.low %v1041_v15, %v1045_v16  ;;  %v766_v52 = vld [vmem:[#allocation4 + $0x1e8] sm:$0xff] }
 0x16d   :  { %3917 = vmatprep.subr.bf16.mxu0 %v8553_v34  ;;  %v646_v56 = vpop.f32.mrf.mxu0  ;;  %3958 = vmatprep.subr.bf16.mxu1 %v8681_v40  ;;  %v687_v44 = vpop.f32.mrf.mxu1  ;;  %v8640_v34 = vcombine.low %v1169_v17, %v1173_v18  ;;  %v8633_v38 = vcombine.high %v1161_v25, %v1165_v27  ;;  %v1029_v40 = vld [vmem:[#allocation4 + $0xa20] sm:$0xff]  ;;  %v8632_v47 = vcombine.low %v1161_v25, %v1165_v27  ;;  %v730_v18 = vld [vmem:[#allocation4 + $0xc8] sm:$0xff] }
 0x16e   :  { %3933 = vmatprep.mubr.bf16.mxu0 %v10246_v51  ;;  %3974 = vmatprep.mubr.bf16.mxu1 %v10248_v55  ;;  %v1157_v45 = vld [vmem:[#allocation4 + $0xe20] sm:$0xff]  ;;  %v8497_v48 = vcombine.high %v1025_v39, %v1029_v40  ;;  %v8496_v35 = vcombine.low %v1025_v39, %v1029_v40  ;;  %v754_v44 = vld [vmem:[#allocation4 + $0x188] sm:$0xff] }
 0x16f   :  { %v8625_v49 = vcombine.high %v1153_v42, %v1157_v45  ;;  %v8624_v56 = vcombine.low %v1153_v42, %v1157_v45  ;;  %v722_v27 = vld [vmem:[#allocation4 + $0x88] sm:$0xff] }
 0x170   :  { %3918 = vmatpush2.bf16.msra.mxu0 %v8552_v50  ;;  %3959 = vmatpush2.bf16.msra.mxu1 %v8680_v53  ;;  %v762_v50 = vld [vmem:[#allocation4 + $0x1c8] sm:$0xff] }
 0x171   :  { %3919 = vmatprep.subr.bf16.mxu0 %v8545_v54  ;;  %3960 = vmatprep.subr.bf16.mxu1 %v8673_v36  ;;  %v890_v53 = vld [vmem:[#allocation4 + $0x5c8] sm:$0xff]  ;;  %v8235_v36 = vcombine.high %v762_v50, %v766_v52 }
 0x172   :  { %v894_v54 = vld [vmem:[#allocation4 + $0x5e8] sm:$0xff] }
 0x173   :  { %v8363_v41 = vcombine.high %v890_v53, %v894_v54  ;;  %v8362_v30 = vcombine.low %v890_v53, %v894_v54  ;;  %v714_v45 = vld [vmem:[#allocation4 + $0x48] sm:$0xff] }
 0x174   :  { %3920 = vmatpush2.bf16.msra.mxu0 %v8544_v57  ;;  %3961 = vmatpush2.bf16.msra.mxu1 %v8672_v58  ;;  %v758_v57 = vld [vmem:[#allocation4 + $0x1a8] sm:$0xff]  ;;  %v10254_v58 = vpack.c.bf16 %v695_v12, %v695_v12 }
 0x175   :  { %3921 = vmatprep.subr.bf16.mxu0 %v8537_v59  ;;  %3962 = vmatprep.subr.bf16.mxu1 %v8665_v63  ;;  %v8234_v59 = vcombine.low %v762_v50, %v766_v52  ;;  %v8227_v26 = vcombine.high %v754_v44, %v758_v57  ;;  %v746_v63 = vld [vmem:[#allocation4 + $0x148] sm:$0xff]  ;;  %v8226_v5 = vcombine.low %v754_v44, %v758_v57 }
 0x176   :  { %v8219_v7 = vcombine.high %v746_v63, %v750_v1  ;;  %v706_v54 = vld [vmem:[#allocation4 + $0x8] sm:$0xff] }
 0x177   :  { %v710_v12 = vld [vmem:[#allocation4 + $0x28] sm:$0xff] }
 0x178   :  { %3922 = vmatpush2.bf16.msra.mxu0 %v8536_v2  ;;  %3963 = vmatpush2.bf16.msra.mxu1 %v8664_v3  ;;  %v8355_v2 = vcombine.high %v882_v60, %v886_v61  ;;  %v874_v3 = vld [vmem:[#allocation4 + $0x548] sm:$0xff] }
 0x179   :  { %3923 = vmatprep.subr.bf16.mxu0 %v8529_v4  ;;  %3964 = vmatprep.subr.bf16.mxu1 %v8657_v8  ;;  %v878_v4 = vld [vmem:[#allocation4 + $0x568] sm:$0xff] }
 0x17a   :  { %v8347_v8 = vcombine.high %v874_v3, %v878_v4  ;;  %v8346_v15 = vcombine.low %v874_v3, %v878_v4  ;;  %v826_v57 = vld [vmem:[#allocation4 + $0x3c8] sm:$0xff] }
 0x17b   :  { %v954_v60 = vld [vmem:[#allocation4 + $0x7c8] sm:$0xff] }
 0x17c   :  { %3924 = vmatpush2.bf16.msra.mxu0 %v8528_v10  ;;  %3965 = vmatpush2.bf16.msra.mxu1 %v8656_v11  ;;  %v742_v10 = vld [vmem:[#allocation4 + $0x128] sm:$0xff] }
 0x17d   :  { %3925 = vmatprep.subr.bf16.mxu0 %v8521_v13  ;;  %3966 = vmatprep.subr.bf16.mxu1 %v8649_v14  ;;  %v866_v11 = vld [vmem:[#allocation4 + $0x508] sm:$0xff]  ;;  %v8218_v14 = vcombine.low %v746_v63, %v750_v1  ;;  %v8211_v16 = vcombine.high %v738_v9, %v742_v10 }
 0x17e   :  { %v870_v13 = vld [vmem:[#allocation4 + $0x528] sm:$0xff] }
 0x17f   :  { %v8339_v17 = vcombine.high %v866_v11, %v870_v13  ;;  %v8338_v23 = vcombine.low %v866_v11, %v870_v13  ;;  %v958_v61 = vld [vmem:[#allocation4 + $0x7e8] sm:$0xff] }
 0x180   :  { %3926 = vmatpush2.bf16.msra.mxu0 %v8520_v19  ;;  %3967 = vmatpush2.bf16.msra.mxu1 %v8648_v20  ;;  %v734_v19 = vld [vmem:[#allocation4 + $0xe8] sm:$0xff]  ;;  %v8427_v1 = vcombine.high %v954_v60, %v958_v61 }
 0x181   :  { %3927 = vmatprep.subr.bf16.mxu0 %v8513_v21  ;;  %3968 = vmatprep.subr.bf16.mxu1 %v8641_v22  ;;  %v858_v20 = vld [vmem:[#allocation4 + $0x4c8] sm:$0xff]  ;;  %v8210_v22 = vcombine.low %v738_v9, %v742_v10  ;;  %v8203_v24 = vcombine.high %v730_v18, %v734_v19 }
 0x182   :  { %v862_v21 = vld [vmem:[#allocation4 + $0x4e8] sm:$0xff] }
 0x183   :  { %v8331_v25 = vcombine.high %v858_v20, %v862_v21  ;;  %v8330_v39 = vcombine.low %v858_v20, %v862_v21  ;;  %v822_v3 = vld [vmem:[#allocation4 + $0x3a8] sm:$0xff] }
 0x184   :  { %3928 = vmatpush2.bf16.msra.mxu0 %v8512_v33  ;;  %3969 = vmatpush2.bf16.msra.mxu1 %v8640_v34  ;;  %v726_v33 = vld [vmem:[#allocation4 + $0xa8] sm:$0xff] }
 0x185   :  { %3929 = vmatprep.subr.bf16.mxu0 %v8505_v37  ;;  %3970 = vmatprep.subr.bf16.mxu1 %v8633_v38  ;;  %v850_v34 = vld [vmem:[#allocation4 + $0x488] sm:$0xff]  ;;  %v8202_v38 = vcombine.low %v730_v18, %v734_v19  ;;  %v8195_v40 = vcombine.high %v722_v27, %v726_v33 }
 0x186   :  { %v854_v37 = vld [vmem:[#allocation4 + $0x4a8] sm:$0xff] }
 0x187   :  { %v8323_v42 = vcombine.high %v850_v34, %v854_v37  ;;  %v8322_v50 = vcombine.low %v850_v34, %v854_v37  ;;  %v946_v4 = vld [vmem:[#allocation4 + $0x788] sm:$0xff] }
 0x188   :  { %3930 = vmatpush2.bf16.msra.mxu0 %v8504_v46  ;;  %3971 = vmatpush2.bf16.msra.mxu1 %v8632_v47  ;;  %v718_v46 = vld [vmem:[#allocation4 + $0x68] sm:$0xff] }
 0x189   :  { %3931 = vmatprep.subr.bf16.mxu0 %v8497_v48  ;;  %3972 = vmatprep.subr.bf16.mxu1 %v8625_v49  ;;  %v842_v47 = vld [vmem:[#allocation4 + $0x448] sm:$0xff]  ;;  %v8194_v49 = vcombine.low %v722_v27, %v726_v33  ;;  %v8187_v52 = vcombine.high %v714_v45, %v718_v46 }
 0x18a   :  { %v846_v48 = vld [vmem:[#allocation4 + $0x468] sm:$0xff] }
 0x18b   :  { %v8315_v53 = vcombine.high %v842_v47, %v846_v48  ;;  %v810_v10 = vld [vmem:[#allocation4 + $0x348] sm:$0xff] }
 0x18c   :  { %3932 = vmatpush2.bf16.msra.mxu0 %v8496_v35  ;;  %3973 = vmatpush2.bf16.msra.mxu1 %v8624_v56  ;;  %v834_v35 = vld [vmem:[#allocation4 + $0x408] sm:$0xff]  ;;  %v8186_v56 = vcombine.low %v714_v45, %v718_v46 }
 0x18d   :  { %3983 = vmatprep.subr.bf16.mxu0 %v8235_v36  ;;  %4024 = vmatprep.subr.bf16.mxu1 %v8363_v41  ;;  %v8314_v36 = vcombine.low %v842_v47, %v846_v48  ;;  %v8179_v41 = vcombine.high %v706_v54, %v710_v12  ;;  %v8307_v44 = vcombine.high %v834_v35, %v838_v43  ;;  %v814_v11 = vld [vmem:[#allocation4 + $0x368] sm:$0xff] }
 0x18e   :  { %v938_v13 = vld [vmem:[#allocation4 + $0x748] sm:$0xff] }
 0x18f   :  { %3934 = vmatmul.mubr.bf16.vlgmr.msra.gmra.mxu0 %v10256_v62  ;;  %3975 = vmatmul.mubr.bf16.vlgmr.msra.gmra.mxu1 %v10254_v58  ;;  %v802_v19 = vld [vmem:[#allocation4 + $0x308] sm:$0xff] }
 0x190   :  { %3984 = vmatpush1.bf16.msra.mxu0 %v8234_v59  ;;  %4015 = vmatprep.mubr.bf16.mxu0 %v10226_v29  ;;  %v830_v59 = vld [vmem:[#allocation4 + $0x3e8] sm:$0xff] }
 0x191   :  { %4025 = vmatpush1.bf16.msra.mxu1 %v8362_v30  ;;  %4056 = vmatprep.mubr.bf16.mxu1 %v10230_v32  ;;  %v8178_v30 = vcombine.low %v706_v54, %v710_v12  ;;  %v8299_v63 = vcombine.high %v826_v57, %v830_v59  ;;  %v806_v20 = vld [vmem:[#allocation4 + $0x328] sm:$0xff] }
 0x192   :  { %3985 = vmatprep.subr.bf16.mxu0 %v8227_v26  ;;  %4026 = vmatprep.subr.bf16.mxu1 %v8355_v2  ;;  %v8306_v26 = vcombine.low %v834_v35, %v838_v43  ;;  %v818_v2 = vld [vmem:[#allocation4 + $0x388] sm:$0xff] }
 0x193   :  { %v930_v21 = vld [vmem:[#allocation4 + $0x708] sm:$0xff] }
 0x194   :  { %3986 = vmatpush1.bf16.msra.mxu0 %v8226_v5  ;;  %v950_v5 = vld [vmem:[#allocation4 + $0x7a8] sm:$0xff] }
 0x195   :  { %4027 = vmatpush1.bf16.msra.mxu1 %v8354_v6  ;;  %3987 = vmatprep.subr.bf16.mxu0 %v8219_v7  ;;  %v8298_v6 = vcombine.low %v826_v57, %v830_v59  ;;  %v8426_v7 = vcombine.low %v954_v60, %v958_v61  ;;  %v8419_v9 = vcombine.high %v946_v4, %v950_v5  ;;  %v794_v33 = vld [vmem:[#allocation4 + $0x2c8] sm:$0xff] }
 0x196   :  { %4028 = vmatprep.subr.bf16.mxu1 %v8347_v8  ;;  %v8291_v8 = vcombine.high %v818_v2, %v822_v3  ;;  %v798_v34 = vld [vmem:[#allocation4 + $0x2e8] sm:$0xff] }
 0x197   :  { %v922_v37 = vld [vmem:[#allocation4 + $0x6c8] sm:$0xff] }
 0x198   :  { %3988 = vmatpush1.bf16.msra.mxu0 %v8218_v14  ;;  %v942_v14 = vld [vmem:[#allocation4 + $0x768] sm:$0xff] }
 0x199   :  { %4029 = vmatpush1.bf16.msra.mxu1 %v8346_v15  ;;  %3989 = vmatprep.subr.bf16.mxu0 %v8211_v16  ;;  %v8290_v15 = vcombine.low %v818_v2, %v822_v3  ;;  %v8418_v16 = vcombine.low %v946_v4, %v950_v5  ;;  %v8411_v18 = vcombine.high %v938_v13, %v942_v14  ;;  %v786_v46 = vld [vmem:[#allocation4 + $0x288] sm:$0xff] }
 0x19a   :  { %4030 = vmatprep.subr.bf16.mxu1 %v8339_v17  ;;  %v8283_v17 = vcombine.high %v810_v10, %v814_v11  ;;  %v790_v47 = vld [vmem:[#allocation4 + $0x2a8] sm:$0xff] }
 0x19b   :  { %v914_v48 = vld [vmem:[#allocation4 + $0x688] sm:$0xff] }
 0x19c   :  { %3990 = vmatpush1.bf16.msra.mxu0 %v8210_v22  ;;  %v934_v22 = vld [vmem:[#allocation4 + $0x728] sm:$0xff] }
 0x19d   :  { %4031 = vmatpush1.bf16.msra.mxu1 %v8338_v23  ;;  %3991 = vmatprep.subr.bf16.mxu0 %v8203_v24  ;;  %v8282_v23 = vcombine.low %v810_v10, %v814_v11  ;;  %v8410_v24 = vcombine.low %v938_v13, %v942_v14  ;;  %v8403_v27 = vcombine.high %v930_v21, %v934_v22  ;;  %v778_v12 = vld [vmem:[#allocation4 + $0x248] sm:$0xff] }
 0x19e   :  { %4032 = vmatprep.subr.bf16.mxu1 %v8331_v25  ;;  %v8275_v25 = vcombine.high %v802_v19, %v806_v20  ;;  %v782_v35 = vld [vmem:[#allocation4 + $0x268] sm:$0xff] }
 0x19f   :  { %v906_v43 = vld [vmem:[#allocation4 + $0x648] sm:$0xff] }
 0x1a0   :  { %3992 = vmatpush1.bf16.msra.mxu0 %v8202_v38  ;;  %v926_v38 = vld [vmem:[#allocation4 + $0x6e8] sm:$0xff] }
 0x1a1   :  { %4033 = vmatpush1.bf16.msra.mxu1 %v8330_v39  ;;  %3993 = vmatprep.subr.bf16.mxu0 %v8195_v40  ;;  %v8274_v39 = vcombine.low %v802_v19, %v806_v20  ;;  %v8402_v40 = vcombine.low %v930_v21, %v934_v22  ;;  %v8395_v45 = vcombine.high %v922_v37, %v926_v38  ;;  %v770_v59 = vld [vmem:[#allocation4 + $0x208] sm:$0xff] }
 0x1a2   :  { %4034 = vmatprep.subr.bf16.mxu1 %v8323_v42  ;;  %v8267_v42 = vcombine.high %v794_v33, %v798_v34  ;;  %v774_v60 = vld [vmem:[#allocation4 + $0x228] sm:$0xff] }
 0x1a3   :  { %v898_v61 = vld [vmem:[#allocation4 + $0x608] sm:$0xff] }
 0x1a4   :  { %3994 = vmatpush1.bf16.msra.mxu0 %v8194_v49  ;;  %v918_v49 = vld [vmem:[#allocation4 + $0x6a8] sm:$0xff] }
 0x1a5   :  { %4035 = vmatpush1.bf16.msra.mxu1 %v8322_v50  ;;  %3995 = vmatprep.subr.bf16.mxu0 %v8187_v52  ;;  %v8266_v50 = vcombine.low %v794_v33, %v798_v34  ;;  %v8394_v52 = vcombine.low %v922_v37, %v926_v38  ;;  %v8387_v54 = vcombine.high %v914_v48, %v918_v49  ;;  %v1018_v3 = vld [vmem:[#allocation4 + $0x9c8] sm:$0xff] }
 0x1a6   :  { %4036 = vmatprep.subr.bf16.mxu1 %v8315_v53  ;;  %v8259_v53 = vcombine.high %v786_v46, %v790_v47  ;;  %v1022_v4 = vld [vmem:[#allocation4 + $0x9e8] sm:$0xff] }
 0x1a7   :  { %v1146_v5 = vld [vmem:[#allocation4 + $0xdc8] sm:$0xff]  ;;  %v8490_v14 = vcombine.low %v1018_v3, %v1022_v4 }
 0x1a8   :  { %3996 = vmatpush1.bf16.msra.mxu0 %v8186_v56  ;;  %v910_v56 = vld [vmem:[#allocation4 + $0x668] sm:$0xff] }
 0x1a9   :  { %4037 = vmatpush1.bf16.msra.mxu1 %v8314_v36  ;;  %3997 = vmatprep.subr.bf16.mxu0 %v8179_v41  ;;  %v8258_v36 = vcombine.low %v786_v46, %v790_v47  ;;  %v8386_v41 = vcombine.low %v914_v48, %v918_v49  ;;  %v8379_v57 = vcombine.high %v906_v43, %v910_v56  ;;  %v1010_v11 = vld [vmem:[#allocation4 + $0x988] sm:$0xff] }
 0x1aa   :  { %4038 = vmatprep.subr.bf16.mxu1 %v8307_v44  ;;  %v8251_v44 = vcombine.high %v778_v12, %v782_v35  ;;  %v1014_v13 = vld [vmem:[#allocation4 + $0x9a8] sm:$0xff] }
 0x1ab   :  { %v1002_v19 = vld [vmem:[#allocation4 + $0x948] sm:$0xff] }
 0x1ac   :  { %3998 = vmatpush1.bf16.msra.mxu0 %v8178_v30  ;;  %v902_v30 = vld [vmem:[#allocation4 + $0x628] sm:$0xff] }
 0x1ad   :  { %4039 = vmatpush1.bf16.msra.mxu1 %v8306_v26  ;;  %3999 = vmatprep.subr.bf16.mxu0 %v8299_v63  ;;  %v8250_v26 = vcombine.low %v778_v12, %v782_v35  ;;  %v8378_v63 = vcombine.low %v906_v43, %v910_v56  ;;  %v8371_v2 = vcombine.high %v898_v61, %v902_v30  ;;  %v1006_v20 = vld [vmem:[#allocation4 + $0x968] sm:$0xff] }
 0x1ae   :  { %4040 = vmatprep.subr.bf16.mxu1 %v8427_v1  ;;  %v8243_v1 = vcombine.high %v770_v59, %v774_v60  ;;  %v1130_v22 = vld [vmem:[#allocation4 + $0xd48] sm:$0xff] }
 0x1af   :  { %v994_v34 = vld [vmem:[#allocation4 + $0x908] sm:$0xff] }
 0x1b0   :  { %4000 = vmatpush2.bf16.msra.mxu0 %v8298_v6  ;;  %v1150_v6 = vld [vmem:[#allocation4 + $0xde8] sm:$0xff] }
 0x1b1   :  { %4041 = vmatpush2.bf16.msra.mxu1 %v8426_v7  ;;  %4001 = vmatprep.subr.bf16.mxu0 %v8291_v8  ;;  %v8242_v7 = vcombine.low %v770_v59, %v774_v60  ;;  %v8370_v8 = vcombine.low %v898_v61, %v902_v30  ;;  %v8619_v10 = vcombine.high %v1146_v5, %v1150_v6  ;;  %v998_v37 = vld [vmem:[#allocation4 + $0x928] sm:$0xff] }
 0x1b2   :  { %4042 = vmatprep.subr.bf16.mxu1 %v8419_v9  ;;  %v8491_v9 = vcombine.high %v1018_v3, %v1022_v4  ;;  %v1122_v38 = vld [vmem:[#allocation4 + $0xd08] sm:$0xff] }
 0x1b3   :  { %v986_v47 = vld [vmem:[#allocation4 + $0x8c8] sm:$0xff] }
 0x1b4   :  { %4002 = vmatpush2.bf16.msra.mxu0 %v8290_v15  ;;  %v1138_v15 = vld [vmem:[#allocation4 + $0xd88] sm:$0xff] }
 0x1b5   :  { %4043 = vmatpush2.bf16.msra.mxu1 %v8418_v16  ;;  %4003 = vmatprep.subr.bf16.mxu0 %v8283_v17  ;;  %v1142_v16 = vld [vmem:[#allocation4 + $0xda8] sm:$0xff]  ;;  %v8618_v17 = vcombine.low %v1146_v5, %v1150_v6 }
 0x1b6   :  { %4044 = vmatprep.subr.bf16.mxu1 %v8411_v18  ;;  %v8483_v18 = vcombine.high %v1010_v11, %v1014_v13  ;;  %v8611_v21 = vcombine.high %v1138_v15, %v1142_v16  ;;  %v990_v48 = vld [vmem:[#allocation4 + $0x8e8] sm:$0xff] }
 0x1b7   :  { %v1114_v49 = vld [vmem:[#allocation4 + $0xcc8] sm:$0xff] }
 0x1b8   :  { %4004 = vmatpush2.bf16.msra.mxu0 %v8282_v23  ;;  %v1134_v23 = vld [vmem:[#allocation4 + $0xd68] sm:$0xff] }
 0x1b9   :  { %4045 = vmatpush2.bf16.msra.mxu1 %v8410_v24  ;;  %4005 = vmatprep.subr.bf16.mxu0 %v8275_v25  ;;  %v8482_v24 = vcombine.low %v1010_v11, %v1014_v13  ;;  %v8610_v25 = vcombine.low %v1138_v15, %v1142_v16  ;;  %v8603_v33 = vcombine.high %v1130_v22, %v1134_v23  ;;  %v978_v35 = vld [vmem:[#allocation4 + $0x888] sm:$0xff] }
 0x1ba   :  { %4046 = vmatprep.subr.bf16.mxu1 %v8403_v27  ;;  %v8475_v27 = vcombine.high %v1002_v19, %v1006_v20  ;;  %v982_v43 = vld [vmem:[#allocation4 + $0x8a8] sm:$0xff] }
 0x1bb   :  { %v1106_v56 = vld [vmem:[#allocation4 + $0xc88] sm:$0xff] }
 0x1bc   :  { %4006 = vmatpush2.bf16.msra.mxu0 %v8274_v39  ;;  %v1126_v39 = vld [vmem:[#allocation4 + $0xd28] sm:$0xff] }
 0x1bd   :  { %4047 = vmatpush2.bf16.msra.mxu1 %v8402_v40  ;;  %4007 = vmatprep.subr.bf16.mxu0 %v8267_v42  ;;  %v8474_v40 = vcombine.low %v1002_v19, %v1006_v20  ;;  %v8602_v42 = vcombine.low %v1130_v22, %v1134_v23  ;;  %v8595_v46 = vcombine.high %v1122_v38, %v1126_v39  ;;  %v970_v60 = vld [vmem:[#allocation4 + $0x848] sm:$0xff] }
 0x1be   :  { %4048 = vmatprep.subr.bf16.mxu1 %v8395_v45  ;;  %v8467_v45 = vcombine.high %v994_v34, %v998_v37  ;;  %v974_v61 = vld [vmem:[#allocation4 + $0x868] sm:$0xff] }
 0x1bf   :  { %v1098_v30 = vld [vmem:[#allocation4 + $0xc48] sm:$0xff] }
 0x1c0   :  { %4008 = vmatpush2.bf16.msra.mxu0 %v8266_v50  ;;  %v1118_v50 = vld [vmem:[#allocation4 + $0xce8] sm:$0xff] }
 0x1c1   :  { %4049 = vmatpush2.bf16.msra.mxu1 %v8394_v52  ;;  %4009 = vmatprep.subr.bf16.mxu0 %v8259_v53  ;;  %v8466_v52 = vcombine.low %v994_v34, %v998_v37  ;;  %v8594_v53 = vcombine.low %v1122_v38, %v1126_v39  ;;  %v8587_v12 = vcombine.high %v1114_v49, %v1118_v50  ;;  %v962_v4 = vld [vmem:[#allocation4 + $0x808] sm:$0xff] }
 0x1c2   :  { %4050 = vmatprep.subr.bf16.mxu1 %v8387_v54  ;;  %v8459_v54 = vcombine.high %v986_v47, %v990_v48  ;;  %v966_v5 = vld [vmem:[#allocation4 + $0x828] sm:$0xff] }
 0x1c3   :  { %v1090_v6 = vld [vmem:[#allocation4 + $0xc08] sm:$0xff] }
 0x1c4   :  { %4010 = vmatpush2.bf16.msra.mxu0 %v8258_v36  ;;  %v1110_v36 = vld [vmem:[#allocation4 + $0xca8] sm:$0xff] }
 0x1c5   :  { %4051 = vmatpush2.bf16.msra.mxu1 %v8386_v41  ;;  %4011 = vmatprep.subr.bf16.mxu0 %v8251_v44  ;;  %v8458_v41 = vcombine.low %v986_v47, %v990_v48  ;;  %v8586_v44 = vcombine.low %v1114_v49, %v1118_v50  ;;  %v8579_v59 = vcombine.high %v1106_v56, %v1110_v36  ;;  %v1082_v13 = vld [vmem:[#allocation4 + $0xbc8] sm:$0xff] }
 0x1c6   :  { %4052 = vmatprep.subr.bf16.mxu1 %v8379_v57  ;;  %v8451_v57 = vcombine.high %v978_v35, %v982_v43  ;;  %v1210_v15 = vld [vmem:[#allocation4 + $0xfc8] sm:$0xff] }
 0x1c7   :  { %v1214_v16 = vld [vmem:[#allocation4 + $0xfe8] sm:$0xff] }
 0x1c8   :  { %4012 = vmatpush2.bf16.msra.mxu0 %v8250_v26  ;;  %v1102_v26 = vld [vmem:[#allocation4 + $0xc68] sm:$0xff]  ;;  %v8683_v20 = vcombine.high %v1210_v15, %v1214_v16 }
 0x1c9   :  { %4053 = vmatpush2.bf16.msra.mxu1 %v8378_v63  ;;  %4013 = vmatprep.subr.bf16.mxu0 %v8243_v1  ;;  %v8450_v63 = vcombine.low %v978_v35, %v982_v43  ;;  %v8578_v1 = vcombine.low %v1106_v56, %v1110_v36  ;;  %v8571_v3 = vcombine.high %v1098_v30, %v1102_v26  ;;  %v1078_v22 = vld [vmem:[#allocation4 + $0xba8] sm:$0xff] }
 0x1ca   :  { %4054 = vmatprep.subr.bf16.mxu1 %v8371_v2  ;;  %v8443_v2 = vcombine.high %v970_v60, %v974_v61  ;;  %v1202_v23 = vld [vmem:[#allocation4 + $0xf88] sm:$0xff] }
 0x1cb   :  { %v1066_v37 = vld [vmem:[#allocation4 + $0xb48] sm:$0xff] }
 0x1cc   :  { %4014 = vmatpush2.bf16.msra.mxu0 %v8242_v7  ;;  %v1094_v7 = vld [vmem:[#allocation4 + $0xc28] sm:$0xff] }
 0x1cd   :  { %4055 = vmatpush2.bf16.msra.mxu1 %v8370_v8  ;;  %4065 = vmatprep.subr.bf16.mxu0 %v8491_v9  ;;  %v8442_v8 = vcombine.low %v970_v60, %v974_v61  ;;  %v8570_v9 = vcombine.low %v1098_v30, %v1102_v26  ;;  %v8563_v11 = vcombine.high %v1090_v6, %v1094_v7  ;;  %v1070_v38 = vld [vmem:[#allocation4 + $0xb68] sm:$0xff] }
 0x1ce   :  { %4106 = vmatprep.subr.bf16.mxu1 %v8619_v10  ;;  %v8435_v10 = vcombine.high %v962_v4, %v966_v5  ;;  %v1194_v39 = vld [vmem:[#allocation4 + $0xf48] sm:$0xff] }
 0x1cf   :  { %4016 = vmatmul.mubr.bf16.vlgmr.msra.gmra.mxu0 %v10228_v31  ;;  %v1058_v48 = vld [vmem:[#allocation4 + $0xb08] sm:$0xff] }
 0x1d0   :  { %4057 = vmatmul.mubr.bf16.vlgmr.msra.gmra.mxu1 %v10224_v28  ;;  %4066 = vmatpush1.bf16.msra.mxu0 %v8490_v14  ;;  %v1086_v14 = vld [vmem:[#allocation4 + $0xbe8] sm:$0xff] }
 0x1d1   :  { %4097 = vmatprep.mubr.bf16.mxu0 %v10246_v51  ;;  %4107 = vmatpush1.bf16.msra.mxu1 %v8618_v17  ;;  %v8434_v17 = vcombine.low %v962_v4, %v966_v5  ;;  %v8555_v19 = vcombine.high %v1082_v13, %v1086_v14  ;;  %v1062_v49 = vld [vmem:[#allocation4 + $0xb28] sm:$0xff] }
 0x1d2   :  { %4138 = vmatprep.mubr.bf16.mxu1 %v10248_v55  ;;  %4067 = vmatprep.subr.bf16.mxu0 %v8483_v18  ;;  %v8562_v18 = vcombine.low %v1090_v6, %v1094_v7  ;;  %v1186_v50 = vld [vmem:[#allocation4 + $0xf08] sm:$0xff] }
 0x1d3   :  { %4108 = vmatprep.subr.bf16.mxu1 %v8611_v21  ;;  %v1074_v21 = vld [vmem:[#allocation4 + $0xb88] sm:$0xff] }
 0x1d4   :  { %4068 = vmatpush1.bf16.msra.mxu0 %v8482_v24  ;;  %v1206_v24 = vld [vmem:[#allocation4 + $0xfa8] sm:$0xff] }
 0x1d5   :  { %4109 = vmatpush1.bf16.msra.mxu1 %v8610_v25  ;;  %4069 = vmatprep.subr.bf16.mxu0 %v8475_v27  ;;  %v8554_v25 = vcombine.low %v1082_v13, %v1086_v14  ;;  %v8682_v27 = vcombine.low %v1210_v15, %v1214_v16  ;;  %v8675_v34 = vcombine.high %v1202_v23, %v1206_v24  ;;  %v1050_v43 = vld [vmem:[#allocation4 + $0xac8] sm:$0xff] }
 0x1d6   :  { %4110 = vmatprep.subr.bf16.mxu1 %v8603_v33  ;;  %v8547_v33 = vcombine.high %v1074_v21, %v1078_v22  ;;  %v1054_v56 = vld [vmem:[#allocation4 + $0xae8] sm:$0xff] }
 0x1d7   :  { %v1178_v36 = vld [vmem:[#allocation4 + $0xec8] sm:$0xff] }
 0x1d8   :  { %4070 = vmatpush1.bf16.msra.mxu0 %v8474_v40  ;;  %v1198_v40 = vld [vmem:[#allocation4 + $0xf68] sm:$0xff] }
 0x1d9   :  { %4111 = vmatpush1.bf16.msra.mxu1 %v8602_v42  ;;  %4071 = vmatprep.subr.bf16.mxu0 %v8467_v45  ;;  %v8546_v42 = vcombine.low %v1074_v21, %v1078_v22  ;;  %v8674_v45 = vcombine.low %v1202_v23, %v1206_v24  ;;  %v8667_v47 = vcombine.high %v1194_v39, %v1198_v40  ;;  %v1042_v61 = vld [vmem:[#allocation4 + $0xa88] sm:$0xff]  ;;  %v763_v24 = vld [vmem:[#allocation4 + $0x1d0] sm:$0xff] }
 0x1da   :  { %4112 = vmatprep.subr.bf16.mxu1 %v8595_v46  ;;  %v8539_v46 = vcombine.high %v1066_v37, %v1070_v38  ;;  %v1046_v30 = vld [vmem:[#allocation4 + $0xaa8] sm:$0xff] }
 0x1db   :  { %v1170_v26 = vld [vmem:[#allocation4 + $0xe88] sm:$0xff] }
 0x1dc   :  { %4072 = vmatpush1.bf16.msra.mxu0 %v8466_v52  ;;  %v1190_v52 = vld [vmem:[#allocation4 + $0xf28] sm:$0xff] }
 0x1dd   :  { %4113 = vmatpush1.bf16.msra.mxu1 %v8594_v53  ;;  %4073 = vmatprep.subr.bf16.mxu0 %v8459_v54  ;;  %v8538_v53 = vcombine.low %v1066_v37, %v1070_v38  ;;  %v8666_v54 = vcombine.low %v1194_v39, %v1198_v40  ;;  %v8659_v35 = vcombine.high %v1186_v50, %v1190_v52  ;;  %v1034_v5 = vld [vmem:[#allocation4 + $0xa48] sm:$0xff]  ;;  %v10272_v40 = vld [vmem:[#allocation13] sm:$0xff] }
 0x1de   :  { %4114 = vmatprep.subr.bf16.mxu1 %v8587_v12  ;;  %v8531_v12 = vcombine.high %v1058_v48, %v1062_v49  ;;  %v1038_v6 = vld [vmem:[#allocation4 + $0xa68] sm:$0xff] }
 0x1df   :  { %v1162_v7 = vld [vmem:[#allocation4 + $0xe48] sm:$0xff]  ;;  %v8507_v13 = vcombine.high %v1034_v5, %v1038_v6 }
 0x1e0   :  { %4074 = vmatpush1.bf16.msra.mxu0 %v8458_v41  ;;  %v1182_v41 = vld [vmem:[#allocation4 + $0xee8] sm:$0xff] }
 0x1e1   :  { %4115 = vmatpush1.bf16.msra.mxu1 %v8586_v44  ;;  %4075 = vmatprep.subr.bf16.mxu0 %v8451_v57  ;;  %v8530_v44 = vcombine.low %v1058_v48, %v1062_v49  ;;  %v8658_v57 = vcombine.low %v1186_v50, %v1190_v52  ;;  %v8651_v60 = vcombine.high %v1178_v36, %v1182_v41  ;;  %v1026_v15 = vld [vmem:[#allocation4 + $0xa08] sm:$0xff]  ;;  %v883_v50 = vld [vmem:[#allocation4 + $0x590] sm:$0xff] }
 0x1e2   :  { %4116 = vmatprep.subr.bf16.mxu1 %v8579_v59  ;;  %v8523_v59 = vcombine.high %v1050_v43, %v1054_v56  ;;  %v1030_v16 = vld [vmem:[#allocation4 + $0xa28] sm:$0xff]  ;;  %v887_v52 = vld [vmem:[#allocation4 + $0x5b0] sm:$0xff] }
 0x1e3   :  { %v8499_v22 = vcombine.high %v1026_v15, %v1030_v16 }
 0x1e4   :  { %4076 = vmatpush1.bf16.msra.mxu0 %v8450_v63  ;;  %v1174_v63 = vld [vmem:[#allocation4 + $0xea8] sm:$0xff] }
 0x1e5   :  { %4117 = vmatpush1.bf16.msra.mxu1 %v8578_v1  ;;  %4077 = vmatprep.subr.bf16.mxu0 %v8443_v2  ;;  %v8522_v1 = vcombine.low %v1050_v43, %v1054_v56  ;;  %v8650_v2 = vcombine.low %v1178_v36, %v1182_v41  ;;  %v8643_v4 = vcombine.high %v1170_v26, %v1174_v63  ;;  %v751_v43 = vld [vmem:[#allocation4 + $0x170] sm:$0xff] }
 0x1e6   :  { %4118 = vmatprep.subr.bf16.mxu1 %v8571_v3  ;;  %v8515_v3 = vcombine.high %v1042_v61, %v1046_v30  ;;  %v8357_v36 = vcombine.high %v883_v50, %v887_v52  ;;  %v875_v41 = vld [vmem:[#allocation4 + $0x550] sm:$0xff] }
 0x1e8   :  { %4078 = vmatpush1.bf16.msra.mxu0 %v8442_v8  ;;  %v1166_v8 = vld [vmem:[#allocation4 + $0xe68] sm:$0xff] }
 0x1e9   :  { %4119 = vmatpush1.bf16.msra.mxu1 %v8570_v9  ;;  %4079 = vmatprep.subr.bf16.mxu0 %v8435_v10  ;;  %v8514_v9 = vcombine.low %v1042_v61, %v1046_v30  ;;  %v1219_v10 = vlaneseq  ;;  %v8635_v14 = vcombine.high %v1162_v7, %v1166_v8  ;;  %v8634_v21 = vcombine.low %v1162_v7, %v1166_v8  ;;  %v867_v7 = vld [vmem:[#allocation4 + $0x510] sm:$0xff] }
 0x1ea   :  { %4120 = vmatprep.subr.bf16.mxu1 %v8563_v11  ;;  %v8642_v11 = vcombine.low %v1170_v26, %v1174_v63  ;;  %v8356_v30 = vcombine.low %v883_v50, %v887_v52  ;;  %v871_v8 = vld [vmem:[#allocation4 + $0x530] sm:$0xff] }
 0x1eb   :  { %v715_v50 = vld [vmem:[#allocation4 + $0x50] sm:$0xff] }
 0x1ec   :  { %4080 = vmatpush1.bf16.msra.mxu0 %v8434_v17  ;;  %v1154_v17 = vld [vmem:[#allocation4 + $0xe08] sm:$0xff]  ;;  %v719_v52 = vld [vmem:[#allocation4 + $0x70] sm:$0xff] }
 0x1ed   :  { %4121 = vmatpush1.bf16.msra.mxu1 %v8562_v18  ;;  %4081 = vmatprep.subr.bf16.mxu0 %v8555_v19  ;;  %v1158_v18 = vld [vmem:[#allocation4 + $0xe28] sm:$0xff]  ;;  %v8506_v19 = vcombine.low %v1034_v5, %v1038_v6  ;;  %v743_v5 = vld [vmem:[#allocation4 + $0x130] sm:$0xff] }
 0x1ee   :  { %4122 = vmatprep.subr.bf16.mxu1 %v8683_v20  ;;  %v10267_v20 = vshrl.u32 %v1219_v10, 7  ;;  %v8627_v23 = vcombine.high %v1154_v17, %v1158_v18  ;;  %v8626_v38 = vcombine.low %v1154_v17, %v1158_v18  ;;  %v8341_v18 = vcombine.high %v867_v7, %v871_v8 }
 0x1f0   :  { %4082 = vmatpush2.bf16.msra.mxu0 %v8554_v25  ;;  %v767_v25 = vld [vmem:[#allocation4 + $0x1f0] sm:$0xff]  ;;  %v10270_v37 = vsub.s32 0, %v10267_v20 }
 0x1f1   :  { %4123 = vmatpush2.bf16.msra.mxu1 %v8682_v27  ;;  %4083 = vmatprep.subr.bf16.mxu0 %v8547_v33  ;;  %v891_v27 = vld [vmem:[#allocation4 + $0x5d0] sm:$0xff]  ;;  %v8237_v39 = vcombine.high %v763_v24, %v767_v25  ;;  %v8236_v48 = vcombine.low %v763_v24, %v767_v25  ;;  %v8340_v25 = vcombine.low %v867_v7, %v871_v8 }
 0x1f2   :  { %4124 = vmatprep.subr.bf16.mxu1 %v8675_v34  ;;  %v895_v33 = vld [vmem:[#allocation4 + $0x5f0] sm:$0xff]  ;;  %v8498_v34 = vcombine.low %v1026_v15, %v1030_v16  ;;  %v1222_v49 = vrot.slane %v10272_v40, %v10270_v37 }
 0x1f3   :  { %v819_v8 = vld [vmem:[#allocation4 + $0x390] sm:$0xff] }
 0x1f4   :  { %4084 = vmatpush2.bf16.msra.mxu0 %v8546_v42  ;;  %v8365_v42 = vcombine.high %v891_v27, %v895_v33 }
 0x1f5   :  { %4125 = vmatpush2.bf16.msra.mxu1 %v8674_v45  ;;  %4085 = vmatprep.subr.bf16.mxu0 %v8539_v46  ;;  %v10275_v45 = vsub.s32 1, %v10267_v20  ;;  %v755_v46 = vld [vmem:[#allocation4 + $0x190] sm:$0xff] }
 0x1f6   :  { %4126 = vmatprep.subr.bf16.mxu1 %v8667_v47  ;;  %v759_v47 = vld [vmem:[#allocation4 + $0x1b0] sm:$0xff] }
 0x1f8   :  { %4086 = vmatpush2.bf16.msra.mxu0 %v8538_v53  ;;  %v8364_v53 = vcombine.low %v891_v27, %v895_v33 }
 0x1f9   :  { %4127 = vmatpush2.bf16.msra.mxu1 %v8666_v54  ;;  %4087 = vmatprep.subr.bf16.mxu0 %v8531_v12  ;;  %v1226_v54 = vrot.slane %v10272_v40, %v10275_v45  ;;  %v8229_v12 = vcombine.high %v755_v46, %v759_v47 }
 0x1fa   :  { %4128 = vmatprep.subr.bf16.mxu1 %v8659_v35  ;;  %v747_v35 = vld [vmem:[#allocation4 + $0x150] sm:$0xff] }
 0x1fb   :  { %v8221_v26 = vcombine.high %v747_v35, %v751_v43 }
 0x1fc   :  { %4088 = vmatpush2.bf16.msra.mxu0 %v8530_v44  ;;  %v879_v44 = vld [vmem:[#allocation4 + $0x570] sm:$0xff] }
 0x1fd   :  { %4129 = vmatpush2.bf16.msra.mxu1 %v8658_v57  ;;  %4089 = vmatprep.subr.bf16.mxu0 %v8523_v59  ;;  %v8348_v15 = vcombine.low %v875_v41, %v879_v44 }
 0x1fe   :  { %4130 = vmatprep.subr.bf16.mxu1 %v8651_v60  ;;  %v8228_v60 = vcombine.low %v755_v46, %v759_v47 }
 0x200   :  { %4090 = vmatpush2.bf16.msra.mxu0 %v8522_v1 }
 0x201   :  { %4131 = vmatpush2.bf16.msra.mxu1 %v8650_v2  ;;  %4091 = vmatprep.subr.bf16.mxu0 %v8515_v3  ;;  %v8349_v3 = vcombine.high %v875_v41, %v879_v44  ;;  %v711_v41 = vld [vmem:[#allocation4 + $0x30] sm:$0xff] }
 0x202   :  { %4132 = vmatprep.subr.bf16.mxu1 %v8643_v4  ;;  %v739_v4 = vld [vmem:[#allocation4 + $0x110] sm:$0xff] }
 0x203   :  { %v8213_v16 = vcombine.high %v739_v4, %v743_v5  ;;  %v8212_v24 = vcombine.low %v739_v4, %v743_v5  ;;  %v835_v44 = vld [vmem:[#allocation4 + $0x410] sm:$0xff] }
 0x204   :  { %4092 = vmatpush2.bf16.msra.mxu0 %v8514_v9 }
 0x205   :  { %4133 = vmatpush2.bf16.msra.mxu1 %v8642_v11  ;;  %4093 = vmatprep.subr.bf16.mxu0 %v8507_v13  ;;  %v8220_v13 = vcombine.low %v747_v35, %v751_v43  ;;  %v8189_v43 = vcombine.high %v715_v50, %v719_v52 }
 0x206   :  { %4134 = vmatprep.subr.bf16.mxu1 %v8635_v14 }
 0x208   :  { %4094 = vmatpush2.bf16.msra.mxu0 %v8506_v19  ;;  %v731_v19 = vld [vmem:[#allocation4 + $0xd0] sm:$0xff] }
 0x209   :  { %4135 = vmatpush2.bf16.msra.mxu1 %v8634_v21  ;;  %4095 = vmatprep.subr.bf16.mxu0 %v8499_v22  ;;  %v735_v21 = vld [vmem:[#allocation4 + $0xf0] sm:$0xff] }
 0x20a   :  { %4136 = vmatprep.subr.bf16.mxu1 %v8627_v23  ;;  %v859_v22 = vld [vmem:[#allocation4 + $0x4d0] sm:$0xff]  ;;  %v8205_v27 = vcombine.high %v731_v19, %v735_v21  ;;  %v8204_v46 = vcombine.low %v731_v19, %v735_v21 }
 0x20b   :  { %v863_v23 = vld [vmem:[#allocation4 + $0x4f0] sm:$0xff] }
 0x20c   :  { %4096 = vmatpush2.bf16.msra.mxu0 %v8498_v34  ;;  %v8333_v33 = vcombine.high %v859_v22, %v863_v23  ;;  %v723_v34 = vld [vmem:[#allocation4 + $0x90] sm:$0xff]  ;;  %v8332_v47 = vcombine.low %v859_v22, %v863_v23 }
 0x20d   :  { %4137 = vmatpush2.bf16.msra.mxu1 %v8626_v38  ;;  %4147 = vmatprep.subr.bf16.mxu0 %v8237_v39  ;;  %v727_v38 = vld [vmem:[#allocation4 + $0xb0] sm:$0xff] }
 0x20e   :  { %4188 = vmatprep.subr.bf16.mxu1 %v8365_v42  ;;  %v851_v39 = vld [vmem:[#allocation4 + $0x490] sm:$0xff] }
 0x20f   :  { %4098 = vmatmul.mubr.bf16.vlgmr.msra.gmra.mxu0 %v10256_v62  ;;  %v3853_v56 = vpop.f32.mrf.mxu0  ;;  %v3894_v59 = vpop.f32.mrf.mxu1  ;;  %v855_v42 = vld [vmem:[#allocation4 + $0x4b0] sm:$0xff] }
 0x210   :  { %4139 = vmatmul.mubr.bf16.vlgmr.msra.gmra.mxu1 %v10254_v58  ;;  %v3854_v57 = vadd.f32 %v3853_v56, %v1222_v49  ;;  %4148 = vmatpush1.bf16.msra.mxu0 %v8236_v48  ;;  %v8197_v48 = vcombine.high %v723_v34, %v727_v38  ;;  %v8325_v49 = vcombine.high %v851_v39, %v855_v42  ;;  %v811_v19 = vld [vmem:[#allocation4 + $0x350] sm:$0xff] }
 0x211   :  { %4179 = vmatprep.mubr.bf16.mxu0 %v10226_v29  ;;  %4189 = vmatpush1.bf16.msra.mxu1 %v8364_v53  ;;  %v3855_v61 = vpop.f32.mrf.mxu0  ;;  %v3896_v2 = vpop.f32.mrf.mxu1  ;;  %v843_v53 = vld [vmem:[#allocation4 + $0x450] sm:$0xff]  ;;  %v8324_v35 = vcombine.low %v851_v39, %v855_v42 }
 0x212   :  { %v10284_v63 = vadd.f32 %v3894_v59, %v3854_v57  ;;  %4220 = vmatprep.mubr.bf16.mxu1 %v10230_v32  ;;  %v3856_v1 = vadd.f32 %v3855_v61, %v1226_v54  ;;  %4149 = vmatprep.subr.bf16.mxu0 %v8229_v12  ;;  %v847_v54 = vld [vmem:[#allocation4 + $0x470] sm:$0xff]  ;;  %v8196_v12 = vcombine.low %v723_v34, %v727_v38 }
 0x213   :  { %4190 = vmatprep.subr.bf16.mxu1 %v8357_v36  ;;  %v3857_v6 = vpop.f32.mrf.mxu0  ;;  %v3898_v11 = vpop.f32.mrf.mxu1  ;;  %v8317_v56 = vcombine.high %v843_v53, %v847_v54  ;;  %v707_v36 = vld [vmem:[#allocation4 + $0x10] sm:$0xff]  ;;  %v8188_v59 = vcombine.low %v715_v50, %v719_v52 }
 0x214   :  { %v10287_v9 = vadd.f32 %v3896_v2, %v3856_v1  ;;  %4150 = vmatpush1.bf16.msra.mxu0 %v8228_v60  ;;  %v839_v57 = vld [vmem:[#allocation4 + $0x430] sm:$0xff]  ;;  %v8316_v60 = vcombine.low %v843_v53, %v847_v54  ;;  %v8181_v61 = vcombine.high %v707_v36, %v711_v41  ;;  %v8180_v4 = vcombine.low %v707_v36, %v711_v41 }
 0x215   :  { %4191 = vmatpush1.bf16.msra.mxu1 %v8356_v30  ;;  %v3858_v14 = vpop.f32.mrf.mxu0  ;;  %4151 = vmatprep.subr.bf16.mxu0 %v8221_v26  ;;  %v3899_v17 = vpop.f32.mrf.mxu1  ;;  %v8309_v30 = vcombine.high %v835_v44, %v839_v57  ;;  %v827_v26 = vld [vmem:[#allocation4 + $0x3d0] sm:$0xff]  ;;  %v8308_v5 = vcombine.low %v835_v44, %v839_v57 }
 0x216   :  { %4192 = vmatprep.subr.bf16.mxu1 %v8349_v3  ;;  %v831_v1 = vld [vmem:[#allocation4 + $0x3f0] sm:$0xff] }
 0x217   :  { %v955_v2 = vld [vmem:[#allocation4 + $0x7d0] sm:$0xff]  ;;  %v8301_v6 = vcombine.high %v827_v26, %v831_v1 }
 0x218   :  { %4152 = vmatpush1.bf16.msra.mxu0 %v8220_v13  ;;  %v959_v3 = vld [vmem:[#allocation4 + $0x7f0] sm:$0xff] }
 0x219   :  { %4193 = vmatpush1.bf16.msra.mxu1 %v8348_v15  ;;  %4153 = vmatprep.subr.bf16.mxu0 %v8213_v16  ;;  %v8429_v7 = vcombine.high %v955_v2, %v959_v3  ;;  %v823_v11 = vld [vmem:[#allocation4 + $0x3b0] sm:$0xff]  ;;  %v8300_v15 = vcombine.low %v827_v26, %v831_v1  ;;  %v8428_v16 = vcombine.low %v955_v2, %v959_v3 }
 0x21a   :  { %4194 = vmatprep.subr.bf16.mxu1 %v8341_v18  ;;  %v947_v13 = vld [vmem:[#allocation4 + $0x790] sm:$0xff]  ;;  %v8293_v17 = vcombine.high %v819_v8, %v823_v11 }
 0x21b   :  { %v951_v14 = vld [vmem:[#allocation4 + $0x7b0] sm:$0xff] }
 0x21c   :  { %4154 = vmatpush1.bf16.msra.mxu0 %v8212_v24  ;;  %v8421_v18 = vcombine.high %v947_v13, %v951_v14  ;;  %v815_v21 = vld [vmem:[#allocation4 + $0x370] sm:$0xff]  ;;  %v8292_v24 = vcombine.low %v819_v8, %v823_v11 }
 0x21d   :  { %4195 = vmatpush1.bf16.msra.mxu1 %v8340_v25  ;;  %4155 = vmatprep.subr.bf16.mxu0 %v8205_v27  ;;  %v939_v22 = vld [vmem:[#allocation4 + $0x750] sm:$0xff]  ;;  %v8420_v25 = vcombine.low %v947_v13, %v951_v14  ;;  %v8285_v27 = vcombine.high %v811_v19, %v815_v21 }
 0x21e   :  { %4196 = vmatprep.subr.bf16.mxu1 %v8333_v33  ;;  %v943_v23 = vld [vmem:[#allocation4 + $0x770] sm:$0xff] }
 0x21f   :  { %v8413_v33 = vcombine.high %v939_v22, %v943_v23  ;;  %v803_v34 = vld [vmem:[#allocation4 + $0x310] sm:$0xff] }
 0x220   :  { %4156 = vmatpush1.bf16.msra.mxu0 %v8204_v46  ;;  %v807_v38 = vld [vmem:[#allocation4 + $0x330] sm:$0xff]  ;;  %v8284_v46 = vcombine.low %v811_v19, %v815_v21 }
 0x221   :  { %4197 = vmatpush1.bf16.msra.mxu1 %v8332_v47  ;;  %4157 = vmatprep.subr.bf16.mxu0 %v8197_v48  ;;  %v931_v39 = vld [vmem:[#allocation4 + $0x710] sm:$0xff]  ;;  %v8412_v47 = vcombine.low %v939_v22, %v943_v23  ;;  %v8277_v48 = vcombine.high %v803_v34, %v807_v38 }
 0x222   :  { %4198 = vmatprep.subr.bf16.mxu1 %v8325_v49  ;;  %v935_v42 = vld [vmem:[#allocation4 + $0x730] sm:$0xff] }
 0x223   :  { %v8405_v49 = vcombine.high %v931_v39, %v935_v42  ;;  %v795_v50 = vld [vmem:[#allocation4 + $0x2d0] sm:$0xff] }
 0x224   :  { %4158 = vmatpush1.bf16.msra.mxu0 %v8196_v12  ;;  %v799_v52 = vld [vmem:[#allocation4 + $0x2f0] sm:$0xff]  ;;  %v8276_v12 = vcombine.low %v803_v34, %v807_v38 }
 0x225   :  { %4199 = vmatpush1.bf16.msra.mxu1 %v8324_v35  ;;  %4159 = vmatprep.subr.bf16.mxu0 %v8189_v43  ;;  %v923_v53 = vld [vmem:[#allocation4 + $0x6d0] sm:$0xff]  ;;  %v8404_v35 = vcombine.low %v931_v39, %v935_v42  ;;  %v8269_v43 = vcombine.high %v795_v50, %v799_v52 }
 0x226   :  { %4200 = vmatprep.subr.bf16.mxu1 %v8317_v56  ;;  %v927_v54 = vld [vmem:[#allocation4 + $0x6f0] sm:$0xff] }
 0x227   :  { %v8397_v56 = vcombine.high %v923_v53, %v927_v54  ;;  %v787_v36 = vld [vmem:[#allocation4 + $0x290] sm:$0xff] }
 0x228   :  { %4160 = vmatpush1.bf16.msra.mxu0 %v8188_v59  ;;  %v791_v41 = vld [vmem:[#allocation4 + $0x2b0] sm:$0xff]  ;;  %v8268_v59 = vcombine.low %v795_v50, %v799_v52 }
 0x229   :  { %4201 = vmatpush1.bf16.msra.mxu1 %v8316_v60  ;;  %4161 = vmatprep.subr.bf16.mxu0 %v8181_v61  ;;  %v915_v44 = vld [vmem:[#allocation4 + $0x690] sm:$0xff]  ;;  %v8396_v60 = vcombine.low %v923_v53, %v927_v54  ;;  %v8261_v61 = vcombine.high %v787_v36, %v791_v41 }
 0x22a   :  { %4202 = vmatprep.subr.bf16.mxu1 %v8309_v30  ;;  %v919_v57 = vld [vmem:[#allocation4 + $0x6b0] sm:$0xff] }
 0x22b   :  { %v8389_v30 = vcombine.high %v915_v44, %v919_v57  ;;  %v779_v26 = vld [vmem:[#allocation4 + $0x250] sm:$0xff] }
 0x22c   :  { %4162 = vmatpush1.bf16.msra.mxu0 %v8180_v4  ;;  %v783_v1 = vld [vmem:[#allocation4 + $0x270] sm:$0xff]  ;;  %v8260_v4 = vcombine.low %v787_v36, %v791_v41 }
 0x22d   :  { %4203 = vmatpush1.bf16.msra.mxu1 %v8308_v5  ;;  %4163 = vmatprep.subr.bf16.mxu0 %v8301_v6  ;;  %v907_v2 = vld [vmem:[#allocation4 + $0x650] sm:$0xff]  ;;  %v8388_v5 = vcombine.low %v915_v44, %v919_v57  ;;  %v8253_v6 = vcombine.high %v779_v26, %v783_v1 }
 0x22e   :  { %4204 = vmatprep.subr.bf16.mxu1 %v8429_v7  ;;  %v911_v3 = vld [vmem:[#allocation4 + $0x670] sm:$0xff] }
 0x22f   :  { %v8381_v7 = vcombine.high %v907_v2, %v911_v3  ;;  %v771_v8 = vld [vmem:[#allocation4 + $0x210] sm:$0xff] }
 0x230   :  { %4164 = vmatpush2.bf16.msra.mxu0 %v8300_v15  ;;  %v775_v11 = vld [vmem:[#allocation4 + $0x230] sm:$0xff]  ;;  %v8252_v15 = vcombine.low %v779_v26, %v783_v1 }
 0x231   :  { %4205 = vmatpush2.bf16.msra.mxu1 %v8428_v16  ;;  %4165 = vmatprep.subr.bf16.mxu0 %v8293_v17  ;;  %v899_v13 = vld [vmem:[#allocation4 + $0x610] sm:$0xff]  ;;  %v8380_v16 = vcombine.low %v907_v2, %v911_v3  ;;  %v8245_v17 = vcombine.high %v771_v8, %v775_v11 }
 0x232   :  { %4206 = vmatprep.subr.bf16.mxu1 %v8421_v18  ;;  %v903_v14 = vld [vmem:[#allocation4 + $0x630] sm:$0xff] }
 0x233   :  { %v8373_v18 = vcombine.high %v899_v13, %v903_v14  ;;  %v1019_v19 = vld [vmem:[#allocation4 + $0x9d0] sm:$0xff] }
 0x234   :  { %4166 = vmatpush2.bf16.msra.mxu0 %v8292_v24  ;;  %v1023_v21 = vld [vmem:[#allocation4 + $0x9f0] sm:$0xff]  ;;  %v8244_v24 = vcombine.low %v771_v8, %v775_v11 }
 0x235   :  { %4207 = vmatpush2.bf16.msra.mxu1 %v8420_v25  ;;  %4167 = vmatprep.subr.bf16.mxu0 %v8285_v27  ;;  %v1147_v22 = vld [vmem:[#allocation4 + $0xdd0] sm:$0xff]  ;;  %v8372_v25 = vcombine.low %v899_v13, %v903_v14  ;;  %v8493_v27 = vcombine.high %v1019_v19, %v1023_v21  ;;  %v8492_v39 = vcombine.low %v1019_v19, %v1023_v21 }
 0x236   :  { %4208 = vmatprep.subr.bf16.mxu1 %v8413_v33  ;;  %v1151_v23 = vld [vmem:[#allocation4 + $0xdf0] sm:$0xff] }
 0x237   :  { %v8621_v33 = vcombine.high %v1147_v22, %v1151_v23  ;;  %v1011_v34 = vld [vmem:[#allocation4 + $0x990] sm:$0xff] }
 0x238   :  { %4168 = vmatpush2.bf16.msra.mxu0 %v8284_v46  ;;  %v1015_v38 = vld [vmem:[#allocation4 + $0x9b0] sm:$0xff] }
 0x239   :  { %4209 = vmatpush2.bf16.msra.mxu1 %v8412_v47  ;;  %4169 = vmatprep.subr.bf16.mxu0 %v8277_v48  ;;  %v1139_v42 = vld [vmem:[#allocation4 + $0xd90] sm:$0xff]  ;;  %v8620_v47 = vcombine.low %v1147_v22, %v1151_v23  ;;  %v8485_v48 = vcombine.high %v1011_v34, %v1015_v38 }
 0x23a   :  { %4210 = vmatprep.subr.bf16.mxu1 %v8405_v49  ;;  %v1143_v46 = vld [vmem:[#allocation4 + $0xdb0] sm:$0xff] }
 0x23b   :  { %v1003_v49 = vld [vmem:[#allocation4 + $0x950] sm:$0xff]  ;;  %v8613_v53 = vcombine.high %v1139_v42, %v1143_v46  ;;  %v8612_v41 = vcombine.low %v1139_v42, %v1143_v46 }
 0x23c   :  { %4170 = vmatpush2.bf16.msra.mxu0 %v8276_v12  ;;  %v1007_v50 = vld [vmem:[#allocation4 + $0x970] sm:$0xff] }
 0x23d   :  { %4211 = vmatpush2.bf16.msra.mxu1 %v8404_v35  ;;  %4171 = vmatprep.subr.bf16.mxu0 %v8269_v43  ;;  %v1131_v54 = vld [vmem:[#allocation4 + $0xd50] sm:$0xff]  ;;  %v8477_v44 = vcombine.high %v1003_v49, %v1007_v50 }
 0x23e   :  { %4212 = vmatprep.subr.bf16.mxu1 %v8397_v56  ;;  %v1135_v12 = vld [vmem:[#allocation4 + $0xd70] sm:$0xff]  ;;  %v8484_v56 = vcombine.low %v1011_v34, %v1015_v38 }
 0x23f   :  { %v1123_v1 = vld [vmem:[#allocation4 + $0xd10] sm:$0xff] }
 0x240   :  { %4172 = vmatpush2.bf16.msra.mxu0 %v8268_v59  ;;  %v1127_v2 = vld [vmem:[#allocation4 + $0xd30] sm:$0xff] }
 0x241   :  { %4213 = vmatpush2.bf16.msra.mxu1 %v8396_v60  ;;  %4173 = vmatprep.subr.bf16.mxu0 %v8261_v61  ;;  %v995_v61 = vld [vmem:[#allocation4 + $0x910] sm:$0xff]  ;;  %v8597_v11 = vcombine.high %v1123_v1, %v1127_v2 }
 0x242   :  { %4214 = vmatprep.subr.bf16.mxu1 %v8389_v30  ;;  %v999_v30 = vld [vmem:[#allocation4 + $0x930] sm:$0xff] }
 0x243   :  { %v8469_v8 = vcombine.high %v995_v61, %v999_v30  ;;  %v987_v13 = vld [vmem:[#allocation4 + $0x8d0] sm:$0xff] }
 0x244   :  { %4174 = vmatpush2.bf16.msra.mxu0 %v8260_v4  ;;  %v991_v14 = vld [vmem:[#allocation4 + $0x8f0] sm:$0xff] }
 0x245   :  { %4215 = vmatpush2.bf16.msra.mxu1 %v8388_v5  ;;  %4175 = vmatprep.subr.bf16.mxu0 %v8253_v6  ;;  %v8476_v5 = vcombine.low %v1003_v49, %v1007_v50  ;;  %v8461_v19 = vcombine.high %v987_v13, %v991_v14  ;;  %v979_v22 = vld [vmem:[#allocation4 + $0x890] sm:$0xff] }
 0x246   :  { %4216 = vmatprep.subr.bf16.mxu1 %v8381_v7  ;;  %v8604_v7 = vcombine.low %v1131_v54, %v1135_v12  ;;  %v983_v23 = vld [vmem:[#allocation4 + $0x8b0] sm:$0xff] }
 0x247   :  { %v8453_v34 = vcombine.high %v979_v22, %v983_v23  ;;  %v975_v42 = vld [vmem:[#allocation4 + $0x870] sm:$0xff] }
 0x248   :  { %4176 = vmatpush2.bf16.msra.mxu0 %v8252_v15  ;;  %v1115_v15 = vld [vmem:[#allocation4 + $0xcd0] sm:$0xff] }
 0x249   :  { %4217 = vmatpush2.bf16.msra.mxu1 %v8380_v16  ;;  %4177 = vmatprep.subr.bf16.mxu0 %v8245_v17  ;;  %v1119_v16 = vld [vmem:[#allocation4 + $0xcf0] sm:$0xff]  ;;  %v8468_v17 = vcombine.low %v995_v61, %v999_v30 }
 0x24a   :  { %4218 = vmatprep.subr.bf16.mxu1 %v8373_v18  ;;  %v8596_v18 = vcombine.low %v1123_v1, %v1127_v2  ;;  %v8589_v21 = vcombine.high %v1115_v15, %v1119_v16  ;;  %v1099_v46 = vld [vmem:[#allocation4 + $0xc50] sm:$0xff] }
 0x24b   :  { %v1075_v2 = vld [vmem:[#allocation4 + $0xb90] sm:$0xff] }
 0x24c   :  { %4178 = vmatpush2.bf16.msra.mxu0 %v8244_v24  ;;  %v1107_v24 = vld [vmem:[#allocation4 + $0xc90] sm:$0xff] }
 0x24d   :  { %4219 = vmatpush2.bf16.msra.mxu1 %v8372_v25  ;;  %4229 = vmatprep.subr.bf16.mxu0 %v8493_v27  ;;  %v1111_v25 = vld [vmem:[#allocation4 + $0xcb0] sm:$0xff]  ;;  %v8460_v27 = vcombine.low %v987_v13, %v991_v14 }
 0x24e   :  { %4270 = vmatprep.subr.bf16.mxu1 %v8621_v33  ;;  %v8588_v33 = vcombine.low %v1115_v15, %v1119_v16  ;;  %v8581_v38 = vcombine.high %v1107_v24, %v1111_v25  ;;  %v8580_v49 = vcombine.low %v1107_v24, %v1111_v25  ;;  %v1067_v13 = vld [vmem:[#allocation4 + $0xb50] sm:$0xff] }
 0x24f   :  { %v3935_v52 = vpop.f32.mrf.mxu0  ;;  %4180 = vmatmul.mubr.bf16.vlgmr.msra.gmra.mxu0 %v10228_v31  ;;  %v3976_v43 = vpop.f32.mrf.mxu1  ;;  %v1071_v14 = vld [vmem:[#allocation4 + $0xb70] sm:$0xff] }
 0x250   :  { %v3936_v35 = vadd.f32 %v3935_v52, %v10284_v63  ;;  %4221 = vmatmul.mubr.bf16.vlgmr.msra.gmra.mxu1 %v10224_v28  ;;  %4230 = vmatpush1.bf16.msra.mxu0 %v8492_v39  ;;  %v8605_v63 = vcombine.high %v1131_v54, %v1135_v12  ;;  %v971_v39 = vld [vmem:[#allocation4 + $0x850] sm:$0xff] }
 0x251   :  { %4261 = vmatprep.mubr.bf16.mxu0 %v10246_v51  ;;  %4271 = vmatpush1.bf16.msra.mxu1 %v8620_v47  ;;  %v3937_v36 = vpop.f32.mrf.mxu0  ;;  %v3978_v60 = vpop.f32.mrf.mxu1  ;;  %v1103_v47 = vld [vmem:[#allocation4 + $0xc70] sm:$0xff]  ;;  %v8445_v50 = vcombine.high %v971_v39, %v975_v42 }
 0x252   :  { %v10293_v57 = vadd.f32 %v3976_v43, %v3936_v35  ;;  %4302 = vmatprep.mubr.bf16.mxu1 %v10248_v55  ;;  %v3938_v59 = vadd.f32 %v3937_v36, %v10287_v9  ;;  %4231 = vmatprep.subr.bf16.mxu0 %v8485_v48  ;;  %v8452_v48 = vcombine.low %v979_v22, %v983_v23  ;;  %v967_v54 = vld [vmem:[#allocation4 + $0x830] sm:$0xff] }
 0x253   :  { %v3939_v26 = vpop.f32.mrf.mxu0  ;;  %4272 = vmatprep.subr.bf16.mxu1 %v8613_v53  ;;  %v3980_v4 = vpop.f32.mrf.mxu1  ;;  %v8573_v52 = vcombine.high %v1099_v46, %v1103_v47  ;;  %v963_v53 = vld [vmem:[#allocation4 + $0x810] sm:$0xff]  ;;  %v8444_v43 = vcombine.low %v971_v39, %v975_v42 }
 0x254   :  { %v10297_v3 = vadd.f32 %v3978_v60, %v3938_v59  ;;  %4232 = vmatpush1.bf16.msra.mxu0 %v8484_v56  ;;  %v1091_v12 = vld [vmem:[#allocation4 + $0xc10] sm:$0xff]  ;;  %v8572_v56 = vcombine.low %v1099_v46, %v1103_v47  ;;  %v8437_v36 = vcombine.high %v963_v53, %v967_v54  ;;  %v8436_v61 = vcombine.low %v963_v53, %v967_v54 }
 0x255   :  { %4273 = vmatpush1.bf16.msra.mxu1 %v8612_v41  ;;  %v3940_v6 = vpop.f32.mrf.mxu0  ;;  %4233 = vmatprep.subr.bf16.mxu0 %v8477_v44  ;;  %v3981_v9 = vpop.f32.mrf.mxu1  ;;  %v1095_v35 = vld [vmem:[#allocation4 + $0xc30] sm:$0xff] }
 0x256   :  { %4274 = vmatprep.subr.bf16.mxu1 %v8605_v63  ;;  %v8565_v41 = vcombine.high %v1091_v12, %v1095_v35  ;;  %v1083_v44 = vld [vmem:[#allocation4 + $0xbd0] sm:$0xff]  ;;  %v8564_v30 = vcombine.low %v1091_v12, %v1095_v35 }
 0x257   :  { %v1087_v59 = vld [vmem:[#allocation4 + $0xbf0] sm:$0xff] }
 0x258   :  { %4234 = vmatpush1.bf16.msra.mxu0 %v8476_v5  ;;  %v1211_v60 = vld [vmem:[#allocation4 + $0xfd0] sm:$0xff]  ;;  %v8557_v26 = vcombine.high %v1083_v44, %v1087_v59 }
 0x259   :  { %4275 = vmatpush1.bf16.msra.mxu1 %v8604_v7  ;;  %4235 = vmatprep.subr.bf16.mxu0 %v8469_v8  ;;  %v1215_v63 = vld [vmem:[#allocation4 + $0xff0] sm:$0xff]  ;;  %v8556_v7 = vcombine.low %v1083_v44, %v1087_v59 }
 0x25a   :  { %4276 = vmatprep.subr.bf16.mxu1 %v8597_v11  ;;  %v8685_v1 = vcombine.high %v1211_v60, %v1215_v63  ;;  %v1079_v4 = vld [vmem:[#allocation4 + $0xbb0] sm:$0xff]  ;;  %v8684_v8 = vcombine.low %v1211_v60, %v1215_v63 }
 0x25b   :  { %v1203_v5 = vld [vmem:[#allocation4 + $0xf90] sm:$0xff]  ;;  %v8549_v9 = vcombine.high %v1075_v2, %v1079_v4 }
 0x25c   :  { %4236 = vmatpush1.bf16.msra.mxu0 %v8468_v17  ;;  %v1207_v6 = vld [vmem:[#allocation4 + $0xfb0] sm:$0xff]  ;;  %v8548_v17 = vcombine.low %v1075_v2, %v1079_v4 }
 0x25d   :  { %4277 = vmatpush1.bf16.msra.mxu1 %v8596_v18  ;;  %4237 = vmatprep.subr.bf16.mxu0 %v8461_v19  ;;  %v8677_v11 = vcombine.high %v1203_v5, %v1207_v6  ;;  %v1195_v15 = vld [vmem:[#allocation4 + $0xf50] sm:$0xff]  ;;  %v8676_v18 = vcombine.low %v1203_v5, %v1207_v6  ;;  %v8541_v19 = vcombine.high %v1067_v13, %v1071_v14 }
 0x25e   :  { %4278 = vmatprep.subr.bf16.mxu1 %v8589_v21  ;;  %v1199_v16 = vld [vmem:[#allocation4 + $0xf70] sm:$0xff] }
 0x25f   :  { %v8669_v21 = vcombine.high %v1195_v15, %v1199_v16  ;;  %v1059_v22 = vld [vmem:[#allocation4 + $0xb10] sm:$0xff] }
 0x260   :  { %4238 = vmatpush1.bf16.msra.mxu0 %v8460_v27  ;;  %v1063_v23 = vld [vmem:[#allocation4 + $0xb30] sm:$0xff]  ;;  %v8540_v27 = vcombine.low %v1067_v13, %v1071_v14  ;;  %v764_v13 = vld [vmem:[#allocation4 + $0x1d8] sm:$0xff] }
 0x261   :  { %4279 = vmatpush1.bf16.msra.mxu1 %v8588_v33  ;;  %4239 = vmatprep.subr.bf16.mxu0 %v8453_v34  ;;  %v1187_v24 = vld [vmem:[#allocation4 + $0xf10] sm:$0xff]  ;;  %v8668_v33 = vcombine.low %v1195_v15, %v1199_v16  ;;  %v8533_v34 = vcombine.high %v1059_v22, %v1063_v23  ;;  %v768_v14 = vld [vmem:[#allocation4 + $0x1f8] sm:$0xff] }
 0x262   :  { %4280 = vmatprep.subr.bf16.mxu1 %v8581_v38  ;;  %v1191_v25 = vld [vmem:[#allocation4 + $0xf30] sm:$0xff]  ;;  %v892_v15 = vld [vmem:[#allocation4 + $0x5d8] sm:$0xff] }
 0x263   :  { %v8661_v38 = vcombine.high %v1187_v24, %v1191_v25  ;;  %v1051_v39 = vld [vmem:[#allocation4 + $0xad0] sm:$0xff]  ;;  %v896_v16 = vld [vmem:[#allocation4 + $0x5f8] sm:$0xff] }
 0x264   :  { %4240 = vmatpush1.bf16.msra.mxu0 %v8452_v48  ;;  %v1055_v42 = vld [vmem:[#allocation4 + $0xaf0] sm:$0xff]  ;;  %v8532_v48 = vcombine.low %v1059_v22, %v1063_v23  ;;  %v8367_v22 = vcombine.high %v892_v15, %v896_v16  ;;  %v1233_v23 = vsub.s32 3, %v10267_v20 }
 0x265   :  { %4281 = vmatpush1.bf16.msra.mxu1 %v8580_v49  ;;  %4241 = vmatprep.subr.bf16.mxu0 %v8445_v50  ;;  %v1179_v46 = vld [vmem:[#allocation4 + $0xed0] sm:$0xff]  ;;  %v8660_v49 = vcombine.low %v1187_v24, %v1191_v25  ;;  %v8525_v50 = vcombine.high %v1051_v39, %v1055_v42  ;;  %v756_v24 = vld [vmem:[#allocation4 + $0x198] sm:$0xff] }
 0x266   :  { %4282 = vmatprep.subr.bf16.mxu1 %v8573_v52  ;;  %v1183_v47 = vld [vmem:[#allocation4 + $0xef0] sm:$0xff]  ;;  %v760_v25 = vld [vmem:[#allocation4 + $0x1b8] sm:$0xff] }
 0x267   :  { %v8653_v52 = vcombine.high %v1179_v46, %v1183_v47  ;;  %v1043_v53 = vld [vmem:[#allocation4 + $0xa90] sm:$0xff] }
 0x268   :  { %4242 = vmatpush1.bf16.msra.mxu0 %v8444_v43  ;;  %v1047_v54 = vld [vmem:[#allocation4 + $0xab0] sm:$0xff]  ;;  %v8524_v43 = vcombine.low %v1051_v39, %v1055_v42  ;;  %v8366_v39 = vcombine.low %v892_v15, %v896_v16  ;;  %v1234_v42 = vrot.slane %v10272_v40, %v1233_v23 }
 0x269   :  { %4283 = vmatpush1.bf16.msra.mxu1 %v8572_v56  ;;  %4243 = vmatprep.subr.bf16.mxu0 %v8437_v36  ;;  %v1171_v12 = vld [vmem:[#allocation4 + $0xe90] sm:$0xff]  ;;  %v8652_v56 = vcombine.low %v1179_v46, %v1183_v47  ;;  %v8517_v36 = vcombine.high %v1043_v53, %v1047_v54  ;;  %v8231_v46 = vcombine.high %v756_v24, %v760_v25  ;;  %v748_v47 = vld [vmem:[#allocation4 + $0x158] sm:$0xff] }
 0x26a   :  { %4284 = vmatprep.subr.bf16.mxu1 %v8565_v41  ;;  %v1175_v35 = vld [vmem:[#allocation4 + $0xeb0] sm:$0xff] }
 0x26b   :  { %v8645_v41 = vcombine.high %v1171_v12, %v1175_v35  ;;  %v1035_v44 = vld [vmem:[#allocation4 + $0xa50] sm:$0xff] }
 0x26c   :  { %4244 = vmatpush1.bf16.msra.mxu0 %v8436_v61  ;;  %v1039_v59 = vld [vmem:[#allocation4 + $0xa70] sm:$0xff]  ;;  %v8516_v61 = vcombine.low %v1043_v53, %v1047_v54  ;;  %v880_v53 = vld [vmem:[#allocation4 + $0x578] sm:$0xff] }
 0x26d   :  { %4285 = vmatpush1.bf16.msra.mxu1 %v8564_v30  ;;  %4245 = vmatprep.subr.bf16.mxu0 %v8557_v26  ;;  %v1163_v60 = vld [vmem:[#allocation4 + $0xe50] sm:$0xff]  ;;  %v8644_v30 = vcombine.low %v1171_v12, %v1175_v35  ;;  %v8509_v26 = vcombine.high %v1035_v44, %v1039_v59  ;;  %v8230_v35 = vcombine.low %v756_v24, %v760_v25  ;;  %v856_v24 = vld [vmem:[#allocation4 + $0x4b8] sm:$0xff] }
 0x26e   :  { %4286 = vmatprep.subr.bf16.mxu1 %v8685_v1  ;;  %v1167_v63 = vld [vmem:[#allocation4 + $0xe70] sm:$0xff] }
 0x26f   :  { %v8637_v1 = vcombine.high %v1163_v60, %v1167_v63  ;;  %v1027_v2 = vld [vmem:[#allocation4 + $0xa10] sm:$0xff] }
 0x270   :  { %4246 = vmatpush2.bf16.msra.mxu0 %v8556_v7  ;;  %v1031_v4 = vld [vmem:[#allocation4 + $0xa30] sm:$0xff]  ;;  %v8508_v7 = vcombine.low %v1035_v44, %v1039_v59 }
 0x271   :  { %4287 = vmatpush2.bf16.msra.mxu1 %v8684_v8  ;;  %4247 = vmatprep.subr.bf16.mxu0 %v8549_v9  ;;  %v1155_v5 = vld [vmem:[#allocation4 + $0xe10] sm:$0xff]  ;;  %v8636_v8 = vcombine.low %v1163_v60, %v1167_v63  ;;  %v8501_v9 = vcombine.high %v1027_v2, %v1031_v4  ;;  %v740_v60 = vld [vmem:[#allocation4 + $0x118] sm:$0xff] }
 0x272   :  { %4288 = vmatprep.subr.bf16.mxu1 %v8677_v11  ;;  %v1159_v6 = vld [vmem:[#allocation4 + $0xe30] sm:$0xff]  ;;  %v744_v63 = vld [vmem:[#allocation4 + $0x138] sm:$0xff] }
 0x273   :  { %v8629_v11 = vcombine.high %v1155_v5, %v1159_v6 }
 0x274   :  { %4248 = vmatpush2.bf16.msra.mxu0 %v8548_v17  ;;  %v8500_v17 = vcombine.low %v1027_v2, %v1031_v4 }
 0x275   :  { %4289 = vmatpush2.bf16.msra.mxu1 %v8676_v18  ;;  %4249 = vmatprep.subr.bf16.mxu0 %v8541_v19  ;;  %v1229_v18 = vsub.s32 2, %v10267_v20  ;;  %v8628_v19 = vcombine.low %v1155_v5, %v1159_v6 }
 0x276   :  { %4290 = vmatprep.subr.bf16.mxu1 %v8669_v21  ;;  %v8239_v21 = vcombine.high %v764_v13, %v768_v14 }
 0x278   :  { %4250 = vmatpush2.bf16.msra.mxu0 %v8540_v27  ;;  %v1230_v27 = vrot.slane %v10272_v40, %v1229_v18 }
 0x279   :  { %4291 = vmatpush2.bf16.msra.mxu1 %v8668_v33  ;;  %4251 = vmatprep.subr.bf16.mxu0 %v8533_v34  ;;  %v8238_v33 = vcombine.low %v764_v13, %v768_v14  ;;  %v884_v34 = vld [vmem:[#allocation4 + $0x598] sm:$0xff]  ;;  %v8214_v14 = vcombine.low %v740_v60, %v744_v63 }
 0x27a   :  { %4292 = vmatprep.subr.bf16.mxu1 %v8661_v38  ;;  %v888_v38 = vld [vmem:[#allocation4 + $0x5b8] sm:$0xff] }
 0x27b   :  { %v8358_v40 = vcombine.low %v884_v34, %v888_v38  ;;  %v864_v13 = vld [vmem:[#allocation4 + $0x4f8] sm:$0xff] }
 0x27c   :  { %4252 = vmatpush2.bf16.msra.mxu0 %v8532_v48  ;;  %v752_v48 = vld [vmem:[#allocation4 + $0x178] sm:$0xff] }
 0x27d   :  { %4293 = vmatpush2.bf16.msra.mxu1 %v8660_v49  ;;  %4253 = vmatprep.subr.bf16.mxu0 %v8525_v50  ;;  %v8359_v50 = vcombine.high %v884_v34, %v888_v38  ;;  %v8222_v2 = vcombine.low %v748_v47, %v752_v48  ;;  %v716_v38 = vld [vmem:[#allocation4 + $0x58] sm:$0xff] }
 0x27e   :  { %4294 = vmatprep.subr.bf16.mxu1 %v8653_v52  ;;  %v876_v52 = vld [vmem:[#allocation4 + $0x558] sm:$0xff] }
 0x27f   :  { %v8351_v59 = vcombine.high %v876_v52, %v880_v53  ;;  %v8350_v5 = vcombine.low %v876_v52, %v880_v53  ;;  %v708_v52 = vld [vmem:[#allocation4 + $0x18] sm:$0xff] }
 0x280   :  { %4254 = vmatpush2.bf16.msra.mxu0 %v8524_v43  ;;  %v712_v53 = vld [vmem:[#allocation4 + $0x38] sm:$0xff] }
 0x281   :  { %4295 = vmatpush2.bf16.msra.mxu1 %v8652_v56  ;;  %4255 = vmatprep.subr.bf16.mxu0 %v8517_v36  ;;  %v8223_v56 = vcombine.high %v748_v47, %v752_v48 }
 0x282   :  { %4296 = vmatprep.subr.bf16.mxu1 %v8645_v41 }
 0x284   :  { %4256 = vmatpush2.bf16.msra.mxu0 %v8516_v61 }
 0x285   :  { %4297 = vmatpush2.bf16.msra.mxu1 %v8644_v30  ;;  %4257 = vmatprep.subr.bf16.mxu0 %v8509_v26  ;;  %v868_v30 = vld [vmem:[#allocation4 + $0x518] sm:$0xff] }
 0x286   :  { %4298 = vmatprep.subr.bf16.mxu1 %v8637_v1  ;;  %v872_v26 = vld [vmem:[#allocation4 + $0x538] sm:$0xff] }
 0x287   :  { %v8342_v15 = vcombine.low %v868_v30, %v872_v26 }
 0x288   :  { %4258 = vmatpush2.bf16.msra.mxu0 %v8508_v7  ;;  %v8343_v7 = vcombine.high %v868_v30, %v872_v26 }
 0x289   :  { %4299 = vmatpush2.bf16.msra.mxu1 %v8636_v8  ;;  %4259 = vmatprep.subr.bf16.mxu0 %v8501_v9  ;;  %v732_v8 = vld [vmem:[#allocation4 + $0xd8] sm:$0xff] }
 0x28a   :  { %4300 = vmatprep.subr.bf16.mxu1 %v8629_v11  ;;  %v736_v9 = vld [vmem:[#allocation4 + $0xf8] sm:$0xff] }
 0x28b   :  { %v860_v11 = vld [vmem:[#allocation4 + $0x4d8] sm:$0xff]  ;;  %v8207_v16 = vcombine.high %v732_v8, %v736_v9  ;;  %v8206_v25 = vcombine.low %v732_v8, %v736_v9 }
 0x28c   :  { %4260 = vmatpush2.bf16.msra.mxu0 %v8500_v17  ;;  %v8335_v17 = vcombine.high %v860_v11, %v864_v13  ;;  %v812_v9 = vld [vmem:[#allocation4 + $0x358] sm:$0xff] }
 0x28d   :  { %4301 = vmatpush2.bf16.msra.mxu1 %v8628_v19  ;;  %4311 = vmatprep.subr.bf16.mxu0 %v8239_v21  ;;  %v724_v19 = vld [vmem:[#allocation4 + $0x98] sm:$0xff] }
 0x28e   :  { %4352 = vmatprep.subr.bf16.mxu1 %v8367_v22  ;;  %v728_v21 = vld [vmem:[#allocation4 + $0xb8] sm:$0xff] }
 0x28f   :  { %v4017_v49 = vpop.f32.mrf.mxu0  ;;  %4262 = vmatmul.mubr.bf16.vlgmr.msra.gmra.mxu0 %v10256_v62  ;;  %v852_v22 = vld [vmem:[#allocation4 + $0x498] sm:$0xff]  ;;  %v8198_v47 = vcombine.low %v724_v19, %v728_v21 }
 0x290   :  { %v4018_v54 = vadd.f32 %v4017_v49, %v1230_v27  ;;  %v4058_v12 = vpop.f32.mrf.mxu1  ;;  %4303 = vmatmul.mubr.bf16.vlgmr.msra.gmra.mxu1 %v10254_v58  ;;  %4312 = vmatpush1.bf16.msra.mxu0 %v8238_v33  ;;  %v8334_v27 = vcombine.low %v860_v11, %v864_v13  ;;  %v8199_v33 = vcombine.high %v724_v19, %v728_v21  ;;  %v816_v11 = vld [vmem:[#allocation4 + $0x378] sm:$0xff] }
 0x291   :  { %4343 = vmatprep.mubr.bf16.mxu0 %v10226_v29  ;;  %4353 = vmatpush1.bf16.msra.mxu1 %v8366_v39  ;;  %v4019_v43 = vpop.f32.mrf.mxu0  ;;  %v8327_v34 = vcombine.high %v852_v22, %v856_v24  ;;  %v720_v39 = vld [vmem:[#allocation4 + $0x78] sm:$0xff]  ;;  %v8326_v48 = vcombine.low %v852_v22, %v856_v24 }
 0x292   :  { %v10310_v36 = vadd.f32 %v4058_v12, %v4018_v54  ;;  %4384 = vmatprep.mubr.bf16.mxu1 %v10230_v32  ;;  %v4020_v41 = vadd.f32 %v4019_v43, %v1234_v42  ;;  %v4060_v44 = vpop.f32.mrf.mxu1  ;;  %4313 = vmatprep.subr.bf16.mxu0 %v8231_v46  ;;  %v8215_v32 = vcombine.high %v740_v60, %v744_v63  ;;  %v844_v42 = vld [vmem:[#allocation4 + $0x458] sm:$0xff] }
 0x293   :  { %v4021_v61 = vpop.f32.mrf.mxu0  ;;  %4354 = vmatprep.subr.bf16.mxu1 %v8359_v50  ;;  %v848_v46 = vld [vmem:[#allocation4 + $0x478] sm:$0xff]  ;;  %v8191_v49 = vcombine.high %v716_v38, %v720_v39  ;;  %v8182_v63 = vcombine.low %v708_v52, %v712_v53 }
 0x294   :  { %v10313_v1 = vadd.f32 %v4060_v44, %v4020_v41  ;;  %v4062_v29 = vpop.f32.mrf.mxu1  ;;  %4314 = vmatpush1.bf16.msra.mxu0 %v8230_v35  ;;  %v8319_v50 = vcombine.high %v844_v42, %v848_v46  ;;  %v836_v54 = vld [vmem:[#allocation4 + $0x418] sm:$0xff]  ;;  %v8190_v35 = vcombine.low %v716_v38, %v720_v39  ;;  %v8318_v43 = vcombine.low %v844_v42, %v848_v46 }
 0x295   :  { %4355 = vmatpush1.bf16.msra.mxu1 %v8358_v40  ;;  %v4022_v4 = vpop.f32.mrf.mxu0  ;;  %4315 = vmatprep.subr.bf16.mxu0 %v8223_v56  ;;  %v840_v12 = vld [vmem:[#allocation4 + $0x438] sm:$0xff]  ;;  %v8183_v40 = vcombine.high %v708_v52, %v712_v53 }
 0x296   :  { %v4063_v6 = vpop.f32.mrf.mxu1  ;;  %4356 = vmatprep.subr.bf16.mxu1 %v8351_v59  ;;  %v8311_v56 = vcombine.high %v836_v54, %v840_v12  ;;  %v828_v41 = vld [vmem:[#allocation4 + $0x3d8] sm:$0xff]  ;;  %v8310_v61 = vcombine.low %v836_v54, %v840_v12 }
 0x297   :  { %v832_v44 = vld [vmem:[#allocation4 + $0x3f8] sm:$0xff] }
 0x298   :  { %4316 = vmatpush1.bf16.msra.mxu0 %v8222_v2  ;;  %v956_v59 = vld [vmem:[#allocation4 + $0x7d8] sm:$0xff]  ;;  %v8303_v30 = vcombine.high %v828_v41, %v832_v44 }
 0x299   :  { %4357 = vmatpush1.bf16.msra.mxu1 %v8350_v5  ;;  %4317 = vmatprep.subr.bf16.mxu0 %v8215_v32  ;;  %v960_v60 = vld [vmem:[#allocation4 + $0x7f8] sm:$0xff]  ;;  %v8302_v32 = vcombine.low %v828_v41, %v832_v44 }
 0x29a   :  { %4358 = vmatprep.subr.bf16.mxu1 %v8343_v7  ;;  %v8431_v26 = vcombine.high %v956_v59, %v960_v60  ;;  %v820_v29 = vld [vmem:[#allocation4 + $0x398] sm:$0xff]  ;;  %v8430_v6 = vcombine.low %v956_v59, %v960_v60 }
 0x29b   :  { %v824_v2 = vld [vmem:[#allocation4 + $0x3b8] sm:$0xff] }
 0x29c   :  { %4318 = vmatpush1.bf16.msra.mxu0 %v8214_v14  ;;  %v948_v4 = vld [vmem:[#allocation4 + $0x798] sm:$0xff]  ;;  %v8295_v7 = vcombine.high %v820_v29, %v824_v2 }
 0x29d   :  { %4359 = vmatpush1.bf16.msra.mxu1 %v8342_v15  ;;  %4319 = vmatprep.subr.bf16.mxu0 %v8207_v16  ;;  %v952_v5 = vld [vmem:[#allocation4 + $0x7b8] sm:$0xff]  ;;  %v8294_v15 = vcombine.low %v820_v29, %v824_v2 }
 0x29e   :  { %4360 = vmatprep.subr.bf16.mxu1 %v8335_v17  ;;  %v8423_v8 = vcombine.high %v948_v4, %v952_v5  ;;  %v940_v13 = vld [vmem:[#allocation4 + $0x758] sm:$0xff]  ;;  %v8422_v16 = vcombine.low %v948_v4, %v952_v5  ;;  %v8287_v17 = vcombine.high %v812_v9, %v816_v11 }
 0x29f   :  { %v944_v14 = vld [vmem:[#allocation4 + $0x778] sm:$0xff] }
 0x2a0   :  { %4320 = vmatpush1.bf16.msra.mxu0 %v8206_v25  ;;  %v8415_v19 = vcombine.high %v940_v13, %v944_v14  ;;  %v804_v21 = vld [vmem:[#allocation4 + $0x318] sm:$0xff] }
 0x2a1   :  { %4361 = vmatpush1.bf16.msra.mxu1 %v8334_v27  ;;  %4321 = vmatprep.subr.bf16.mxu0 %v8199_v33  ;;  %v808_v22 = vld [vmem:[#allocation4 + $0x338] sm:$0xff]  ;;  %v8286_v27 = vcombine.low %v812_v9, %v816_v11  ;;  %v8414_v33 = vcombine.low %v940_v13, %v944_v14 }
 0x2a2   :  { %4362 = vmatprep.subr.bf16.mxu1 %v8327_v34  ;;  %v932_v24 = vld [vmem:[#allocation4 + $0x718] sm:$0xff]  ;;  %v8279_v34 = vcombine.high %v804_v21, %v808_v22 }
 0x2a3   :  { %v936_v25 = vld [vmem:[#allocation4 + $0x738] sm:$0xff] }
 0x2a4   :  { %4322 = vmatpush1.bf16.msra.mxu0 %v8198_v47  ;;  %v8407_v38 = vcombine.high %v932_v24, %v936_v25  ;;  %v796_v39 = vld [vmem:[#allocation4 + $0x2d8] sm:$0xff] }
 0x2a5   :  { %4363 = vmatpush1.bf16.msra.mxu1 %v8326_v48  ;;  %4323 = vmatprep.subr.bf16.mxu0 %v8191_v49  ;;  %v800_v42 = vld [vmem:[#allocation4 + $0x2f8] sm:$0xff]  ;;  %v8278_v48 = vcombine.low %v804_v21, %v808_v22  ;;  %v8406_v49 = vcombine.low %v932_v24, %v936_v25 }
 0x2a6   :  { %4364 = vmatprep.subr.bf16.mxu1 %v8319_v50  ;;  %v924_v46 = vld [vmem:[#allocation4 + $0x6d8] sm:$0xff]  ;;  %v8271_v50 = vcombine.high %v796_v39, %v800_v42 }
 0x2a7   :  { %v928_v47 = vld [vmem:[#allocation4 + $0x6f8] sm:$0xff] }
 0x2a8   :  { %4324 = vmatpush1.bf16.msra.mxu0 %v8190_v35  ;;  %v8399_v52 = vcombine.high %v924_v46, %v928_v47  ;;  %v788_v53 = vld [vmem:[#allocation4 + $0x298] sm:$0xff] }
 0x2a9   :  { %4365 = vmatpush1.bf16.msra.mxu1 %v8318_v43  ;;  %4325 = vmatprep.subr.bf16.mxu0 %v8183_v40  ;;  %v792_v54 = vld [vmem:[#allocation4 + $0x2b8] sm:$0xff]  ;;  %v8270_v43 = vcombine.low %v796_v39, %v800_v42  ;;  %v8398_v40 = vcombine.low %v924_v46, %v928_v47 }
 0x2aa   :  { %4366 = vmatprep.subr.bf16.mxu1 %v8311_v56  ;;  %v916_v12 = vld [vmem:[#allocation4 + $0x698] sm:$0xff]  ;;  %v8263_v56 = vcombine.high %v788_v53, %v792_v54 }
 0x2ab   :  { %v920_v35 = vld [vmem:[#allocation4 + $0x6b8] sm:$0xff] }
 0x2ac   :  { %4326 = vmatpush1.bf16.msra.mxu0 %v8182_v63  ;;  %v8391_v41 = vcombine.high %v916_v12, %v920_v35  ;;  %v780_v44 = vld [vmem:[#allocation4 + $0x258] sm:$0xff] }
 0x2ad   :  { %4367 = vmatpush1.bf16.msra.mxu1 %v8310_v61  ;;  %4327 = vmatprep.subr.bf16.mxu0 %v8303_v30  ;;  %v784_v59 = vld [vmem:[#allocation4 + $0x278] sm:$0xff]  ;;  %v8262_v61 = vcombine.low %v788_v53, %v792_v54  ;;  %v8390_v30 = vcombine.low %v916_v12, %v920_v35 }
 0x2ae   :  { %4368 = vmatprep.subr.bf16.mxu1 %v8431_v26  ;;  %v908_v60 = vld [vmem:[#allocation4 + $0x658] sm:$0xff]  ;;  %v8255_v26 = vcombine.high %v780_v44, %v784_v59 }
 0x2af   :  { %v912_v63 = vld [vmem:[#allocation4 + $0x678] sm:$0xff] }
 0x2b0   :  { %4328 = vmatpush2.bf16.msra.mxu0 %v8302_v32  ;;  %v8383_v29 = vcombine.high %v908_v60, %v912_v63  ;;  %v772_v2 = vld [vmem:[#allocation4 + $0x218] sm:$0xff] }
 0x2b1   :  { %4369 = vmatpush2.bf16.msra.mxu1 %v8430_v6  ;;  %4329 = vmatprep.subr.bf16.mxu0 %v8295_v7  ;;  %v776_v4 = vld [vmem:[#allocation4 + $0x238] sm:$0xff]  ;;  %v8254_v6 = vcombine.low %v780_v44, %v784_v59  ;;  %v8382_v7 = vcombine.low %v908_v60, %v912_v63 }
 0x2b2   :  { %4370 = vmatprep.subr.bf16.mxu1 %v8423_v8  ;;  %v900_v5 = vld [vmem:[#allocation4 + $0x618] sm:$0xff]  ;;  %v8247_v8 = vcombine.high %v772_v2, %v776_v4 }
 0x2b3   :  { %v904_v32 = vld [vmem:[#allocation4 + $0x638] sm:$0xff] }
 0x2b4   :  { %4330 = vmatpush2.bf16.msra.mxu0 %v8294_v15  ;;  %v8375_v9 = vcombine.high %v900_v5, %v904_v32  ;;  %v1020_v11 = vld [vmem:[#allocation4 + $0x9d8] sm:$0xff] }
 0x2b5   :  { %4371 = vmatpush2.bf16.msra.mxu1 %v8422_v16  ;;  %4331 = vmatprep.subr.bf16.mxu0 %v8287_v17  ;;  %v1024_v13 = vld [vmem:[#allocation4 + $0x9f8] sm:$0xff]  ;;  %v8246_v16 = vcombine.low %v772_v2, %v776_v4  ;;  %v8374_v17 = vcombine.low %v900_v5, %v904_v32 }
 0x2b6   :  { %4372 = vmatprep.subr.bf16.mxu1 %v8415_v19  ;;  %v1148_v14 = vld [vmem:[#allocation4 + $0xdd8] sm:$0xff]  ;;  %v8495_v19 = vcombine.high %v1020_v11, %v1024_v13  ;;  %v8494_v25 = vcombine.low %v1020_v11, %v1024_v13 }
 0x2b7   :  { %v1152_v15 = vld [vmem:[#allocation4 + $0xdf8] sm:$0xff] }
 0x2b8   :  { %4332 = vmatpush2.bf16.msra.mxu0 %v8286_v27  ;;  %v8623_v21 = vcombine.high %v1148_v14, %v1152_v15  ;;  %v1012_v22 = vld [vmem:[#allocation4 + $0x998] sm:$0xff] }
 0x2b9   :  { %4373 = vmatpush2.bf16.msra.mxu1 %v8414_v33  ;;  %4333 = vmatprep.subr.bf16.mxu0 %v8279_v34  ;;  %v1016_v24 = vld [vmem:[#allocation4 + $0x9b8] sm:$0xff]  ;;  %v8622_v34 = vcombine.low %v1148_v14, %v1152_v15 }
 0x2ba   :  { %4374 = vmatprep.subr.bf16.mxu1 %v8407_v38  ;;  %v1140_v27 = vld [vmem:[#allocation4 + $0xd98] sm:$0xff]  ;;  %v8487_v38 = vcombine.high %v1012_v22, %v1016_v24  ;;  %v8486_v53 = vcombine.low %v1012_v22, %v1016_v24 }
 0x2bb   :  { %v1144_v33 = vld [vmem:[#allocation4 + $0xdb8] sm:$0xff] }
 0x2bc   :  { %4334 = vmatpush2.bf16.msra.mxu0 %v8278_v48  ;;  %v1004_v39 = vld [vmem:[#allocation4 + $0x958] sm:$0xff]  ;;  %v8615_v47 = vcombine.high %v1140_v27, %v1144_v33  ;;  %v8614_v12 = vcombine.low %v1140_v27, %v1144_v33 }
 0x2bd   :  { %4375 = vmatpush2.bf16.msra.mxu1 %v8406_v49  ;;  %4335 = vmatprep.subr.bf16.mxu0 %v8271_v50  ;;  %v1008_v42 = vld [vmem:[#allocation4 + $0x978] sm:$0xff] }
 0x2be   :  { %4376 = vmatprep.subr.bf16.mxu1 %v8399_v52  ;;  %v1132_v48 = vld [vmem:[#allocation4 + $0xd58] sm:$0xff]  ;;  %v8479_v35 = vcombine.high %v1004_v39, %v1008_v42  ;;  %v8478_v59 = vcombine.low %v1004_v39, %v1008_v42 }
 0x2bf   :  { %v1136_v49 = vld [vmem:[#allocation4 + $0xd78] sm:$0xff] }
 0x2c0   :  { %4336 = vmatpush2.bf16.msra.mxu0 %v8270_v43  ;;  %v1128_v44 = vld [vmem:[#allocation4 + $0xd38] sm:$0xff]  ;;  %v8606_v63 = vcombine.low %v1132_v48, %v1136_v49 }
 0x2c1   :  { %4377 = vmatpush2.bf16.msra.mxu1 %v8398_v40  ;;  %4337 = vmatprep.subr.bf16.mxu0 %v8263_v56  ;;  %v996_v40 = vld [vmem:[#allocation4 + $0x918] sm:$0xff] }
 0x2c2   :  { %4378 = vmatprep.subr.bf16.mxu1 %v8391_v41  ;;  %v1000_v56 = vld [vmem:[#allocation4 + $0x938] sm:$0xff] }
 0x2c3   :  { %v1124_v41 = vld [vmem:[#allocation4 + $0xd18] sm:$0xff]  ;;  %v8470_v5 = vcombine.low %v996_v40, %v1000_v56 }
 0x2c4   :  { %4338 = vmatpush2.bf16.msra.mxu0 %v8262_v61  ;;  %v8471_v61 = vcombine.high %v996_v40, %v1000_v56  ;;  %v1116_v2 = vld [vmem:[#allocation4 + $0xcd8] sm:$0xff]  ;;  %v8598_v32 = vcombine.low %v1124_v41, %v1128_v44 }
 0x2c5   :  { %4379 = vmatpush2.bf16.msra.mxu1 %v8390_v30  ;;  %4339 = vmatprep.subr.bf16.mxu0 %v8255_v26  ;;  %v988_v26 = vld [vmem:[#allocation4 + $0x8d8] sm:$0xff] }
 0x2c6   :  { %4380 = vmatprep.subr.bf16.mxu1 %v8383_v29  ;;  %v992_v29 = vld [vmem:[#allocation4 + $0x8f8] sm:$0xff] }
 0x2c7   :  { %v1120_v4 = vld [vmem:[#allocation4 + $0xcf8] sm:$0xff]  ;;  %v8462_v14 = vcombine.low %v988_v26, %v992_v29 }
 0x2c8   :  { %4340 = vmatpush2.bf16.msra.mxu0 %v8254_v6  ;;  %v8463_v6 = vcombine.high %v988_v26, %v992_v29  ;;  %v1108_v11 = vld [vmem:[#allocation4 + $0xc98] sm:$0xff]  ;;  %v8590_v15 = vcombine.low %v1116_v2, %v1120_v4 }
 0x2c9   :  { %4381 = vmatpush2.bf16.msra.mxu1 %v8382_v7  ;;  %4341 = vmatprep.subr.bf16.mxu0 %v8247_v8  ;;  %v8591_v7 = vcombine.high %v1116_v2, %v1120_v4  ;;  %v980_v8 = vld [vmem:[#allocation4 + $0x898] sm:$0xff] }
 0x2ca   :  { %4382 = vmatprep.subr.bf16.mxu1 %v8375_v9  ;;  %v984_v9 = vld [vmem:[#allocation4 + $0x8b8] sm:$0xff] }
 0x2cb   :  { %v1112_v13 = vld [vmem:[#allocation4 + $0xcb8] sm:$0xff] }
 0x2cc   :  { %4342 = vmatpush2.bf16.msra.mxu0 %v8246_v16  ;;  %v8455_v16 = vcombine.high %v980_v8, %v984_v9  ;;  %v1100_v22 = vld [vmem:[#allocation4 + $0xc58] sm:$0xff]  ;;  %v8582_v27 = vcombine.low %v1108_v11, %v1112_v13 }
 0x2cd   :  { %4383 = vmatpush2.bf16.msra.mxu1 %v8374_v17  ;;  %4393 = vmatprep.subr.bf16.mxu0 %v8495_v19  ;;  %v8583_v17 = vcombine.high %v1108_v11, %v1112_v13  ;;  %v972_v19 = vld [vmem:[#allocation4 + $0x858] sm:$0xff] }
 0x2ce   :  { %4434 = vmatprep.subr.bf16.mxu1 %v8623_v21  ;;  %v976_v21 = vld [vmem:[#allocation4 + $0x878] sm:$0xff] }
 0x2cf   :  { %v4099_v46 = vpop.f32.mrf.mxu0  ;;  %4344 = vmatmul.mubr.bf16.vlgmr.msra.gmra.mxu0 %v10228_v31  ;;  %v1104_v24 = vld [vmem:[#allocation4 + $0xc78] sm:$0xff]  ;;  %v8447_v33 = vcombine.high %v972_v19, %v976_v21 }
 0x2d0   :  { %v4100_v50 = vadd.f32 %v4099_v46, %v10310_v36  ;;  %v4140_v52 = vpop.f32.mrf.mxu1  ;;  %4385 = vmatmul.mubr.bf16.vlgmr.msra.gmra.mxu1 %v10224_v28  ;;  %4394 = vmatpush1.bf16.msra.mxu0 %v8494_v25  ;;  %v8607_v36 = vcombine.high %v1132_v48, %v1136_v49  ;;  %v8454_v25 = vcombine.low %v980_v8, %v984_v9  ;;  %v968_v39 = vld [vmem:[#allocation4 + $0x838] sm:$0xff] }
 0x2d1   :  { %4425 = vmatprep.mubr.bf16.mxu0 %v10246_v51  ;;  %4435 = vmatpush1.bf16.msra.mxu1 %v8622_v34  ;;  %v10319_v54 = vpop.f32.mrf.mxu0  ;;  %v8575_v34 = vcombine.high %v1100_v22, %v1104_v24  ;;  %v1092_v42 = vld [vmem:[#allocation4 + $0xc18] sm:$0xff]  ;;  %v8574_v48 = vcombine.low %v1100_v22, %v1104_v24 }
 0x2d2   :  { %v10321_v43 = vadd.f32 %v4140_v52, %v4100_v50  ;;  %4466 = vmatprep.mubr.bf16.mxu1 %v10248_v55  ;;  %v10324_v31 = vpop.f32.mrf.mxu1  ;;  %4395 = vmatprep.subr.bf16.mxu0 %v8487_v38  ;;  %v8599_v55 = vcombine.high %v1124_v41, %v1128_v44  ;;  %v964_v38 = vld [vmem:[#allocation4 + $0x818] sm:$0xff] }
 0x2d3   :  { %v4103_v28 = vpop.f32.mrf.mxu0  ;;  %4436 = vmatprep.subr.bf16.mxu1 %v8615_v47  ;;  %v1096_v46 = vld [vmem:[#allocation4 + $0xc38] sm:$0xff]  ;;  %v8446_v47 = vcombine.low %v972_v19, %v976_v21  ;;  %v8439_v49 = vcombine.high %v964_v38, %v968_v39 }
 0x2d4   :  { %v4144_v51 = vpop.f32.mrf.mxu1  ;;  %4396 = vmatpush1.bf16.msra.mxu0 %v8486_v53  ;;  %v8567_v50 = vcombine.high %v1092_v42, %v1096_v46  ;;  %v1084_v52 = vld [vmem:[#allocation4 + $0xbd8] sm:$0xff]  ;;  %v8566_v40 = vcombine.low %v1092_v42, %v1096_v46 }
 0x2d5   :  { %4437 = vmatpush1.bf16.msra.mxu1 %v8614_v12  ;;  %v4104_v60 = vpop.f32.mrf.mxu0  ;;  %4397 = vmatprep.subr.bf16.mxu0 %v8479_v35  ;;  %v1088_v53 = vld [vmem:[#allocation4 + $0xbf8] sm:$0xff] }
 0x2d6   :  { %v4145_v30 = vpop.f32.mrf.mxu1  ;;  %4438 = vmatprep.subr.bf16.mxu1 %v8607_v36  ;;  %v1212_v12 = vld [vmem:[#allocation4 + $0xfd8] sm:$0xff]  ;;  %v8438_v36 = vcombine.low %v964_v38, %v968_v39  ;;  %v8559_v56 = vcombine.high %v1084_v52, %v1088_v53  ;;  %v8558_v60 = vcombine.low %v1084_v52, %v1088_v53 }
 0x2d7   :  { %v1216_v35 = vld [vmem:[#allocation4 + $0xff8] sm:$0xff] }
 0x2d8   :  { %4398 = vmatpush1.bf16.msra.mxu0 %v8478_v59  ;;  %v8687_v28 = vcombine.high %v1212_v12, %v1216_v35  ;;  %v1076_v41 = vld [vmem:[#allocation4 + $0xb98] sm:$0xff] }
 0x2d9   :  { %4439 = vmatpush1.bf16.msra.mxu1 %v8606_v63  ;;  %4399 = vmatprep.subr.bf16.mxu0 %v8471_v61  ;;  %v1080_v44 = vld [vmem:[#allocation4 + $0xbb8] sm:$0xff]  ;;  %v8686_v63 = vcombine.low %v1212_v12, %v1216_v35 }
 0x2da   :  { %4440 = vmatprep.subr.bf16.mxu1 %v8599_v55  ;;  %v1204_v51 = vld [vmem:[#allocation4 + $0xf98] sm:$0xff]  ;;  %v8551_v61 = vcombine.high %v1076_v41, %v1080_v44  ;;  %v8550_v4 = vcombine.low %v1076_v41, %v1080_v44 }
 0x2db   :  { %v1208_v59 = vld [vmem:[#allocation4 + $0xfb8] sm:$0xff] }
 0x2dc   :  { %4400 = vmatpush1.bf16.msra.mxu0 %v8470_v5  ;;  %v8679_v30 = vcombine.high %v1204_v51, %v1208_v59  ;;  %v1068_v55 = vld [vmem:[#allocation4 + $0xb58] sm:$0xff]  ;;  %v8678_v5 = vcombine.low %v1204_v51, %v1208_v59  ;;  %v4102_v59 = vadd.f32 %v10319_v54, %v10313_v1  ;;  %v4476_v54 = vmax.f32 %v10297_v3, 0.0  ;;  %v9321_v3 = vld [vmem:[#allocation6 + $0x374] ss:$20 sps:$4 sm:$0xff]  }
 0x2dd   :  { %4441 = vmatpush1.bf16.msra.mxu1 %v8598_v32  ;;  %4401 = vmatprep.subr.bf16.mxu0 %v8463_v6  ;;  %v1072_v26 = vld [vmem:[#allocation4 + $0xb78] sm:$0xff] }
 0x2de   :  { %4442 = vmatprep.subr.bf16.mxu1 %v8591_v7  ;;  %v1196_v29 = vld [vmem:[#allocation4 + $0xf58] sm:$0xff]  ;;  %v8543_v32 = vcombine.high %v1068_v55, %v1072_v26  ;;  %v8542_v13 = vcombine.low %v1068_v55, %v1072_v26  ;;  %v4143_v55 = vadd.f32 %v10324_v31, %v4102_v59  ;;  %v9352_v59 = vld [vmem:[#allocation6] ss:$20 sps:$4 sm:$0xff]  }
 0x2df   :  { %v1200_v2 = vld [vmem:[#allocation4 + $0xf78] sm:$0xff] }
 0x2e0   :  { %4402 = vmatpush1.bf16.msra.mxu0 %v8462_v14  ;;  %v8671_v6 = vcombine.high %v1196_v29, %v1200_v2  ;;  %v1060_v7 = vld [vmem:[#allocation4 + $0xb18] sm:$0xff]  ;;  %v8670_v14 = vcombine.low %v1196_v29, %v1200_v2  ;;  %v1237_v29 = vsub.s32 4, %v10267_v20 }
 0x2e1   :  { %4443 = vmatpush1.bf16.msra.mxu1 %v8590_v15  ;;  %4403 = vmatprep.subr.bf16.mxu0 %v8455_v16  ;;  %v1064_v8 = vld [vmem:[#allocation4 + $0xb38] sm:$0xff] }
 0x2e2   :  { %4444 = vmatprep.subr.bf16.mxu1 %v8583_v17  ;;  %v1188_v9 = vld [vmem:[#allocation4 + $0xf18] sm:$0xff]  ;;  %v8535_v15 = vcombine.high %v1060_v7, %v1064_v8  ;;  %v8534_v24 = vcombine.low %v1060_v7, %v1064_v8  ;;  %v9318_v8 = vld [vmem:[#allocation6 + $0xf4] ss:$20 sps:$4 sm:$0xff]  }
 0x2e3   :  { %v1192_v11 = vld [vmem:[#allocation4 + $0xf38] sm:$0xff] }
 0x2e4   :  { %4404 = vmatpush1.bf16.msra.mxu0 %v8454_v25  ;;  %v8663_v16 = vcombine.high %v1188_v9, %v1192_v11  ;;  %v1052_v17 = vld [vmem:[#allocation4 + $0xad8] sm:$0xff]  ;;  %v8662_v25 = vcombine.low %v1188_v9, %v1192_v11  ;;  %v10336_v9 = vpack.c.bf16 %v4476_v54, %v4476_v54  ;;  %v9372_v54 = vld [vmem:[#allocation6 + $0x20c] ss:$20 sps:$4 sm:$0xff]  }
 0x2e5   :  { %4445 = vmatpush1.bf16.msra.mxu1 %v8582_v27  ;;  %4405 = vmatprep.subr.bf16.mxu0 %v8447_v33  ;;  %v1056_v19 = vld [vmem:[#allocation4 + $0xaf8] sm:$0xff] }
 0x2e6   :  { %4446 = vmatprep.subr.bf16.mxu1 %v8575_v34  ;;  %v1180_v21 = vld [vmem:[#allocation4 + $0xed8] sm:$0xff]  ;;  %v8527_v27 = vcombine.high %v1052_v17, %v1056_v19  ;;  %v8526_v46 = vcombine.low %v1052_v17, %v1056_v19  ;;  %v9319_v19 = vld [vmem:[#allocation6 + $0x370] ss:$20 sps:$4 sm:$0xff]  }
 0x2e7   :  { %v1184_v22 = vld [vmem:[#allocation4 + $0xef8] sm:$0xff] }
 0x2e8   :  { %4406 = vmatpush1.bf16.msra.mxu0 %v8446_v47  ;;  %v8655_v33 = vcombine.high %v1180_v21, %v1184_v22  ;;  %v1044_v34 = vld [vmem:[#allocation4 + $0xa98] sm:$0xff]  ;;  %v8654_v47 = vcombine.low %v1180_v21, %v1184_v22  ;;  %v9324_v21 = vld [vmem:[#allocation6 + $0xcc] ss:$20 sps:$4 sm:$0xff]  }
 0x2e9   :  { %4447 = vmatpush1.bf16.msra.mxu1 %v8574_v48  ;;  %4407 = vmatprep.subr.bf16.mxu0 %v8439_v49  ;;  %v1048_v38 = vld [vmem:[#allocation4 + $0xab8] sm:$0xff] }
 0x2ea   :  { %4448 = vmatprep.subr.bf16.mxu1 %v8567_v50  ;;  %v1172_v39 = vld [vmem:[#allocation4 + $0xe98] sm:$0xff]  ;;  %v8519_v48 = vcombine.high %v1044_v34, %v1048_v38  ;;  %v8518_v35 = vcombine.low %v1044_v34, %v1048_v38 }
 0x2eb   :  { %v1176_v42 = vld [vmem:[#allocation4 + $0xeb8] sm:$0xff] }
 0x2ec   :  { %4408 = vmatpush1.bf16.msra.mxu0 %v8438_v36  ;;  %v8647_v49 = vcombine.high %v1172_v39, %v1176_v42  ;;  %v1036_v50 = vld [vmem:[#allocation4 + $0xa58] sm:$0xff]  ;;  %v8646_v36 = vcombine.low %v1172_v39, %v1176_v42 }
 0x2ed   :  { %4449 = vmatpush1.bf16.msra.mxu1 %v8566_v40  ;;  %4409 = vmatprep.subr.bf16.mxu0 %v8559_v56  ;;  %v1040_v52 = vld [vmem:[#allocation4 + $0xa78] sm:$0xff] }
 0x2ee   :  { %4450 = vmatprep.subr.bf16.mxu1 %v8687_v28  ;;  %v1164_v53 = vld [vmem:[#allocation4 + $0xe58] sm:$0xff]  ;;  %v8511_v40 = vcombine.high %v1036_v50, %v1040_v52 }
 0x2ef   :  { %v1168_v12 = vld [vmem:[#allocation4 + $0xe78] sm:$0xff] }
 0x2f0   :  { %4410 = vmatpush2.bf16.msra.mxu0 %v8558_v60  ;;  %v8639_v56 = vcombine.high %v1164_v53, %v1168_v12  ;;  %v1028_v28 = vld [vmem:[#allocation4 + $0xa18] sm:$0xff]  ;;  %v8510_v60 = vcombine.low %v1036_v50, %v1040_v52 }
 0x2f1   :  { %4451 = vmatpush2.bf16.msra.mxu1 %v8686_v63  ;;  %4411 = vmatprep.subr.bf16.mxu0 %v8551_v61  ;;  %v1032_v41 = vld [vmem:[#allocation4 + $0xa38] sm:$0xff]  ;;  %v8638_v63 = vcombine.low %v1164_v53, %v1168_v12  ;;  %v9342_v53 = vld [vmem:[#allocation6 + $0x54] ss:$20 sps:$4 sm:$0xff]  }
 0x2f2   :  { %4452 = vmatprep.subr.bf16.mxu1 %v8679_v30  ;;  %v1156_v44 = vld [vmem:[#allocation4 + $0xe18] sm:$0xff]  ;;  %v8503_v61 = vcombine.high %v1028_v28, %v1032_v41  ;;  %v8502_v26 = vcombine.low %v1028_v28, %v1032_v41  ;;  %v9345_v12 = vld [vmem:[#allocation6 + $0x2d4] ss:$20 sps:$4 sm:$0xff]  }
 0x2f3   :  { %v1160_v51 = vld [vmem:[#allocation4 + $0xe38] sm:$0xff] }
 0x2f4   :  { %4412 = vmatpush2.bf16.msra.mxu0 %v8550_v4  ;;  %v8631_v30 = vcombine.high %v1156_v44, %v1160_v51  ;;  %v8630_v2 = vcombine.low %v1156_v44, %v1160_v51  ;;  %v9312_v4 = vld [vmem:[#allocation6 + $0x11c] ss:$20 sps:$4 sm:$0xff]   ;;  %v9313_v7 = vld [vmem:[#allocation6 + $0x398] ss:$20 sps:$4 sm:$0xff]  }
 0x2f5   :  { %4453 = vmatpush2.bf16.msra.mxu1 %v8678_v5  ;;  %4413 = vmatprep.subr.bf16.mxu0 %v8543_v32  ;;  %v9315_v1 = vld [vmem:[#allocation6 + $0x39c] ss:$20 sps:$4 sm:$0xff]   ;;  %v4478_v5 = vmax.f32 %v4143_v55, 0.0  ;;  %v10331_v32 = vld [vmem:[#allocation13] sm:$0xff]  ;;  %v9334_v50 = vld [vmem:[#allocation6 + $0x78] ss:$20 sps:$4 sm:$0xff]  }
 0x2f6   :  { %4454 = vmatprep.subr.bf16.mxu1 %v8671_v6  ;;  %v1238_v31 = vrot.slane %v10331_v32, %v1237_v29  ;;  %v9310_v6 = vld [vmem:[#allocation6 + $0x118] ss:$20 sps:$4 sm:$0xff]   ;;  %v9325_v34 = vld [vmem:[#allocation6 + $0x348] ss:$20 sps:$4 sm:$0xff]  }
 0x2f7   :  { %v9330_v38 = vld [vmem:[#allocation6 + $0xa4] ss:$20 sps:$4 sm:$0xff]   ;;  %v9346_v28 = vld [vmem:[#allocation6 + $0x28] ss:$20 sps:$4 sm:$0xff]  }
 0x2f8   :  { %4414 = vmatpush2.bf16.msra.mxu0 %v8542_v13  ;;  %v10339_v13 = vpack.c.bf16 %v4478_v5, %v4478_v5  ;;  %v9333_v42 = vld [vmem:[#allocation6 + $0x324] ss:$20 sps:$4 sm:$0xff]   ;;  %v9349_v41 = vld [vmem:[#allocation6 + $0x2a8] ss:$20 sps:$4 sm:$0xff]   ;;  %v9375_v5 = vld [vmem:[#allocation6 + $0x48c] ss:$20 sps:$4 sm:$0xff]  }
 0x2f9   :  { %4455 = vmatpush2.bf16.msra.mxu1 %v8670_v14  ;;  %4415 = vmatprep.subr.bf16.mxu0 %v8535_v15  ;;  %v9337_v52 = vld [vmem:[#allocation6 + $0x2f8] ss:$20 sps:$4 sm:$0xff]  }
 0x2fa   :  { %4456 = vmatprep.subr.bf16.mxu1 %v8663_v16  ;;  %v9316_v16 = vld [vmem:[#allocation6 + $0xf0] ss:$20 sps:$4 sm:$0xff]   ;;  %v9361_v55 = vld [vmem:[#allocation6 + $0x4d8] ss:$20 sps:$4 sm:$0xff]  }
 0x2fb   :  { %v9354_v44 = vld [vmem:[#allocation6 + $0x4] ss:$20 sps:$4 sm:$0xff]  }
 0x2fc   :  { %4416 = vmatpush2.bf16.msra.mxu0 %v8534_v24  ;;  %v9327_v24 = vld [vmem:[#allocation6 + $0x34c] ss:$20 sps:$4 sm:$0xff]   ;;  %v9357_v51 = vld [vmem:[#allocation6 + $0x284] ss:$20 sps:$4 sm:$0xff]  }
 0x2fd   :  { %4457 = vmatpush2.bf16.msra.mxu1 %v8662_v25  ;;  %4417 = vmatprep.subr.bf16.mxu0 %v8527_v27  ;;  %v9322_v27 = vld [vmem:[#allocation6 + $0xc8] ss:$20 sps:$4 sm:$0xff]  }
 0x2fe   :  { %4458 = vmatprep.subr.bf16.mxu1 %v8655_v33 }
 0x300   :  { %4418 = vmatpush2.bf16.msra.mxu0 %v8526_v46  ;;  %v9328_v46 = vld [vmem:[#allocation6 + $0xa0] ss:$20 sps:$4 sm:$0xff]  }
 0x301   :  { %4459 = vmatpush2.bf16.msra.mxu1 %v8654_v47  ;;  %4419 = vmatprep.subr.bf16.mxu0 %v8519_v48  ;;  %v9331_v47 = vld [vmem:[#allocation6 + $0x320] ss:$20 sps:$4 sm:$0xff]   ;;  %v9336_v48 = vld [vmem:[#allocation6 + $0x7c] ss:$20 sps:$4 sm:$0xff]  }
 0x302   :  { %4460 = vmatprep.subr.bf16.mxu1 %v8647_v49  ;;  %v9339_v49 = vld [vmem:[#allocation6 + $0x2fc] ss:$20 sps:$4 sm:$0xff]  }
 0x304   :  { %4420 = vmatpush2.bf16.msra.mxu0 %v8518_v35  ;;  %v9340_v35 = vld [vmem:[#allocation6 + $0x50] ss:$20 sps:$4 sm:$0xff]  }
 0x305   :  { %4461 = vmatpush2.bf16.msra.mxu1 %v8646_v36  ;;  %4421 = vmatprep.subr.bf16.mxu0 %v8511_v40  ;;  %v9343_v36 = vld [vmem:[#allocation6 + $0x2d0] ss:$20 sps:$4 sm:$0xff]   ;;  %v9348_v40 = vld [vmem:[#allocation6 + $0x2c] ss:$20 sps:$4 sm:$0xff]  }
 0x306   :  { %4462 = vmatprep.subr.bf16.mxu1 %v8639_v56  ;;  %v9351_v56 = vld [vmem:[#allocation6 + $0x2ac] ss:$20 sps:$4 sm:$0xff]  }
 0x308   :  { %4422 = vmatpush2.bf16.msra.mxu0 %v8510_v60  ;;  %v9355_v60 = vld [vmem:[#allocation6 + $0x280] ss:$20 sps:$4 sm:$0xff]  }
 0x309   :  { %4463 = vmatpush2.bf16.msra.mxu1 %v8638_v63  ;;  %4423 = vmatprep.subr.bf16.mxu0 %v8503_v61  ;;  %v9360_v63 = vld [vmem:[#allocation6 + $0x25c] ss:$20 sps:$4 sm:$0xff]  }
 0x30a   :  { %4464 = vmatprep.subr.bf16.mxu1 %v8631_v30  ;;  %v9363_v61 = vld [vmem:[#allocation6 + $0x4dc] ss:$20 sps:$4 sm:$0xff]   ;;  %v9358_v30 = vld [vmem:[#allocation6 + $0x258] ss:$20 sps:$4 sm:$0xff]  }
 0x30c   :  { %4424 = vmatpush2.bf16.msra.mxu0 %v8502_v26  ;;  %v9366_v26 = vld [vmem:[#allocation6 + $0x234] ss:$20 sps:$4 sm:$0xff]  }
 0x30d   :  { %4465 = vmatpush2.bf16.msra.mxu1 %v8630_v2  ;;  %6566 = vmatprep.subr.bf16.mxu0 %v9312_v4  ;;  %v9369_v2 = vld [vmem:[#allocation6 + $0x4b4] ss:$20 sps:$4 sm:$0xff]   ;;  %v9364_v4 = vld [vmem:[#allocation6 + $0x230] ss:$20 sps:$4 sm:$0xff]  }
 0x30e   :  { %6607 = vmatprep.subr.bf16.mxu1 %v9315_v1  ;;  %v9367_v1 = vld [vmem:[#allocation6 + $0x4b0] ss:$20 sps:$4 sm:$0xff]  }
 0x30f   :  { %v4181_v11 = vpop.f32.mrf.mxu0  ;;  %4426 = vmatmul.mubr.bf16.vlgmr.msra.gmra.mxu0 %v10256_v62 }
 0x310   :  { %v4182_v14 = vadd.f32 %v4181_v11, %v1238_v31  ;;  %v4222_v15 = vpop.f32.mrf.mxu1  ;;  %4467 = vmatmul.mubr.bf16.vlgmr.msra.gmra.mxu1 %v10254_v58  ;;  %6567 = vmatpush1.bf16.msra.mxu0 %v9310_v6  ;;  %v9370_v31 = vld [vmem:[#allocation6 + $0x208] ss:$20 sps:$4 sm:$0xff]   ;;  %v9376_v11 = vld [vmem:[#allocation6 + $0x1e0] ss:$20 sps:$4 sm:$0xff]  }
 0x311   :  { %6598 = vmatprep.mubr.bf16.mxu0 %v10336_v9  ;;  %6608 = vmatpush1.bf16.msra.mxu1 %v9313_v7  ;;  %v10343_v17 = vpop.f32.mrf.mxu0  ;;  %v9373_v6 = vld [vmem:[#allocation6 + $0x488] ss:$20 sps:$4 sm:$0xff]   ;;  %v9378_v7 = vld [vmem:[#allocation6 + $0x1e4] ss:$20 sps:$4 sm:$0xff]  }
 0x312   :  { %v10345_v22 = vadd.f32 %v4222_v15, %v4182_v14  ;;  %6639 = vmatprep.mubr.bf16.mxu1 %v10339_v13  ;;  %v10348_v62 = vpop.f32.mrf.mxu1  ;;  %6568 = vmatprep.subr.bf16.mxu0 %v9318_v8  ;;  %v9381_v8 = vld [vmem:[#allocation6 + $0x464] ss:$20 sps:$4 sm:$0xff]   ;;  %v9384_v14 = vld [vmem:[#allocation6 + $0x1bc] ss:$20 sps:$4 sm:$0xff]  }
 0x313   :  { %v4185_v25 = vpop.f32.mrf.mxu0  ;;  %6609 = vmatprep.subr.bf16.mxu1 %v9321_v3  ;;  %v9379_v3 = vld [vmem:[#allocation6 + $0x460] ss:$20 sps:$4 sm:$0xff]   ;;  %v9387_v15 = vld [vmem:[#allocation6 + $0x43c] ss:$20 sps:$4 sm:$0xff]  }
 0x314   :  { %v4226_v58 = vpop.f32.mrf.mxu1  ;;  %6569 = vmatpush1.bf16.msra.mxu0 %v9316_v16  ;;  %v9382_v16 = vld [vmem:[#allocation6 + $0x1b8] ss:$20 sps:$4 sm:$0xff]   ;;  %v9388_v25 = vld [vmem:[#allocation6 + $0x190] ss:$20 sps:$4 sm:$0xff]  }
 0x315   :  { %6610 = vmatpush1.bf16.msra.mxu1 %v9319_v19  ;;  %v4186_v33 = vpop.f32.mrf.mxu0  ;;  %6570 = vmatprep.subr.bf16.mxu0 %v9324_v21  ;;  %v9385_v19 = vld [vmem:[#allocation6 + $0x438] ss:$20 sps:$4 sm:$0xff]   ;;  %v9390_v21 = vld [vmem:[#allocation6 + $0x194] ss:$20 sps:$4 sm:$0xff]   ;;  %v9391_v58 = vld [vmem:[#allocation6 + $0x410] ss:$20 sps:$4 sm:$0xff]  }
 0x316   :  { %v4227_v39 = vpop.f32.mrf.mxu1  ;;  %6611 = vmatprep.subr.bf16.mxu1 %v9327_v24  ;;  %v9393_v24 = vld [vmem:[#allocation6 + $0x414] ss:$20 sps:$4 sm:$0xff]   ;;  %v9399_v33 = vld [vmem:[#allocation6 + $0x3ec] ss:$20 sps:$4 sm:$0xff]  }
 0x317   :  { %v9397_v39 = vld [vmem:[#allocation6 + $0x3e8] ss:$20 sps:$4 sm:$0xff]  }
 0x318   :  { %6571 = vmatpush1.bf16.msra.mxu0 %v9322_v27  ;;  %v9396_v27 = vld [vmem:[#allocation6 + $0x16c] ss:$20 sps:$4 sm:$0xff]  }
 0x319   :  { %6612 = vmatpush1.bf16.msra.mxu1 %v9325_v34  ;;  %6572 = vmatprep.subr.bf16.mxu0 %v9330_v38  ;;  %v1241_v34 = vsub.s32 5, %v10267_v20  ;;  %v9394_v38 = vld [vmem:[#allocation6 + $0x168] ss:$20 sps:$4 sm:$0xff]  }
 0x31a   :  { %6613 = vmatprep.subr.bf16.mxu1 %v9333_v42  ;;  %v9402_v42 = vld [vmem:[#allocation6 + $0x144] ss:$20 sps:$4 sm:$0xff]  }
 0x31c   :  { %6573 = vmatpush1.bf16.msra.mxu0 %v9328_v46  ;;  %v9405_v46 = vld [vmem:[#allocation6 + $0x3c4] ss:$20 sps:$4 sm:$0xff]  }
 0x31d   :  { %6614 = vmatpush1.bf16.msra.mxu1 %v9331_v47  ;;  %6574 = vmatprep.subr.bf16.mxu0 %v9336_v48  ;;  %v1242_v47 = vrot.slane %v10331_v32, %v1241_v34  ;;  %v9400_v48 = vld [vmem:[#allocation6 + $0x140] ss:$20 sps:$4 sm:$0xff]   ;;  %v9424_v34 = vld [vmem:[#allocation6 + $0x528] ss:$20 sps:$4 sm:$0xff]  }
 0x31e   :  { %6615 = vmatprep.subr.bf16.mxu1 %v9339_v49  ;;  %v4475_v49 = vmax.f32 %v10293_v57, 0.0  ;;  %v9471_v57 = vld [vmem:[#allocation6 + $0x874] ss:$20 sps:$4 sm:$0xff]  }
 0x320   :  { %6575 = vmatpush1.bf16.msra.mxu0 %v9334_v50  ;;  %v9403_v50 = vld [vmem:[#allocation6 + $0x3c0] ss:$20 sps:$4 sm:$0xff]  }
 0x321   :  { %6616 = vmatpush1.bf16.msra.mxu1 %v9337_v52  ;;  %6576 = vmatprep.subr.bf16.mxu0 %v9342_v53  ;;  %v9408_v52 = vld [vmem:[#allocation6 + $0x61c] ss:$20 sps:$4 sm:$0xff]   ;;  %v4477_v53 = vmax.f32 %v10321_v43, 0.0 }
 0x322   :  { %6617 = vmatprep.subr.bf16.mxu1 %v9345_v12  ;;  %v9465_v12 = vld [vmem:[#allocation6 + $0x89c] ss:$20 sps:$4 sm:$0xff]  }
 0x324   :  { %6577 = vmatpush1.bf16.msra.mxu0 %v9340_v35  ;;  %v4184_v35 = vadd.f32 %v10343_v17, %v1242_v47  ;;  %v9409_v17 = vld [vmem:[#allocation6 + $0x5f0] ss:$20 sps:$4 sm:$0xff]  }
 0x325   :  { %6618 = vmatpush1.bf16.msra.mxu1 %v9343_v36  ;;  %6578 = vmatprep.subr.bf16.mxu0 %v9348_v40  ;;  %v9406_v36 = vld [vmem:[#allocation6 + $0x618] ss:$20 sps:$4 sm:$0xff]   ;;  %v10355_v40 = vpack.c.bf16 %v4475_v49, %v4475_v49  ;;  %v9432_v47 = vld [vmem:[#allocation6 + $0x75c] ss:$20 sps:$4 sm:$0xff]  }
 0x326   :  { %6619 = vmatprep.subr.bf16.mxu1 %v9351_v56  ;;  %v9411_v56 = vld [vmem:[#allocation6 + $0x5f4] ss:$20 sps:$4 sm:$0xff]   ;;  %v4225_v43 = vadd.f32 %v10348_v62, %v4184_v35  ;;  %v9513_v49 = vld [vmem:[#allocation6 + $0x9dc] ss:$20 sps:$4 sm:$0xff]  }
 0x327   :  { %v9412_v62 = vld [vmem:[#allocation6 + $0x5c8] ss:$20 sps:$4 sm:$0xff]   ;;  %v9433_v35 = vld [vmem:[#allocation6 + $0x730] ss:$20 sps:$4 sm:$0xff]  }
 0x328   :  { %6579 = vmatpush1.bf16.msra.mxu0 %v9346_v28  ;;  %v9463_v28 = vld [vmem:[#allocation6 + $0x898] ss:$20 sps:$4 sm:$0xff]  }
 0x329   :  { %6620 = vmatpush1.bf16.msra.mxu1 %v9349_v41  ;;  %6580 = vmatprep.subr.bf16.mxu0 %v9354_v44  ;;  %v10357_v41 = vpack.c.bf16 %v4477_v53, %v4477_v53  ;;  %v9511_v53 = vld [vmem:[#allocation6 + $0x9d8] ss:$20 sps:$4 sm:$0xff]  }
 0x32a   :  { %6621 = vmatprep.subr.bf16.mxu1 %v9357_v51 }
 0x32c   :  { %6581 = vmatpush1.bf16.msra.mxu0 %v9352_v59 }
 0x32d   :  { %6622 = vmatpush1.bf16.msra.mxu1 %v9355_v60  ;;  %6582 = vmatprep.subr.bf16.mxu0 %v9360_v63  ;;  %v9414_v60 = vld [vmem:[#allocation6 + $0x5cc] ss:$20 sps:$4 sm:$0xff]   ;;  %v9469_v63 = vld [vmem:[#allocation6 + $0x870] ss:$20 sps:$4 sm:$0xff]  }
 0x32e   :  { %6623 = vmatprep.subr.bf16.mxu1 %v9363_v61 }
 0x330   :  { %6583 = vmatpush2.bf16.msra.mxu0 %v9358_v30 }
 0x331   :  { %6624 = vmatpush2.bf16.msra.mxu1 %v9361_v55  ;;  %6584 = vmatprep.subr.bf16.mxu0 %v9366_v26  ;;  %v9477_v55 = vld [vmem:[#allocation6 + $0x84c] ss:$20 sps:$4 sm:$0xff]  }
 0x332   :  { %6625 = vmatprep.subr.bf16.mxu1 %v9369_v2 }
 0x334   :  { %6585 = vmatpush2.bf16.msra.mxu0 %v9364_v4 }
 0x335   :  { %6626 = vmatpush2.bf16.msra.mxu1 %v9367_v1  ;;  %6586 = vmatprep.subr.bf16.mxu0 %v9372_v54  ;;  %v9417_v54 = vld [vmem:[#allocation6 + $0x5a4] ss:$20 sps:$4 sm:$0xff]  }
 0x336   :  { %6627 = vmatprep.subr.bf16.mxu1 %v9375_v5  ;;  %v9475_v5 = vld [vmem:[#allocation6 + $0x848] ss:$20 sps:$4 sm:$0xff]  }
 0x338   :  { %6587 = vmatpush2.bf16.msra.mxu0 %v9370_v31 }
 0x339   :  { %6628 = vmatpush2.bf16.msra.mxu1 %v9373_v6  ;;  %6588 = vmatprep.subr.bf16.mxu0 %v9378_v7  ;;  %v9483_v7 = vld [vmem:[#allocation6 + $0x824] ss:$20 sps:$4 sm:$0xff]  }
 0x33a   :  { %6629 = vmatprep.subr.bf16.mxu1 %v9381_v8 }
 0x33c   :  { %6589 = vmatpush2.bf16.msra.mxu0 %v9376_v11  ;;  %v9415_v11 = vld [vmem:[#allocation6 + $0x5a0] ss:$20 sps:$4 sm:$0xff]  }
 0x33d   :  { %6630 = vmatpush2.bf16.msra.mxu1 %v9379_v3  ;;  %6590 = vmatprep.subr.bf16.mxu0 %v9384_v14  ;;  %v9420_v3 = vld [vmem:[#allocation6 + $0x57c] ss:$20 sps:$4 sm:$0xff]   ;;  %v9481_v14 = vld [vmem:[#allocation6 + $0x820] ss:$20 sps:$4 sm:$0xff]  }
 0x33e   :  { %6631 = vmatprep.subr.bf16.mxu1 %v9387_v15  ;;  %v9489_v15 = vld [vmem:[#allocation6 + $0x7fc] ss:$20 sps:$4 sm:$0xff]  }
 0x340   :  { %6591 = vmatpush2.bf16.msra.mxu0 %v9382_v16  ;;  %v9418_v16 = vld [vmem:[#allocation6 + $0x578] ss:$20 sps:$4 sm:$0xff]  }
 0x341   :  { %6632 = vmatpush2.bf16.msra.mxu1 %v9385_v19  ;;  %6592 = vmatprep.subr.bf16.mxu0 %v9390_v21  ;;  %v9423_v19 = vld [vmem:[#allocation6 + $0x554] ss:$20 sps:$4 sm:$0xff]   ;;  %v9487_v21 = vld [vmem:[#allocation6 + $0x7f8] ss:$20 sps:$4 sm:$0xff]  }
 0x342   :  { %6633 = vmatprep.subr.bf16.mxu1 %v9393_v24  ;;  %v9495_v24 = vld [vmem:[#allocation6 + $0x7d4] ss:$20 sps:$4 sm:$0xff]  }
 0x344   :  { %6593 = vmatpush2.bf16.msra.mxu0 %v9388_v25  ;;  %v9421_v25 = vld [vmem:[#allocation6 + $0x550] ss:$20 sps:$4 sm:$0xff]  }
 0x345   :  { %6634 = vmatpush2.bf16.msra.mxu1 %v9391_v58  ;;  %6594 = vmatprep.subr.bf16.mxu0 %v9396_v27  ;;  %v9426_v58 = vld [vmem:[#allocation6 + $0x52c] ss:$20 sps:$4 sm:$0xff]   ;;  %v9493_v27 = vld [vmem:[#allocation6 + $0x7d0] ss:$20 sps:$4 sm:$0xff]  }
 0x346   :  { %6635 = vmatprep.subr.bf16.mxu1 %v9399_v33  ;;  %v9501_v33 = vld [vmem:[#allocation6 + $0x7ac] ss:$20 sps:$4 sm:$0xff]  }
 0x348   :  { %6595 = vmatpush2.bf16.msra.mxu0 %v9394_v38  ;;  %v9429_v38 = vld [vmem:[#allocation6 + $0x504] ss:$20 sps:$4 sm:$0xff]  }
 0x349   :  { %6636 = vmatpush2.bf16.msra.mxu1 %v9397_v39  ;;  %6596 = vmatprep.subr.bf16.mxu0 %v9402_v42  ;;  %v9499_v39 = vld [vmem:[#allocation6 + $0x7a8] ss:$20 sps:$4 sm:$0xff]   ;;  %v9507_v42 = vld [vmem:[#allocation6 + $0x784] ss:$20 sps:$4 sm:$0xff]  }
 0x34a   :  { %6637 = vmatprep.subr.bf16.mxu1 %v9405_v46  ;;  %v9427_v46 = vld [vmem:[#allocation6 + $0x500] ss:$20 sps:$4 sm:$0xff]  }
 0x34c   :  { %6597 = vmatpush2.bf16.msra.mxu0 %v9400_v48  ;;  %v9505_v48 = vld [vmem:[#allocation6 + $0x780] ss:$20 sps:$4 sm:$0xff]  }
 0x34d   :  { %6638 = vmatpush2.bf16.msra.mxu1 %v9403_v50  ;;  %6648 = vmatprep.subr.bf16.mxu0 %v9408_v52  ;;  %v9430_v50 = vld [vmem:[#allocation6 + $0x758] ss:$20 sps:$4 sm:$0xff]   ;;  %v9435_v52 = vld [vmem:[#allocation6 + $0x734] ss:$20 sps:$4 sm:$0xff]  }
 0x34e   :  { %6689 = vmatprep.subr.bf16.mxu1 %v9465_v12  ;;  %v9519_v12 = vld [vmem:[#allocation6 + $0x9b4] ss:$20 sps:$4 sm:$0xff]  }
 0x34f   :  { %v10359_v44 = vpop.f32.mrf.mxu0  ;;  %6599 = vmatmul.mubr.bf16.vlgmr.msra.gmra.mxu0 %v10355_v40 }
 0x350   :  { %v10363_v51 = vpop.f32.mrf.mxu1  ;;  %6640 = vmatmul.mubr.bf16.vlgmr.msra.gmra.mxu1 %v10357_v41  ;;  %6649 = vmatpush1.bf16.msra.mxu0 %v9406_v36  ;;  %v9438_v36 = vld [vmem:[#allocation6 + $0x70c] ss:$20 sps:$4 sm:$0xff]  }
 0x351   :  { %v4265_v59 = vpop.f32.mrf.mxu0  ;;  %6650 = vmatprep.subr.bf16.mxu0 %v9411_v56  ;;  %6690 = vmatpush1.bf16.msra.mxu1 %v9463_v28  ;;  %v9517_v56 = vld [vmem:[#allocation6 + $0x9b0] ss:$20 sps:$4 sm:$0xff]   ;;  %v9525_v28 = vld [vmem:[#allocation6 + $0x98c] ss:$20 sps:$4 sm:$0xff]  }
 0x352   :  { %v4266_v61 = vadd.f32 %v4265_v59, %v4225_v43  ;;  %v4306_v30 = vpop.f32.mrf.mxu1  ;;  %6691 = vmatprep.subr.bf16.mxu1 %v9471_v57  ;;  %v9436_v57 = vld [vmem:[#allocation6 + $0x708] ss:$20 sps:$4 sm:$0xff]   ;;  %v9441_v43 = vld [vmem:[#allocation6 + $0x6e4] ss:$20 sps:$4 sm:$0xff]  }
 0x353   :  { %v4267_v26 = vpop.f32.mrf.mxu0  ;;  %v9531_v59 = vld [vmem:[#allocation6 + $0x964] ss:$20 sps:$4 sm:$0xff]  }
 0x354   :  { %v4307_v2 = vadd.f32 %v4306_v30, %v4266_v61  ;;  %v4308_v4 = vpop.f32.mrf.mxu1  ;;  %6651 = vmatpush1.bf16.msra.mxu0 %v9409_v17  ;;  %v9523_v17 = vld [vmem:[#allocation6 + $0x988] ss:$20 sps:$4 sm:$0xff]   ;;  %v9529_v61 = vld [vmem:[#allocation6 + $0x960] ss:$20 sps:$4 sm:$0xff]  }
 0x355   :  { %v4268_v1 = vpop.f32.mrf.mxu0  ;;  %6652 = vmatprep.subr.bf16.mxu0 %v9414_v60  ;;  %6692 = vmatpush1.bf16.msra.mxu1 %v9469_v63  ;;  %v9439_v60 = vld [vmem:[#allocation6 + $0x6e0] ss:$20 sps:$4 sm:$0xff]   ;;  %v9444_v63 = vld [vmem:[#allocation6 + $0x6bc] ss:$20 sps:$4 sm:$0xff]  }
 0x356   :  { %v4480_v31 = vmax.f32 %v4307_v2, 0.0  ;;  %v4309_v6 = vpop.f32.mrf.mxu1  ;;  %6693 = vmatprep.subr.bf16.mxu1 %v9477_v55  ;;  %v9537_v30 = vld [vmem:[#allocation6 + $0x93c] ss:$20 sps:$4 sm:$0xff]   ;;  %v9442_v55 = vld [vmem:[#allocation6 + $0x6b8] ss:$20 sps:$4 sm:$0xff]   ;;  %v4264_v1 = vadd.f32 %v10359_v44, %v10345_v22 }
 0x357   :  { %v9447_v26 = vld [vmem:[#allocation6 + $0x694] ss:$20 sps:$4 sm:$0xff]   ;;  %v9535_v2 = vld [vmem:[#allocation6 + $0x938] ss:$20 sps:$4 sm:$0xff]  }
 0x358   :  { %v10366_v8 = vpack.c.bf16 %v4480_v31, %v4480_v31  ;;  %6653 = vmatpush1.bf16.msra.mxu0 %v9412_v62  ;;  %v9543_v4 = vld [vmem:[#allocation6 + $0x914] ss:$20 sps:$4 sm:$0xff]   ;;  %v9445_v62 = vld [vmem:[#allocation6 + $0x690] ss:$20 sps:$4 sm:$0xff]   ;;  %v9549_v31 = vld [vmem:[#allocation6 + $0x8ec] ss:$20 sps:$4 sm:$0xff]  }
 0x359   :  { %6654 = vmatprep.subr.bf16.mxu0 %v9417_v54  ;;  %6694 = vmatpush1.bf16.msra.mxu1 %v9475_v5  ;;  %v9450_v54 = vld [vmem:[#allocation6 + $0x66c] ss:$20 sps:$4 sm:$0xff]   ;;  %v9541_v5 = vld [vmem:[#allocation6 + $0x910] ss:$20 sps:$4 sm:$0xff]   ;;  %v9448_v6 = vld [vmem:[#allocation6 + $0x668] ss:$20 sps:$4 sm:$0xff]  }
 0x35a   :  { %6680 = vmatprep.mubr.bf16.mxu0 %v10366_v8  ;;  %6695 = vmatprep.subr.bf16.mxu1 %v9483_v7  ;;  %v4305_v7 = vadd.f32 %v10363_v51, %v4264_v1  ;;  %v9456_v22 = vld [vmem:[#allocation6 + $0x124] ss:$20 sps:$4 sm:$0xff]   ;;  %v9553_v44 = vld [vmem:[#allocation6 + $0x8c0] ss:$20 sps:$4 sm:$0xff]   ;;  %v9459_v51 = vld [vmem:[#allocation6 + $0xfc] ss:$20 sps:$4 sm:$0xff]  }
 0x35b   :  { %v9534_v1 = vld [vmem:[#allocation6 + $0x174] ss:$20 sps:$4 sm:$0xff]  }
 0x35c   :  { %6655 = vmatpush1.bf16.msra.mxu0 %v9415_v11  ;;  %v9453_v11 = vld [vmem:[#allocation6 + $0x644] ss:$20 sps:$4 sm:$0xff]  }
 0x35d   :  { %6656 = vmatprep.subr.bf16.mxu0 %v9420_v3  ;;  %6696 = vmatpush1.bf16.msra.mxu1 %v9481_v14  ;;  %v9547_v3 = vld [vmem:[#allocation6 + $0x8e8] ss:$20 sps:$4 sm:$0xff]   ;;  %v9555_v14 = vld [vmem:[#allocation6 + $0x8c4] ss:$20 sps:$4 sm:$0xff]  }
 0x35e   :  { %6697 = vmatprep.subr.bf16.mxu1 %v9489_v15  ;;  %v9451_v15 = vld [vmem:[#allocation6 + $0x640] ss:$20 sps:$4 sm:$0xff]  }
 0x360   :  { %6657 = vmatpush1.bf16.msra.mxu0 %v9418_v16  ;;  %v4479_v16 = vmax.f32 %v4305_v7, 0.0 }
 0x361   :  { %6658 = vmatprep.subr.bf16.mxu0 %v9423_v19  ;;  %6698 = vmatpush1.bf16.msra.mxu1 %v9487_v21  ;;  %v9561_v19 = vld [vmem:[#allocation6 + $0x3a4] ss:$20 sps:$4 sm:$0xff]   ;;  %v9454_v21 = vld [vmem:[#allocation6 + $0x120] ss:$20 sps:$4 sm:$0xff]  }
 0x362   :  { %6699 = vmatprep.subr.bf16.mxu1 %v9495_v24  ;;  %v10372_v24 = vpack.c.bf16 %v4479_v16, %v4479_v16 }
 0x364   :  { %6659 = vmatpush1.bf16.msra.mxu0 %v9421_v25 }
 0x365   :  { %6660 = vmatprep.subr.bf16.mxu0 %v9426_v58  ;;  %6700 = vmatpush1.bf16.msra.mxu1 %v9493_v27  ;;  %v9457_v27 = vld [vmem:[#allocation6 + $0xf8] ss:$20 sps:$4 sm:$0xff]  }
 0x366   :  { %6701 = vmatprep.subr.bf16.mxu1 %v9501_v33 }
 0x368   :  { %6661 = vmatpush1.bf16.msra.mxu0 %v9424_v34  ;;  %v9462_v34 = vld [vmem:[#allocation6 + $0xd4] ss:$20 sps:$4 sm:$0xff]  }
 0x369   :  { %6662 = vmatprep.subr.bf16.mxu0 %v9429_v38  ;;  %6702 = vmatpush1.bf16.msra.mxu1 %v9499_v39 }
 0x36a   :  { %6703 = vmatprep.subr.bf16.mxu1 %v9507_v42 }
 0x36c   :  { %6663 = vmatpush1.bf16.msra.mxu0 %v9427_v46  ;;  %v9460_v46 = vld [vmem:[#allocation6 + $0xd0] ss:$20 sps:$4 sm:$0xff]  }
 0x36d   :  { %6664 = vmatprep.subr.bf16.mxu0 %v9432_v47  ;;  %6704 = vmatpush1.bf16.msra.mxu1 %v9505_v48  ;;  %v9468_v48 = vld [vmem:[#allocation6 + $0xac] ss:$20 sps:$4 sm:$0xff]  }
 0x36e   :  { %6705 = vmatprep.subr.bf16.mxu1 %v9513_v49 }
 0x370   :  { %6665 = vmatpush2.bf16.msra.mxu0 %v9430_v50  ;;  %v9466_v50 = vld [vmem:[#allocation6 + $0xa8] ss:$20 sps:$4 sm:$0xff]  }
 0x371   :  { %6666 = vmatprep.subr.bf16.mxu0 %v9435_v52  ;;  %6706 = vmatpush2.bf16.msra.mxu1 %v9511_v53  ;;  %v9474_v52 = vld [vmem:[#allocation6 + $0x84] ss:$20 sps:$4 sm:$0xff]   ;;  %v9472_v53 = vld [vmem:[#allocation6 + $0x80] ss:$20 sps:$4 sm:$0xff]  }
 0x372   :  { %6707 = vmatprep.subr.bf16.mxu1 %v9519_v12  ;;  %v9480_v12 = vld [vmem:[#allocation6 + $0x5c] ss:$20 sps:$4 sm:$0xff]  }
 0x374   :  { %6667 = vmatpush2.bf16.msra.mxu0 %v9433_v35  ;;  %v9478_v35 = vld [vmem:[#allocation6 + $0x58] ss:$20 sps:$4 sm:$0xff]  }
 0x375   :  { %6668 = vmatprep.subr.bf16.mxu0 %v9438_v36  ;;  %6708 = vmatpush2.bf16.msra.mxu1 %v9517_v56  ;;  %v9486_v36 = vld [vmem:[#allocation6 + $0x34] ss:$20 sps:$4 sm:$0xff]   ;;  %v9484_v56 = vld [vmem:[#allocation6 + $0x30] ss:$20 sps:$4 sm:$0xff]  }
 0x376   :  { %6709 = vmatprep.subr.bf16.mxu1 %v9525_v28  ;;  %v9492_v28 = vld [vmem:[#allocation6 + $0xc] ss:$20 sps:$4 sm:$0xff]  }
 0x378   :  { %6669 = vmatpush2.bf16.msra.mxu0 %v9436_v57  ;;  %v9490_v57 = vld [vmem:[#allocation6 + $0x8] ss:$20 sps:$4 sm:$0xff]  }
 0x379   :  { %6670 = vmatprep.subr.bf16.mxu0 %v9441_v43  ;;  %6710 = vmatpush2.bf16.msra.mxu1 %v9523_v17  ;;  %v9498_v43 = vld [vmem:[#allocation6 + $0x264] ss:$20 sps:$4 sm:$0xff]   ;;  %v9496_v17 = vld [vmem:[#allocation6 + $0x260] ss:$20 sps:$4 sm:$0xff]  }
 0x37a   :  { %6711 = vmatprep.subr.bf16.mxu1 %v9531_v59  ;;  %v9504_v59 = vld [vmem:[#allocation6 + $0x23c] ss:$20 sps:$4 sm:$0xff]  }
 0x37c   :  { %6671 = vmatpush2.bf16.msra.mxu0 %v9439_v60  ;;  %v9502_v60 = vld [vmem:[#allocation6 + $0x238] ss:$20 sps:$4 sm:$0xff]  }
 0x37d   :  { %6672 = vmatprep.subr.bf16.mxu0 %v9444_v63  ;;  %6712 = vmatpush2.bf16.msra.mxu1 %v9529_v61  ;;  %v9510_v63 = vld [vmem:[#allocation6 + $0x214] ss:$20 sps:$4 sm:$0xff]   ;;  %v9508_v61 = vld [vmem:[#allocation6 + $0x210] ss:$20 sps:$4 sm:$0xff]  }
 0x37e   :  { %6713 = vmatprep.subr.bf16.mxu1 %v9537_v30  ;;  %v9516_v30 = vld [vmem:[#allocation6 + $0x1ec] ss:$20 sps:$4 sm:$0xff]  }
 0x380   :  { %6673 = vmatpush2.bf16.msra.mxu0 %v9442_v55  ;;  %v9514_v55 = vld [vmem:[#allocation6 + $0x1e8] ss:$20 sps:$4 sm:$0xff]  }
 0x381   :  { %6674 = vmatprep.subr.bf16.mxu0 %v9447_v26  ;;  %6714 = vmatpush2.bf16.msra.mxu1 %v9535_v2  ;;  %v9522_v26 = vld [vmem:[#allocation6 + $0x1c4] ss:$20 sps:$4 sm:$0xff]   ;;  %v9520_v2 = vld [vmem:[#allocation6 + $0x1c0] ss:$20 sps:$4 sm:$0xff]  }
 0x382   :  { %6715 = vmatprep.subr.bf16.mxu1 %v9543_v4  ;;  %v9528_v4 = vld [vmem:[#allocation6 + $0x19c] ss:$20 sps:$4 sm:$0xff]  }
 0x384   :  { %6675 = vmatpush2.bf16.msra.mxu0 %v9445_v62  ;;  %v9526_v62 = vld [vmem:[#allocation6 + $0x198] ss:$20 sps:$4 sm:$0xff]  }
 0x385   :  { %6676 = vmatprep.subr.bf16.mxu0 %v9450_v54  ;;  %6716 = vmatpush2.bf16.msra.mxu1 %v9541_v5  ;;  %v1245_v54 = vsub.s32 6, %v10267_v20  ;;  %v1249_v5 = vsub.s32 7, %v10267_v20 }
 0x386   :  { %6717 = vmatprep.subr.bf16.mxu1 %v9549_v31  ;;  %v9532_v31 = vld [vmem:[#allocation6 + $0x170] ss:$20 sps:$4 sm:$0xff]  }
 0x387   :  { %v1246_v7 = vrot.slane %v10331_v32, %v1245_v54  ;;  %v9583_v54 = vld [vmem:[#allocation6 + $0x300] ss:$20 sps:$4 sm:$0xff]  }
 0x388   :  { %6677 = vmatpush2.bf16.msra.mxu0 %v9448_v6  ;;  %v9540_v6 = vld [vmem:[#allocation6 + $0x14c] ss:$20 sps:$4 sm:$0xff]  }
 0x389   :  { %6678 = vmatprep.subr.bf16.mxu0 %v9453_v11  ;;  %6718 = vmatpush2.bf16.msra.mxu1 %v9547_v3  ;;  %v1250_v11 = vrot.slane %v10331_v32, %v1249_v5  ;;  %v9538_v3 = vld [vmem:[#allocation6 + $0x148] ss:$20 sps:$4 sm:$0xff]  }
 0x38a   :  { %6719 = vmatprep.subr.bf16.mxu1 %v9555_v14  ;;  %v9546_v14 = vld [vmem:[#allocation6 + $0x624] ss:$20 sps:$4 sm:$0xff]   ;;  %v9586_v5 = vld [vmem:[#allocation6 + $0x508] ss:$20 sps:$4 sm:$0xff]  }
 0x38c   :  { %6679 = vmatpush2.bf16.msra.mxu0 %v9451_v15 }
 0x38d   :  { %6730 = vmatprep.subr.bf16.mxu0 %v9456_v22  ;;  %6720 = vmatpush2.bf16.msra.mxu1 %v9553_v44  ;;  %v9544_v22 = vld [vmem:[#allocation6 + $0x620] ss:$20 sps:$4 sm:$0xff]   ;;  %v9552_v44 = vld [vmem:[#allocation6 + $0x5fc] ss:$20 sps:$4 sm:$0xff]  }
 0x38e   :  { %6771 = vmatprep.subr.bf16.mxu1 %v9561_v19 }
 0x38f   :  { %v10374_v25 = vpop.f32.mrf.mxu0  ;;  %6681 = vmatmul.mubr.bf16.vlgmr.msra.gmra.mxu0 %v10372_v24 }
 0x390   :  { %v10377_v58 = vpop.f32.mrf.mxu1  ;;  %6731 = vmatpush1.bf16.msra.mxu0 %v9454_v21  ;;  %6762 = vmatprep.mubr.bf16.mxu0 %v10336_v9  ;;  %v4346_v15 = vadd.f32 %v10374_v25, %v1246_v7  ;;  %v9589_v7 = vld [vmem:[#allocation6 + $0x2d8] ss:$20 sps:$4 sm:$0xff]  }
 0x391   :  { %v10380_v33 = vpop.f32.mrf.mxu0  ;;  %6732 = vmatprep.subr.bf16.mxu0 %v9459_v51 }
 0x392   :  { %v10382_v38 = vpop.f32.mrf.mxu1  ;;  %v4348_v16 = vadd.f32 %v10380_v33, %v1250_v11  ;;  %v4387_v19 = vadd.f32 %v10377_v58, %v4346_v15  ;;  %v9558_v33 = vld [vmem:[#allocation6 + $0x5d4] ss:$20 sps:$4 sm:$0xff]   ;;  %v9595_v15 = vld [vmem:[#allocation6 + $0x2b0] ss:$20 sps:$4 sm:$0xff]  }
 0x393   :  { %v4349_v39 = vpop.f32.mrf.mxu0  ;;  %v9592_v11 = vld [vmem:[#allocation6 + $0x760] ss:$20 sps:$4 sm:$0xff]  }
 0x394   :  { %v4390_v42 = vpop.f32.mrf.mxu1  ;;  %6733 = vmatpush1.bf16.msra.mxu0 %v9457_v27  ;;  %v4389_v51 = vadd.f32 %v10382_v38, %v4348_v16  ;;  %v9564_v38 = vld [vmem:[#allocation6 + $0x5ac] ss:$20 sps:$4 sm:$0xff]  }
 0x395   :  { %v4350_v47 = vpop.f32.mrf.mxu0  ;;  %6734 = vmatprep.subr.bf16.mxu0 %v9462_v34  ;;  %v9550_v34 = vld [vmem:[#allocation6 + $0x5f8] ss:$20 sps:$4 sm:$0xff]  }
 0x396   :  { %v4391_v49 = vpop.f32.mrf.mxu1  ;;  %v9598_v16 = vld [vmem:[#allocation6 + $0x738] ss:$20 sps:$4 sm:$0xff]  }
 0x397   :  { %v9556_v49 = vld [vmem:[#allocation6 + $0x5d0] ss:$20 sps:$4 sm:$0xff]  }
 0x398   :  { %6735 = vmatpush1.bf16.msra.mxu0 %v9460_v46 }
 0x399   :  { %6736 = vmatprep.subr.bf16.mxu0 %v9468_v48 }
 0x39c   :  { %6737 = vmatpush1.bf16.msra.mxu0 %v9466_v50 }
 0x39d   :  { %6738 = vmatprep.subr.bf16.mxu0 %v9474_v52 }
 0x3a0   :  { %6739 = vmatpush1.bf16.msra.mxu0 %v9472_v53 }
 0x3a1   :  { %6740 = vmatprep.subr.bf16.mxu0 %v9480_v12 }
 0x3a4   :  { %6741 = vmatpush1.bf16.msra.mxu0 %v9478_v35 }
 0x3a5   :  { %6742 = vmatprep.subr.bf16.mxu0 %v9486_v36  ;;  %v9559_v36 = vld [vmem:[#allocation6 + $0x3a0] ss:$20 sps:$4 sm:$0xff]  }
 0x3a8   :  { %6743 = vmatpush1.bf16.msra.mxu0 %v9484_v56 }
 0x3a9   :  { %6744 = vmatprep.subr.bf16.mxu0 %v9492_v28  ;;  %v9562_v28 = vld [vmem:[#allocation6 + $0x5a8] ss:$20 sps:$4 sm:$0xff]  }
 0x3ac   :  { %6745 = vmatpush1.bf16.msra.mxu0 %v9490_v57  ;;  %v9567_v57 = vld [vmem:[#allocation6 + $0x37c] ss:$20 sps:$4 sm:$0xff]  }
 0x3ad   :  { %6746 = vmatprep.subr.bf16.mxu0 %v9498_v43  ;;  %v9570_v43 = vld [vmem:[#allocation6 + $0x584] ss:$20 sps:$4 sm:$0xff]  }
 0x3b0   :  { %6747 = vmatpush2.bf16.msra.mxu0 %v9496_v17  ;;  %v9565_v17 = vld [vmem:[#allocation6 + $0x378] ss:$20 sps:$4 sm:$0xff]  }
 0x3b1   :  { %6748 = vmatprep.subr.bf16.mxu0 %v9504_v59  ;;  %v9568_v59 = vld [vmem:[#allocation6 + $0x580] ss:$20 sps:$4 sm:$0xff]  }
 0x3b4   :  { %6749 = vmatpush2.bf16.msra.mxu0 %v9502_v60  ;;  %v9573_v60 = vld [vmem:[#allocation6 + $0x354] ss:$20 sps:$4 sm:$0xff]  }
 0x3b5   :  { %6750 = vmatprep.subr.bf16.mxu0 %v9510_v63  ;;  %v9576_v63 = vld [vmem:[#allocation6 + $0x55c] ss:$20 sps:$4 sm:$0xff]  }
 0x3b8   :  { %6751 = vmatpush2.bf16.msra.mxu0 %v9508_v61  ;;  %v9571_v61 = vld [vmem:[#allocation6 + $0x350] ss:$20 sps:$4 sm:$0xff]  }
 0x3b9   :  { %6752 = vmatprep.subr.bf16.mxu0 %v9516_v30  ;;  %v9574_v30 = vld [vmem:[#allocation6 + $0x558] ss:$20 sps:$4 sm:$0xff]  }
 0x3bc   :  { %6753 = vmatpush2.bf16.msra.mxu0 %v9514_v55  ;;  %v9579_v55 = vld [vmem:[#allocation6 + $0x32c] ss:$20 sps:$4 sm:$0xff]  }
 0x3bd   :  { %6754 = vmatprep.subr.bf16.mxu0 %v9522_v26  ;;  %v9582_v26 = vld [vmem:[#allocation6 + $0x534] ss:$20 sps:$4 sm:$0xff]  }
 0x3c0   :  { %6755 = vmatpush2.bf16.msra.mxu0 %v9520_v2  ;;  %v9577_v2 = vld [vmem:[#allocation6 + $0x328] ss:$20 sps:$4 sm:$0xff]  }
 0x3c1   :  { %6756 = vmatprep.subr.bf16.mxu0 %v9528_v4  ;;  %v9580_v4 = vld [vmem:[#allocation6 + $0x530] ss:$20 sps:$4 sm:$0xff]  }
 0x3c4   :  { %6757 = vmatpush2.bf16.msra.mxu0 %v9526_v62  ;;  %v9585_v62 = vld [vmem:[#allocation6 + $0x304] ss:$20 sps:$4 sm:$0xff]  }
 0x3c5   :  { %6758 = vmatprep.subr.bf16.mxu0 %v9534_v1  ;;  %v9588_v1 = vld [vmem:[#allocation6 + $0x50c] ss:$20 sps:$4 sm:$0xff]  }
 0x3c8   :  { %6759 = vmatpush2.bf16.msra.mxu0 %v9532_v31  ;;  %v9591_v31 = vld [vmem:[#allocation6 + $0x2dc] ss:$20 sps:$4 sm:$0xff]  }
 0x3c9   :  { %6760 = vmatprep.subr.bf16.mxu0 %v9540_v6  ;;  %v9594_v6 = vld [vmem:[#allocation6 + $0x764] ss:$20 sps:$4 sm:$0xff]  }
 0x3cc   :  { %6761 = vmatpush2.bf16.msra.mxu0 %v9538_v3  ;;  %v9597_v3 = vld [vmem:[#allocation6 + $0x2b4] ss:$20 sps:$4 sm:$0xff]  }
 0x3cd   :  { %6812 = vmatprep.subr.bf16.mxu0 %v9546_v14  ;;  %v9600_v14 = vld [vmem:[#allocation6 + $0x73c] ss:$20 sps:$4 sm:$0xff]  }
 0x3cf   :  { %v4427_v21 = vpop.f32.mrf.mxu0  ;;  %6763 = vmatmul.mubr.bf16.vlgmr.msra.gmra.mxu0 %v10355_v40 }
 0x3d0   :  { %v4428_v32 = vadd.f32 %v4427_v21, %v4387_v19  ;;  %v4468_v27 = vpop.f32.mrf.mxu1  ;;  %6813 = vmatpush1.bf16.msra.mxu0 %v9544_v22  ;;  %6844 = vmatprep.mubr.bf16.mxu0 %v10366_v8  ;;  %v9603_v22 = vld [vmem:[#allocation6 + $0x28c] ss:$20 sps:$4 sm:$0xff]   ;;  %v9601_v19 = vld [vmem:[#allocation6 + $0x288] ss:$20 sps:$4 sm:$0xff]   ;;  %v9604_v21 = vld [vmem:[#allocation6 + $0x710] ss:$20 sps:$4 sm:$0xff]  }
 0x3d1   :  { %v4429_v25 = vpop.f32.mrf.mxu0  ;;  %6814 = vmatprep.subr.bf16.mxu0 %v9552_v44  ;;  %v9606_v44 = vld [vmem:[#allocation6 + $0x714] ss:$20 sps:$4 sm:$0xff]  }
 0x3d2   :  { %v4469_v39 = vadd.f32 %v4468_v27, %v4428_v32  ;;  %v4430_v42 = vadd.f32 %v4429_v25, %v4389_v51  ;;  %v4470_v46 = vpop.f32.mrf.mxu1  ;;  %v9609_v51 = vld [vmem:[#allocation6 + $0x4e4] ss:$20 sps:$4 sm:$0xff]   ;;  %v9612_v32 = vld [vmem:[#allocation6 + $0x6ec] ss:$20 sps:$4 sm:$0xff]   ;;  %v9615_v25 = vld [vmem:[#allocation6 + $0x4bc] ss:$20 sps:$4 sm:$0xff]  }
 0x3d3   :  { %v4431_v47 = vpop.f32.mrf.mxu0  ;;  %v9607_v27 = vld [vmem:[#allocation6 + $0x4e0] ss:$20 sps:$4 sm:$0xff]  }
 0x3d4   :  { %v4471_v48 = vadd.f32 %v4470_v46, %v4430_v42  ;;  %v4472_v58 = vpop.f32.mrf.mxu1  ;;  %6815 = vmatpush1.bf16.msra.mxu0 %v9550_v34  ;;  %v4481_v50 = vmax.f32 %v4469_v39, 0.0  ;;  %v9610_v34 = vld [vmem:[#allocation6 + $0x6e8] ss:$20 sps:$4 sm:$0xff]   ;;  %v9613_v39 = vld [vmem:[#allocation6 + $0x4b8] ss:$20 sps:$4 sm:$0xff]  }
 0x3d5   :  { %v4432_v52 = vpop.f32.mrf.mxu0  ;;  %6816 = vmatprep.subr.bf16.mxu0 %v9558_v33  ;;  %v9618_v33 = vld [vmem:[#allocation6 + $0x6c4] ss:$20 sps:$4 sm:$0xff]   ;;  %v9616_v42 = vld [vmem:[#allocation6 + $0x6c0] ss:$20 sps:$4 sm:$0xff]   ;;  %v9624_v47 = vld [vmem:[#allocation6 + $0x69c] ss:$20 sps:$4 sm:$0xff]  }
 0x3d6   :  { %v4482_v53 = vmax.f32 %v4471_v48, 0.0  ;;  %v4473_v12 = vpop.f32.mrf.mxu1  ;;  %v10396_v56 = vpack.c.bf16 %v4481_v50, %v4481_v50  ;;  %v9621_v46 = vld [vmem:[#allocation6 + $0x494] ss:$20 sps:$4 sm:$0xff]   ;;  %v9619_v48 = vld [vmem:[#allocation6 + $0x490] ss:$20 sps:$4 sm:$0xff]  }
 0x3d7   :  { %v9622_v58 = vld [vmem:[#allocation6 + $0x698] ss:$20 sps:$4 sm:$0xff]   ;;  %v9630_v50 = vld [vmem:[#allocation6 + $0x674] ss:$20 sps:$4 sm:$0xff]  }
 0x3d8   :  { %v10394_v35 = vpack.c.bf16 %v4482_v53, %v4482_v53  ;;  %6817 = vmatpush1.bf16.msra.mxu0 %v9556_v49  ;;  %v9627_v49 = vld [vmem:[#allocation6 + $0x46c] ss:$20 sps:$4 sm:$0xff]   ;;  %v9625_v52 = vld [vmem:[#allocation6 + $0x468] ss:$20 sps:$4 sm:$0xff]   ;;  %v9633_v53 = vld [vmem:[#allocation6 + $0x444] ss:$20 sps:$4 sm:$0xff]  }
 0x3d9   :  { %6818 = vmatprep.subr.bf16.mxu0 %v9564_v38  ;;  %v9628_v38 = vld [vmem:[#allocation6 + $0x670] ss:$20 sps:$4 sm:$0xff]   ;;  %v9636_v12 = vld [vmem:[#allocation6 + $0x64c] ss:$20 sps:$4 sm:$0xff]  }
 0x3da   :  { %6721 = vmatprep.mubr.bf16.mxu1 %v10394_v35 }
 0x3db   :  { %6722 = vmatmul.mubr.bf16.vlgmr.msra.gmra.mxu1 %v10396_v56 }
 0x3dc   :  { %6772 = vmatpush1.bf16.msra.mxu1 %v9559_v36  ;;  %6803 = vmatprep.mubr.bf16.mxu1 %v10339_v13  ;;  %v9631_v36 = vld [vmem:[#allocation6 + $0x440] ss:$20 sps:$4 sm:$0xff]  }
 0x3dd   :  { %6819 = vmatpush1.bf16.msra.mxu0 %v9562_v28  ;;  %6773 = vmatprep.subr.bf16.mxu1 %v9567_v57  ;;  %v9634_v28 = vld [vmem:[#allocation6 + $0x648] ss:$20 sps:$4 sm:$0xff]  }
 0x3de   :  { %6820 = vmatprep.subr.bf16.mxu0 %v9570_v43  ;;  %v9639_v57 = vld [vmem:[#allocation6 + $0x41c] ss:$20 sps:$4 sm:$0xff]   ;;  %v10401_v43 = vld [vmem:[#allocation13 + $0x8] sm:$0x1f] }
 0x3e0   :  { %6774 = vmatpush1.bf16.msra.mxu1 %v9565_v17  ;;  %v9640_v17 = vld [vmem:[#allocation6 + $0x268] ss:$20 sps:$4 sm:$0xff]  }
 0x3e1   :  { %6821 = vmatpush1.bf16.msra.mxu0 %v9568_v59  ;;  %6775 = vmatprep.subr.bf16.mxu1 %v9573_v60  ;;  %v9637_v59 = vld [vmem:[#allocation6 + $0x418] ss:$20 sps:$4 sm:$0xff]   ;;  %v4880_v60 = vrot.slane %v10401_v43, %v10270_v37 }
 0x3e2   :  { %6822 = vmatprep.subr.bf16.mxu0 %v9576_v63  ;;  %v9641_v63 = vld [vmem:[#allocation6 + $0x128] ss:$20 sps:$4 sm:$0xff]  }
 0x3e4   :  { %6776 = vmatpush1.bf16.msra.mxu1 %v9571_v61  ;;  %v4884_v61 = vrot.slane %v10401_v43, %v10275_v45 }
 0x3e5   :  { %6823 = vmatpush1.bf16.msra.mxu0 %v9574_v30  ;;  %6777 = vmatprep.subr.bf16.mxu1 %v9579_v55  ;;  %v9644_v30 = vld [vmem:[#allocation6 + $0x3f4] ss:$20 sps:$4 sm:$0xff]  }
 0x3e6   :  { %6824 = vmatprep.subr.bf16.mxu0 %v9582_v26  ;;  %v9645_v55 = vld [vmem:[#allocation6 + $0x240] ss:$20 sps:$4 sm:$0xff]  }
 0x3e8   :  { %6778 = vmatpush1.bf16.msra.mxu1 %v9577_v2 }
 0x3e9   :  { %6825 = vmatpush1.bf16.msra.mxu0 %v9580_v4  ;;  %6779 = vmatprep.subr.bf16.mxu1 %v9585_v62  ;;  %v9642_v62 = vld [vmem:[#allocation6 + $0x3f0] ss:$20 sps:$4 sm:$0xff]  }
 0x3ea   :  { %6826 = vmatprep.subr.bf16.mxu0 %v9588_v1 }
 0x3ec   :  { %6780 = vmatpush1.bf16.msra.mxu1 %v9583_v54  ;;  %v9646_v54 = vld [vmem:[#allocation6 + $0x100] ss:$20 sps:$4 sm:$0xff]  }
 0x3ed   :  { %6827 = vmatpush1.bf16.msra.mxu0 %v9586_v5  ;;  %6781 = vmatprep.subr.bf16.mxu1 %v9591_v31  ;;  %v9649_v5 = vld [vmem:[#allocation6 + $0x3cc] ss:$20 sps:$4 sm:$0xff]  }
 0x3ee   :  { %6828 = vmatprep.subr.bf16.mxu0 %v9594_v6 }
 0x3f0   :  { %6782 = vmatpush1.bf16.msra.mxu1 %v9589_v7 }
 0x3f1   :  { %6829 = vmatpush2.bf16.msra.mxu0 %v9592_v11  ;;  %6783 = vmatprep.subr.bf16.mxu1 %v9597_v3  ;;  %v9650_v11 = vld [vmem:[#allocation6 + $0x218] ss:$20 sps:$4 sm:$0xff]  }
 0x3f2   :  { %6830 = vmatprep.subr.bf16.mxu0 %v9600_v14 }
 0x3f4   :  { %6784 = vmatpush1.bf16.msra.mxu1 %v9595_v15 }
 0x3f5   :  { %6831 = vmatpush2.bf16.msra.mxu0 %v9598_v16  ;;  %6785 = vmatprep.subr.bf16.mxu1 %v9603_v22  ;;  %v9647_v16 = vld [vmem:[#allocation6 + $0x3c8] ss:$20 sps:$4 sm:$0xff]  }
 0x3f6   :  { %6832 = vmatprep.subr.bf16.mxu0 %v9606_v44  ;;  %v9654_v44 = vld [vmem:[#allocation6 + $0x8a4] ss:$20 sps:$4 sm:$0xff]  }
 0x3f8   :  { %6786 = vmatpush1.bf16.msra.mxu1 %v9601_v19 }
 0x3f9   :  { %6833 = vmatpush2.bf16.msra.mxu0 %v9604_v21  ;;  %6787 = vmatprep.subr.bf16.mxu1 %v9609_v51  ;;  %v9655_v21 = vld [vmem:[#allocation6 + $0x1f0] ss:$20 sps:$4 sm:$0xff]   ;;  %v9652_v51 = vld [vmem:[#allocation6 + $0x8a0] ss:$20 sps:$4 sm:$0xff]  }
 0x3fa   :  { %6834 = vmatprep.subr.bf16.mxu0 %v9612_v32  ;;  %v9656_v32 = vld [vmem:[#allocation6 + $0xb0] ss:$20 sps:$4 sm:$0xff]  }
 0x3fc   :  { %6788 = vmatpush2.bf16.msra.mxu1 %v9607_v27  ;;  %v9659_v27 = vld [vmem:[#allocation6 + $0x87c] ss:$20 sps:$4 sm:$0xff]  }
 0x3fd   :  { %6835 = vmatpush2.bf16.msra.mxu0 %v9610_v34  ;;  %6789 = vmatprep.subr.bf16.mxu1 %v9615_v25  ;;  %v9660_v34 = vld [vmem:[#allocation6 + $0x1c8] ss:$20 sps:$4 sm:$0xff]   ;;  %v9657_v25 = vld [vmem:[#allocation6 + $0x878] ss:$20 sps:$4 sm:$0xff]  }
 0x3fe   :  { %6836 = vmatprep.subr.bf16.mxu0 %v9618_v33  ;;  %v9661_v33 = vld [vmem:[#allocation6 + $0x88] ss:$20 sps:$4 sm:$0xff]  }
 0x400   :  { %6790 = vmatpush2.bf16.msra.mxu1 %v9613_v39  ;;  %v9664_v39 = vld [vmem:[#allocation6 + $0x854] ss:$20 sps:$4 sm:$0xff]  }
 0x401   :  { %6837 = vmatpush2.bf16.msra.mxu0 %v9616_v42  ;;  %6791 = vmatprep.subr.bf16.mxu1 %v9621_v46  ;;  %v9665_v42 = vld [vmem:[#allocation6 + $0x1a0] ss:$20 sps:$4 sm:$0xff]   ;;  %v9662_v46 = vld [vmem:[#allocation6 + $0x850] ss:$20 sps:$4 sm:$0xff]  }
 0x402   :  { %6838 = vmatprep.subr.bf16.mxu0 %v9624_v47  ;;  %v9666_v47 = vld [vmem:[#allocation6 + $0x60] ss:$20 sps:$4 sm:$0xff]  }
 0x404   :  { %6792 = vmatpush2.bf16.msra.mxu1 %v9619_v48  ;;  %v9669_v48 = vld [vmem:[#allocation6 + $0x82c] ss:$20 sps:$4 sm:$0xff]  }
 0x405   :  { %6839 = vmatpush2.bf16.msra.mxu0 %v9622_v58  ;;  %6793 = vmatprep.subr.bf16.mxu1 %v9627_v49  ;;  %v9670_v58 = vld [vmem:[#allocation6 + $0x178] ss:$20 sps:$4 sm:$0xff]   ;;  %v9667_v49 = vld [vmem:[#allocation6 + $0x828] ss:$20 sps:$4 sm:$0xff]  }
 0x406   :  { %6840 = vmatprep.subr.bf16.mxu0 %v9630_v50  ;;  %v9671_v50 = vld [vmem:[#allocation6 + $0x38] ss:$20 sps:$4 sm:$0xff]  }
 0x408   :  { %6794 = vmatpush2.bf16.msra.mxu1 %v9625_v52  ;;  %v9674_v52 = vld [vmem:[#allocation6 + $0x804] ss:$20 sps:$4 sm:$0xff]  }
 0x409   :  { %6841 = vmatpush2.bf16.msra.mxu0 %v9628_v38  ;;  %6795 = vmatprep.subr.bf16.mxu1 %v9633_v53  ;;  %v9675_v38 = vld [vmem:[#allocation6 + $0x150] ss:$20 sps:$4 sm:$0xff]   ;;  %v9672_v53 = vld [vmem:[#allocation6 + $0x800] ss:$20 sps:$4 sm:$0xff]  }
 0x40a   :  { %6842 = vmatprep.subr.bf16.mxu0 %v9636_v12  ;;  %v9676_v12 = vld [vmem:[#allocation6 + $0x10] ss:$20 sps:$4 sm:$0xff]  }
 0x40c   :  { %6796 = vmatpush2.bf16.msra.mxu1 %v9631_v36  ;;  %v9679_v36 = vld [vmem:[#allocation6 + $0x7dc] ss:$20 sps:$4 sm:$0xff]  }
 0x40d   :  { %6843 = vmatpush2.bf16.msra.mxu0 %v9634_v28  ;;  %6797 = vmatprep.subr.bf16.mxu1 %v9639_v57  ;;  %v9680_v28 = vld [vmem:[#allocation6 + $0x768] ss:$20 sps:$4 sm:$0xff]   ;;  %v9677_v57 = vld [vmem:[#allocation6 + $0x7d8] ss:$20 sps:$4 sm:$0xff]  }
 0x40e   :  { %9123 = vmatprep.subr.bf16.mxu0 %v9640_v17  ;;  %v9681_v17 = vld [vmem:[#allocation6 + $0x628] ss:$20 sps:$4 sm:$0xff]  }
 0x40f   :  { %v6600_v26 = vpop.f32.mrf.mxu0 }
 0x410   :  { %v6601_v2 = vadd.f32 %v6600_v26, %v4880_v60  ;;  %v6641_v4 = vpop.f32.mrf.mxu1  ;;  %6798 = vmatpush2.bf16.msra.mxu1 %v9637_v59  ;;  %6845 = vmatmul.mubr.bf16.vlgmr.msra.gmra.mxu0 %v10372_v24  ;;  %v9684_v59 = vld [vmem:[#allocation6 + $0x7b4] ss:$20 sps:$4 sm:$0xff]  }
 0x411   :  { %9124 = vmatpush3.bf16.msra.mxu0 %v9641_v63  ;;  %6926 = vmatprep.mubr.bf16.mxu0 %v10336_v9  ;;  %v6602_v1 = vpop.f32.mrf.mxu0  ;;  %v9651_v9 = vld [vmem:[#allocation6 + $0xd8] ss:$20 sps:$4 sm:$0xff]   ;;  %v9685_v60 = vld [vmem:[#allocation6 + $0x740] ss:$20 sps:$4 sm:$0xff]   ;;  %v9682_v63 = vld [vmem:[#allocation6 + $0x7b0] ss:$20 sps:$4 sm:$0xff]  }
 0x412   :  { %v10409_v31 = vadd.f32 %v6641_v4, %v6601_v2  ;;  %v6603_v6 = vadd.f32 %v6602_v1, %v4884_v61  ;;  %v6643_v7 = vpop.f32.mrf.mxu1  ;;  %6799 = vmatprep.subr.bf16.mxu1 %v9644_v30  ;;  %9125 = vmatprep.subr.bf16.mxu0 %v9645_v55  ;;  %v9686_v61 = vld [vmem:[#allocation6 + $0x600] ss:$20 sps:$4 sm:$0xff]   ;;  %v9690_v55 = vld [vmem:[#allocation6 + $0x718] ss:$20 sps:$4 sm:$0xff]   ;;  %v9687_v26 = vld [vmem:[#allocation6 + $0x788] ss:$20 sps:$4 sm:$0xff]  }
 0x413   :  { %v6604_v3 = vpop.f32.mrf.mxu0  ;;  %v9689_v30 = vld [vmem:[#allocation6 + $0x78c] ss:$20 sps:$4 sm:$0xff]   ;;  %v9694_v4 = vld [vmem:[#allocation6 + $0x9e4] ss:$20 sps:$4 sm:$0xff]  }
 0x414   :  { %v10411_v14 = vadd.f32 %v6643_v7, %v6603_v6  ;;  %v6645_v15 = vpop.f32.mrf.mxu1  ;;  %6800 = vmatpush2.bf16.msra.mxu1 %v9642_v62  ;;  %v9691_v2 = vld [vmem:[#allocation6 + $0x5d8] ss:$20 sps:$4 sm:$0xff]   ;;  %v9695_v62 = vld [vmem:[#allocation6 + $0x6f0] ss:$20 sps:$4 sm:$0xff]   ;;  %v9692_v1 = vld [vmem:[#allocation6 + $0x9e0] ss:$20 sps:$4 sm:$0xff]  }
 0x415   :  { %9126 = vmatpush3.bf16.msra.mxu0 %v9646_v54  ;;  %v6605_v22 = vpop.f32.mrf.mxu0  ;;  %6801 = vmatprep.subr.bf16.mxu1 %v9649_v5  ;;  %v9699_v54 = vld [vmem:[#allocation6 + $0x9bc] ss:$20 sps:$4 sm:$0xff]   ;;  %v9697_v5 = vld [vmem:[#allocation6 + $0x9b8] ss:$20 sps:$4 sm:$0xff]   ;;  %v9704_v7 = vld [vmem:[#allocation6 + $0x994] ss:$20 sps:$4 sm:$0xff]  }
 0x416   :  { %v6646_v19 = vpop.f32.mrf.mxu1  ;;  %9127 = vmatprep.subr.bf16.mxu0 %v9650_v11  ;;  %v9701_v6 = vld [vmem:[#allocation6 + $0x588] ss:$20 sps:$4 sm:$0xff]   ;;  %v9705_v11 = vld [vmem:[#allocation6 + $0x6a0] ss:$20 sps:$4 sm:$0xff]   ;;  %v9702_v3 = vld [vmem:[#allocation6 + $0x990] ss:$20 sps:$4 sm:$0xff]  }
 0x417   :  { %v9706_v15 = vld [vmem:[#allocation6 + $0x560] ss:$20 sps:$4 sm:$0xff]   ;;  %v9710_v22 = vld [vmem:[#allocation6 + $0x678] ss:$20 sps:$4 sm:$0xff]  }
 0x418   :  { %6802 = vmatpush2.bf16.msra.mxu1 %v9647_v16  ;;  %v9709_v16 = vld [vmem:[#allocation6 + $0x96c] ss:$20 sps:$4 sm:$0xff]   ;;  %v9714_v19 = vld [vmem:[#allocation6 + $0x944] ss:$20 sps:$4 sm:$0xff]  }
 0x419   :  { %9128 = vmatpush3.bf16.msra.mxu0 %v9651_v9  ;;  %6853 = vmatprep.subr.bf16.mxu1 %v9654_v44  ;;  %v9707_v9 = vld [vmem:[#allocation6 + $0x968] ss:$20 sps:$4 sm:$0xff]   ;;  %v9711_v44 = vld [vmem:[#allocation6 + $0x538] ss:$20 sps:$4 sm:$0xff]  }
 0x41a   :  { %9129 = vmatprep.subr.bf16.mxu0 %v9655_v21  ;;  %v9715_v21 = vld [vmem:[#allocation6 + $0x650] ss:$20 sps:$4 sm:$0xff]  }
 0x41b   :  { %6804 = vmatmul.mubr.bf16.vlgmr.msra.gmra.mxu1 %v10357_v41 }
 0x41c   :  { %6854 = vmatpush1.bf16.msra.mxu1 %v9652_v51  ;;  %6885 = vmatprep.mubr.bf16.mxu1 %v10394_v35  ;;  %v9712_v51 = vld [vmem:[#allocation6 + $0x940] ss:$20 sps:$4 sm:$0xff]  }
 0x41d   :  { %9130 = vmatpush3.bf16.msra.mxu0 %v9656_v32  ;;  %6855 = vmatprep.subr.bf16.mxu1 %v9659_v27  ;;  %v9716_v32 = vld [vmem:[#allocation6 + $0x510] ss:$20 sps:$4 sm:$0xff]  }
 0x41e   :  { %9131 = vmatprep.subr.bf16.mxu0 %v9660_v34  ;;  %v9719_v27 = vld [vmem:[#allocation6 + $0x91c] ss:$20 sps:$4 sm:$0xff]  }
 0x41f   :  { %v9734_v34 = vld [vmem:[#allocation7 + $0x74] ss:$8 sps:$4 sm:$0xff]  }
 0x420   :  { %6856 = vmatpush1.bf16.msra.mxu1 %v9657_v25  ;;  %v9717_v25 = vld [vmem:[#allocation6 + $0x918] ss:$20 sps:$4 sm:$0xff]  }
 0x421   :  { %9132 = vmatpush3.bf16.msra.mxu0 %v9661_v33  ;;  %6857 = vmatprep.subr.bf16.mxu1 %v9664_v39  ;;  %v9722_v33 = vld [vmem:[#allocation6 + $0x8f4] ss:$20 sps:$4 sm:$0xff]   ;;  %v9732_v39 = vld [vmem:[#allocation7 + $0x70] ss:$8 sps:$4 sm:$0xff]  }
 0x422   :  { %9133 = vmatprep.subr.bf16.mxu0 %v9665_v42  ;;  %v9739_v42 = vld [vmem:[#allocation7 + $0x64] ss:$8 sps:$4 sm:$0xff]  }
 0x424   :  { %6858 = vmatpush1.bf16.msra.mxu1 %v9662_v46 }
 0x425   :  { %9134 = vmatpush3.bf16.msra.mxu0 %v9666_v47  ;;  %6859 = vmatprep.subr.bf16.mxu1 %v9669_v48  ;;  %v9720_v48 = vld [vmem:[#allocation6 + $0x8f0] ss:$20 sps:$4 sm:$0xff]  }
 0x426   :  { %9135 = vmatprep.subr.bf16.mxu0 %v9670_v58 }
 0x428   :  { %6860 = vmatpush1.bf16.msra.mxu1 %v9667_v49  ;;  %v9725_v49 = vld [vmem:[#allocation6 + $0x8cc] ss:$20 sps:$4 sm:$0xff]  }
 0x429   :  { %9136 = vmatpush3.bf16.msra.mxu0 %v9671_v50  ;;  %6861 = vmatprep.subr.bf16.mxu1 %v9674_v52  ;;  %v9737_v50 = vld [vmem:[#allocation7 + $0x60] ss:$8 sps:$4 sm:$0xff]  }
 0x42a   :  { %9137 = vmatprep.subr.bf16.mxu0 %v9675_v38  ;;  %v9744_v38 = vld [vmem:[#allocation7 + $0x54] ss:$8 sps:$4 sm:$0xff]  }
 0x42c   :  { %6862 = vmatpush1.bf16.msra.mxu1 %v9672_v53 }
 0x42d   :  { %9138 = vmatpush3.bf16.msra.mxu0 %v9676_v12  ;;  %6863 = vmatprep.subr.bf16.mxu1 %v9679_v36  ;;  %v9723_v12 = vld [vmem:[#allocation6 + $0x8c8] ss:$20 sps:$4 sm:$0xff]  }
 0x42e   :  { %9167 = vmatprep.subr.bf16.mxu0 %v9680_v28  ;;  %v9742_v28 = vld [vmem:[#allocation7 + $0x50] ss:$8 sps:$4 sm:$0xff]  }
 0x430   :  { %6864 = vmatpush1.bf16.msra.mxu1 %v9677_v57  ;;  %6927 = vmatmul.mubr.bf16.vlgmr.msra.gmra.mxu0 %v10355_v40  ;;  %v9696_v40 = vld [vmem:[#allocation6 + $0x5b0] ss:$20 sps:$4 sm:$0xff]   ;;  %v9727_v57 = vld [vmem:[#allocation6 + $0x3a8] ss:$20 sps:$4 sm:$0xff]  }
 0x431   :  { %9168 = vmatpush3.bf16.msra.mxu0 %v9681_v17  ;;  %7006 = vmatprep.mubr.bf16.mxu0 %v10366_v8  ;;  %v9700_v8 = vld [vmem:[#allocation6 + $0x6c8] ss:$20 sps:$4 sm:$0xff]   ;;  %v9728_v17 = vld [vmem:[#allocation6 + $0x4c0] ss:$20 sps:$4 sm:$0xff]  }
 0x432   :  { %6865 = vmatprep.subr.bf16.mxu1 %v9684_v59  ;;  %9169 = vmatprep.subr.bf16.mxu0 %v9685_v60  ;;  %v9747_v59 = vld [vmem:[#allocation7 + $0x40] ss:$8 sps:$4 sm:$0xff]  }
 0x433   :  { %v9729_v60 = vld [vmem:[#allocation6 + $0x380] ss:$20 sps:$4 sm:$0xff]  }
 0x434   :  { %6866 = vmatpush1.bf16.msra.mxu1 %v9682_v63  ;;  %v9730_v63 = vld [vmem:[#allocation6 + $0x498] ss:$20 sps:$4 sm:$0xff]  }
 0x435   :  { %9170 = vmatpush3.bf16.msra.mxu0 %v9686_v61  ;;  %6867 = vmatprep.subr.bf16.mxu1 %v9689_v30  ;;  %v9752_v61 = vld [vmem:[#allocation7 + $0x30] ss:$8 sps:$4 sm:$0xff]   ;;  %v9759_v30 = vld [vmem:[#allocation7 + $0x24] ss:$8 sps:$4 sm:$0xff]  }
 0x436   :  { %9171 = vmatprep.subr.bf16.mxu0 %v9690_v55  ;;  %v9731_v55 = vld [vmem:[#allocation6 + $0x358] ss:$20 sps:$4 sm:$0xff]  }
 0x438   :  { %6868 = vmatpush1.bf16.msra.mxu1 %v9687_v26  ;;  %v9735_v26 = vld [vmem:[#allocation6 + $0x470] ss:$20 sps:$4 sm:$0xff]  }
 0x439   :  { %9172 = vmatpush3.bf16.msra.mxu0 %v9691_v2  ;;  %6869 = vmatprep.subr.bf16.mxu1 %v9694_v4  ;;  %v9757_v2 = vld [vmem:[#allocation7 + $0x20] ss:$8 sps:$4 sm:$0xff]   ;;  %v9764_v4 = vld [vmem:[#allocation7 + $0x14] ss:$8 sps:$4 sm:$0xff]  }
 0x43a   :  { %9173 = vmatprep.subr.bf16.mxu0 %v9695_v62  ;;  %v9736_v62 = vld [vmem:[#allocation6 + $0x330] ss:$20 sps:$4 sm:$0xff]  }
 0x43c   :  { %6870 = vmatpush2.bf16.msra.mxu1 %v9692_v1  ;;  %v9740_v1 = vld [vmem:[#allocation6 + $0x448] ss:$20 sps:$4 sm:$0xff]  }
 0x43d   :  { %9174 = vmatpush3.bf16.msra.mxu0 %v9696_v40  ;;  %6871 = vmatprep.subr.bf16.mxu1 %v9699_v54  ;;  %v9769_v40 = vld [vmem:[#allocation7 + $0x4] ss:$8 sps:$4 sm:$0xff]   ;;  %v9741_v54 = vld [vmem:[#allocation6 + $0x308] ss:$20 sps:$4 sm:$0xff]  }
 0x43e   :  { %9175 = vmatprep.subr.bf16.mxu0 %v9700_v8  ;;  %v9745_v8 = vld [vmem:[#allocation6 + $0x420] ss:$20 sps:$4 sm:$0xff]  }
 0x440   :  { %6872 = vmatpush2.bf16.msra.mxu1 %v9697_v5  ;;  %v9767_v5 = vld [vmem:[#allocation7] ss:$8 sps:$4 sm:$0xff]  }
 0x441   :  { %9176 = vmatpush3.bf16.msra.mxu0 %v9701_v6  ;;  %6873 = vmatprep.subr.bf16.mxu1 %v9704_v7  ;;  %v9774_v6 = vld [vmem:[#allocation7 + $0xf4] ss:$8 sps:$4 sm:$0xff]  }
 0x442   :  { %9177 = vmatprep.subr.bf16.mxu0 %v9705_v11  ;;  %v9746_v7 = vld [vmem:[#allocation6 + $0x2e0] ss:$20 sps:$4 sm:$0xff]   ;;  %v9750_v11 = vld [vmem:[#allocation6 + $0x3f8] ss:$20 sps:$4 sm:$0xff]  }
 0x444   :  { %6874 = vmatpush2.bf16.msra.mxu1 %v9702_v3  ;;  %v9772_v3 = vld [vmem:[#allocation7 + $0xf0] ss:$8 sps:$4 sm:$0xff]  }
 0x445   :  { %9178 = vmatpush3.bf16.msra.mxu0 %v9706_v15  ;;  %6875 = vmatprep.subr.bf16.mxu1 %v9709_v16  ;;  %v9779_v15 = vld [vmem:[#allocation7 + $0xe4] ss:$8 sps:$4 sm:$0xff]  }
 0x446   :  { %9179 = vmatprep.subr.bf16.mxu0 %v9710_v22  ;;  %v9751_v16 = vld [vmem:[#allocation6 + $0x2b8] ss:$20 sps:$4 sm:$0xff]   ;;  %v9755_v22 = vld [vmem:[#allocation6 + $0x3d0] ss:$20 sps:$4 sm:$0xff]  }
 0x448   :  { %6876 = vmatpush2.bf16.msra.mxu1 %v9707_v9  ;;  %v9777_v9 = vld [vmem:[#allocation7 + $0xe0] ss:$8 sps:$4 sm:$0xff]  }
 0x449   :  { %9180 = vmatpush3.bf16.msra.mxu0 %v9711_v44  ;;  %6877 = vmatprep.subr.bf16.mxu1 %v9714_v19  ;;  %v9784_v44 = vld [vmem:[#allocation7 + $0xd4] ss:$8 sps:$4 sm:$0xff]   ;;  %v9756_v19 = vld [vmem:[#allocation6 + $0x290] ss:$20 sps:$4 sm:$0xff]  }
 0x44a   :  { %9181 = vmatprep.subr.bf16.mxu0 %v9715_v21  ;;  %v9760_v21 = vld [vmem:[#allocation6 + $0x9e8] ss:$20 sps:$4 sm:$0xff]  }
 0x44c   :  { %6878 = vmatpush2.bf16.msra.mxu1 %v9712_v51  ;;  %v9782_v51 = vld [vmem:[#allocation7 + $0xd0] ss:$8 sps:$4 sm:$0xff]  }
 0x44d   :  { %9182 = vmatpush3.bf16.msra.mxu0 %v9716_v32  ;;  %6879 = vmatprep.subr.bf16.mxu1 %v9719_v27  ;;  %v9789_v32 = vld [vmem:[#allocation7 + $0xc4] ss:$8 sps:$4 sm:$0xff]   ;;  %v9761_v27 = vld [vmem:[#allocation6 + $0x8a8] ss:$20 sps:$4 sm:$0xff]  }
 0x44e   :  { %7556 = vmatprep.subr.bf16.mxu0 %v9734_v34  ;;  %v9765_v34 = vld [vmem:[#allocation6 + $0x9c0] ss:$20 sps:$4 sm:$0xff]  }
 0x44f   :  { %v6682_v46 = vpop.f32.mrf.mxu0 }
 0x450   :  { %v10418_v47 = vadd.f32 %v6682_v46, %v10409_v31  ;;  %6880 = vmatpush2.bf16.msra.mxu1 %v9717_v25  ;;  %7007 = vmatmul.mubr.bf16.vlgmr.msra.gmra.mxu0 %v10372_v24  ;;  %v9726_v31 = vld [vmem:[#allocation6 + $0x4e8] ss:$20 sps:$4 sm:$0xff]   ;;  %v9749_v24 = vld [vmem:[#allocation7 + $0x44] ss:$8 sps:$4 sm:$0xff]   ;;  %v9792_v46 = vld [vmem:[#allocation7 + $0xb0] ss:$8 sps:$4 sm:$0xff]  }
 0x451   :  { %v6684_v58 = vpop.f32.mrf.mxu0  ;;  %6881 = vmatprep.subr.bf16.mxu1 %v9722_v33  ;;  %7557 = vmatpush1.bf16.msra.mxu0 %v9732_v39  ;;  %v9787_v25 = vld [vmem:[#allocation7 + $0xc0] ss:$8 sps:$4 sm:$0xff]   ;;  %v9794_v33 = vld [vmem:[#allocation7 + $0xb4] ss:$8 sps:$4 sm:$0xff]  }
 0x452   :  { %v10422_v52 = vadd.f32 %v6684_v58, %v10411_v14  ;;  %7558 = vmatprep.subr.bf16.mxu0 %v9739_v42  ;;  %v9754_v14 = vld [vmem:[#allocation7 + $0x34] ss:$8 sps:$4 sm:$0xff]   ;;  %v9770_v42 = vld [vmem:[#allocation6 + $0x998] ss:$20 sps:$4 sm:$0xff]  }
 0x453   :  { %v6686_v53 = vpop.f32.mrf.mxu0  ;;  %v9766_v39 = vld [vmem:[#allocation6 + $0x880] ss:$20 sps:$4 sm:$0xff]   ;;  %v9771_v58 = vld [vmem:[#allocation6 + $0x858] ss:$20 sps:$4 sm:$0xff]  }
 0x454   :  { %6882 = vmatpush2.bf16.msra.mxu1 %v9720_v48  ;;  %v9799_v48 = vld [vmem:[#allocation7 + $0xa4] ss:$8 sps:$4 sm:$0xff]   ;;  %v9780_v53 = vld [vmem:[#allocation6 + $0x948] ss:$20 sps:$4 sm:$0xff]  }
 0x455   :  { %v6687_v36 = vpop.f32.mrf.mxu0  ;;  %6883 = vmatprep.subr.bf16.mxu1 %v9725_v49  ;;  %7559 = vmatpush1.bf16.msra.mxu0 %v9737_v50  ;;  %v9775_v49 = vld [vmem:[#allocation6 + $0x970] ss:$20 sps:$4 sm:$0xff]   ;;  %v9797_v50 = vld [vmem:[#allocation7 + $0xa0] ss:$8 sps:$4 sm:$0xff]  }
 0x456   :  { %7560 = vmatprep.subr.bf16.mxu0 %v9744_v38  ;;  %v9802_v38 = vld [vmem:[#allocation7 + $0x94] ss:$8 sps:$4 sm:$0xff]  }
 0x457   :  { %v9781_v36 = vld [vmem:[#allocation6 + $0x808] ss:$20 sps:$4 sm:$0xff]  }
 0x458   :  { %6884 = vmatpush2.bf16.msra.mxu1 %v9723_v12  ;;  %v9805_v12 = vld [vmem:[#allocation7 + $0x84] ss:$8 sps:$4 sm:$0xff]  }
 0x459   :  { %9145 = vmatprep.subr.bf16.mxu1 %v9726_v31  ;;  %7561 = vmatpush1.bf16.msra.mxu0 %v9742_v28  ;;  %v9785_v31 = vld [vmem:[#allocation6 + $0x920] ss:$20 sps:$4 sm:$0xff]  }
 0x45a   :  { %7562 = vmatprep.subr.bf16.mxu0 %v9749_v24  ;;  %v9803_v28 = vld [vmem:[#allocation7 + $0x80] ss:$8 sps:$4 sm:$0xff]  }
 0x45b   :  { %6886 = vmatmul.mubr.bf16.vlgmr.msra.gmra.mxu1 %v10396_v56  ;;  %v9786_v24 = vld [vmem:[#allocation6 + $0x7e0] ss:$20 sps:$4 sm:$0xff]  }
 0x45c   :  { %9146 = vmatpush3.bf16.msra.mxu1 %v9727_v57  ;;  %6966 = vmatprep.mubr.bf16.mxu1 %v10339_v13  ;;  %v9762_v13 = vld [vmem:[#allocation7 + $0x10] ss:$8 sps:$4 sm:$0xff]  }
 0x45d   :  { %9147 = vmatprep.subr.bf16.mxu1 %v9728_v17  ;;  %7563 = vmatpush1.bf16.msra.mxu0 %v9747_v59  ;;  %v9790_v57 = vld [vmem:[#allocation6 + $0x8f8] ss:$20 sps:$4 sm:$0xff]  }
 0x45e   :  { %7564 = vmatprep.subr.bf16.mxu0 %v9754_v14  ;;  %v9791_v59 = vld [vmem:[#allocation6 + $0x7b8] ss:$20 sps:$4 sm:$0xff]  }
 0x460   :  { %9148 = vmatpush3.bf16.msra.mxu1 %v9729_v60  ;;  %v9795_v60 = vld [vmem:[#allocation6 + $0x8d0] ss:$20 sps:$4 sm:$0xff]  }
 0x461   :  { %9149 = vmatprep.subr.bf16.mxu1 %v9730_v63  ;;  %7565 = vmatpush1.bf16.msra.mxu0 %v9752_v61  ;;  %v9796_v61 = vld [vmem:[#allocation6 + $0x790] ss:$20 sps:$4 sm:$0xff]  }
 0x462   :  { %7566 = vmatprep.subr.bf16.mxu0 %v9759_v30 }
 0x464   :  { %9150 = vmatpush3.bf16.msra.mxu1 %v9731_v55  ;;  %v9808_v55 = vld [vmem:[#allocation7 + $0x174] ss:$8 sps:$4 sm:$0xff]  }
 0x465   :  { %9151 = vmatprep.subr.bf16.mxu1 %v9735_v26  ;;  %7567 = vmatpush1.bf16.msra.mxu0 %v9757_v2  ;;  %v9806_v26 = vld [vmem:[#allocation7 + $0x170] ss:$8 sps:$4 sm:$0xff]   ;;  %v9811_v2 = vld [vmem:[#allocation7 + $0x164] ss:$8 sps:$4 sm:$0xff]  }
 0x466   :  { %7568 = vmatprep.subr.bf16.mxu0 %v9764_v4 }
 0x468   :  { %9152 = vmatpush3.bf16.msra.mxu1 %v9736_v62 }
 0x469   :  { %9153 = vmatprep.subr.bf16.mxu1 %v9740_v1  ;;  %7569 = vmatpush1.bf16.msra.mxu0 %v9762_v13  ;;  %v9809_v1 = vld [vmem:[#allocation7 + $0x160] ss:$8 sps:$4 sm:$0xff]  }
 0x46a   :  { %7570 = vmatprep.subr.bf16.mxu0 %v9769_v40  ;;  %v9814_v40 = vld [vmem:[#allocation7 + $0x154] ss:$8 sps:$4 sm:$0xff]  }
 0x46c   :  { %9154 = vmatpush3.bf16.msra.mxu1 %v9741_v54 }
 0x46d   :  { %9155 = vmatprep.subr.bf16.mxu1 %v9745_v8  ;;  %7571 = vmatpush1.bf16.msra.mxu0 %v9767_v5 }
 0x46e   :  { %7572 = vmatprep.subr.bf16.mxu0 %v9774_v6 }
 0x470   :  { %9156 = vmatpush3.bf16.msra.mxu1 %v9746_v7  ;;  %v9812_v7 = vld [vmem:[#allocation7 + $0x150] ss:$8 sps:$4 sm:$0xff]  }
 0x471   :  { %9157 = vmatprep.subr.bf16.mxu1 %v9750_v11  ;;  %7573 = vmatpush2.bf16.msra.mxu0 %v9772_v3  ;;  %v9817_v3 = vld [vmem:[#allocation7 + $0x144] ss:$8 sps:$4 sm:$0xff]  }
 0x472   :  { %7574 = vmatprep.subr.bf16.mxu0 %v9779_v15 }
 0x474   :  { %9158 = vmatpush3.bf16.msra.mxu1 %v9751_v16  ;;  %v9820_v16 = vld [vmem:[#allocation7 + $0x134] ss:$8 sps:$4 sm:$0xff]  }
 0x475   :  { %9159 = vmatprep.subr.bf16.mxu1 %v9755_v22  ;;  %7575 = vmatpush2.bf16.msra.mxu0 %v9777_v9  ;;  %v9823_v22 = vld [vmem:[#allocation7 + $0x124] ss:$8 sps:$4 sm:$0xff]   ;;  %v9821_v9 = vld [vmem:[#allocation7 + $0x120] ss:$8 sps:$4 sm:$0xff]  }
 0x476   :  { %7576 = vmatprep.subr.bf16.mxu0 %v9784_v44  ;;  %v9826_v44 = vld [vmem:[#allocation7 + $0x114] ss:$8 sps:$4 sm:$0xff]  }
 0x478   :  { %9160 = vmatpush3.bf16.msra.mxu1 %v9756_v19  ;;  %v9824_v19 = vld [vmem:[#allocation7 + $0x110] ss:$8 sps:$4 sm:$0xff]  }
 0x479   :  { %9189 = vmatprep.subr.bf16.mxu1 %v9760_v21  ;;  %7577 = vmatpush2.bf16.msra.mxu0 %v9782_v51  ;;  %v9829_v21 = vld [vmem:[#allocation7 + $0x104] ss:$8 sps:$4 sm:$0xff]   ;;  %v9827_v51 = vld [vmem:[#allocation7 + $0x100] ss:$8 sps:$4 sm:$0xff]  }
 0x47a   :  { %7578 = vmatprep.subr.bf16.mxu0 %v9789_v32  ;;  %v9832_v32 = vld [vmem:[#allocation7 + $0x1f4] ss:$8 sps:$4 sm:$0xff]  }
 0x47b   :  { %6967 = vmatmul.mubr.bf16.vlgmr.msra.gmra.mxu1 %v10357_v41  ;;  %v9776_v41 = vld [vmem:[#allocation6 + $0x830] ss:$20 sps:$4 sm:$0xff]  }
 0x47c   :  { %9190 = vmatpush3.bf16.msra.mxu1 %v9761_v27  ;;  %7046 = vmatprep.mubr.bf16.mxu1 %v10394_v35  ;;  %v9800_v35 = vld [vmem:[#allocation7 + $0x90] ss:$8 sps:$4 sm:$0xff]  }
 0x47d   :  { %9191 = vmatprep.subr.bf16.mxu1 %v9765_v34  ;;  %7579 = vmatpush2.bf16.msra.mxu0 %v9787_v25  ;;  %v9830_v27 = vld [vmem:[#allocation7 + $0x1f0] ss:$8 sps:$4 sm:$0xff]   ;;  %v9833_v34 = vld [vmem:[#allocation7 + $0x1e0] ss:$8 sps:$4 sm:$0xff]   ;;  %v9838_v25 = vld [vmem:[#allocation7 + $0x1d4] ss:$8 sps:$4 sm:$0xff]  }
 0x47e   :  { %7580 = vmatprep.subr.bf16.mxu0 %v9794_v33  ;;  %v9836_v33 = vld [vmem:[#allocation7 + $0x1d0] ss:$8 sps:$4 sm:$0xff]  }
 0x480   :  { %9192 = vmatpush3.bf16.msra.mxu1 %v9766_v39  ;;  %v9841_v39 = vld [vmem:[#allocation7 + $0x1c4] ss:$8 sps:$4 sm:$0xff]  }
 0x481   :  { %9193 = vmatprep.subr.bf16.mxu1 %v9770_v42  ;;  %7581 = vmatpush2.bf16.msra.mxu0 %v9792_v46  ;;  %v9854_v42 = vld [vmem:[#allocation7 + $0x270] ss:$8 sps:$4 sm:$0xff]   ;;  %v9856_v46 = vld [vmem:[#allocation7 + $0x274] ss:$8 sps:$4 sm:$0xff]  }
 0x482   :  { %7582 = vmatprep.subr.bf16.mxu0 %v9799_v48  ;;  %v9859_v48 = vld [vmem:[#allocation7 + $0x264] ss:$8 sps:$4 sm:$0xff]  }
 0x484   :  { %9194 = vmatpush3.bf16.msra.mxu1 %v9771_v58  ;;  %v9839_v58 = vld [vmem:[#allocation7 + $0x1c0] ss:$8 sps:$4 sm:$0xff]  }
 0x485   :  { %9195 = vmatprep.subr.bf16.mxu1 %v9775_v49  ;;  %7583 = vmatpush2.bf16.msra.mxu0 %v9797_v50  ;;  %v9857_v49 = vld [vmem:[#allocation7 + $0x260] ss:$8 sps:$4 sm:$0xff]   ;;  %v9844_v50 = vld [vmem:[#allocation7 + $0x1b4] ss:$8 sps:$4 sm:$0xff]  }
 0x486   :  { %7584 = vmatprep.subr.bf16.mxu0 %v9802_v38  ;;  %v9862_v38 = vld [vmem:[#allocation7 + $0x254] ss:$8 sps:$4 sm:$0xff]  }
 0x488   :  { %9196 = vmatpush3.bf16.msra.mxu1 %v9776_v41  ;;  %v9842_v41 = vld [vmem:[#allocation7 + $0x1b0] ss:$8 sps:$4 sm:$0xff]  }
 0x489   :  { %9197 = vmatprep.subr.bf16.mxu1 %v9780_v53  ;;  %7585 = vmatpush2.bf16.msra.mxu0 %v9800_v35  ;;  %v9860_v53 = vld [vmem:[#allocation7 + $0x250] ss:$8 sps:$4 sm:$0xff]   ;;  %v9847_v35 = vld [vmem:[#allocation7 + $0x1a4] ss:$8 sps:$4 sm:$0xff]  }
 0x48a   :  { %7586 = vmatprep.subr.bf16.mxu0 %v9805_v12  ;;  %v9865_v12 = vld [vmem:[#allocation7 + $0x244] ss:$8 sps:$4 sm:$0xff]  }
 0x48c   :  { %9198 = vmatpush3.bf16.msra.mxu1 %v9781_v36  ;;  %v9845_v36 = vld [vmem:[#allocation7 + $0x1a0] ss:$8 sps:$4 sm:$0xff]  }
 0x48d   :  { %9199 = vmatprep.subr.bf16.mxu1 %v9785_v31  ;;  %7587 = vmatpush2.bf16.msra.mxu0 %v9803_v28  ;;  %v9863_v31 = vld [vmem:[#allocation7 + $0x240] ss:$8 sps:$4 sm:$0xff]   ;;  %v9850_v28 = vld [vmem:[#allocation7 + $0x194] ss:$8 sps:$4 sm:$0xff]  }
 0x48e   :  { %7638 = vmatprep.subr.bf16.mxu0 %v9856_v46 }
 0x48f   :  { %v10428_v17 = vpop.f32.mrf.mxu0 }
 0x490   :  { %9200 = vmatpush3.bf16.msra.mxu1 %v9786_v24  ;;  %v9868_v24 = vld [vmem:[#allocation7 + $0x234] ss:$8 sps:$4 sm:$0xff]  }
 0x491   :  { %v10430_v14 = vpop.f32.mrf.mxu0  ;;  %9201 = vmatprep.subr.bf16.mxu1 %v9790_v57 }
 0x493   :  { %v6768_v63 = vpop.f32.mrf.mxu0 }
 0x494   :  { %9202 = vmatpush3.bf16.msra.mxu1 %v9791_v59  ;;  %v9848_v59 = vld [vmem:[#allocation7 + $0x190] ss:$8 sps:$4 sm:$0xff]   ;;  %v9853_v63 = vld [vmem:[#allocation7 + $0x184] ss:$8 sps:$4 sm:$0xff]  }
 0x495   :  { %v6769_v30 = vpop.f32.mrf.mxu0  ;;  %9203 = vmatprep.subr.bf16.mxu1 %v9795_v60  ;;  %v9866_v60 = vld [vmem:[#allocation7 + $0x230] ss:$8 sps:$4 sm:$0xff]  }
 0x498   :  { %9204 = vmatpush3.bf16.msra.mxu1 %v9796_v61  ;;  %v9871_v61 = vld [vmem:[#allocation7 + $0x224] ss:$8 sps:$4 sm:$0xff]  }
 0x499   :  { %7597 = vmatprep.subr.bf16.mxu1 %v9808_v55 }
 0x49b   :  { %7047 = vmatmul.mubr.bf16.vlgmr.msra.gmra.mxu1 %v10396_v56  ;;  %v6723_v4 = vpop.f32.mrf.mxu1 }
 0x49c   :  { %v6724_v62 = vadd.f32 %v6723_v4, %v10418_v47  ;;  %7598 = vmatpush1.bf16.msra.mxu1 %v9806_v26  ;;  %v9815_v47 = vld [vmem:[#allocation7 + $0x140] ss:$8 sps:$4 sm:$0xff]   ;;  %v4888_v4 = vrot.slane %v10401_v43, %v1229_v18 }
 0x49d   :  { %v6725_v13 = vpop.f32.mrf.mxu1  ;;  %7599 = vmatprep.subr.bf16.mxu1 %v9811_v2  ;;  %v9851_v26 = vld [vmem:[#allocation7 + $0x180] ss:$8 sps:$4 sm:$0xff]  }
 0x49e   :  { %v6726_v54 = vadd.f32 %v6725_v13, %v10422_v52  ;;  %v7054_v8 = vmax.f32 %v6724_v62, 0.0  ;;  %v9818_v52 = vld [vmem:[#allocation7 + $0x130] ss:$8 sps:$4 sm:$0xff]   ;;  %v9869_v2 = vld [vmem:[#allocation7 + $0x220] ss:$8 sps:$4 sm:$0xff]   ;;  %v6765_v13 = vadd.f32 %v10428_v17, %v4888_v4 }
 0x49f   :  { %v6727_v5 = vpop.f32.mrf.mxu1  ;;  %v9881_v4 = vld [vmem:[#allocation9 + $0x30] sm:$0xff]  }
 0x4a0   :  { %v7055_v6 = vmax.f32 %v6726_v54, 0.0  ;;  %7600 = vmatpush1.bf16.msra.mxu1 %v9809_v1  ;;  %v7059_v56 = vpack.c.bf16 %v7054_v8, %v7054_v8  ;;  %v4892_v1 = vrot.slane %v10401_v43, %v1233_v23  ;;  %v9875_v23 = vld [vmem:[#allocation7 + $0x200] ss:$8 sps:$4 sm:$0xff]  }
 0x4a1   :  { %v6728_v11 = vpop.f32.mrf.mxu1  ;;  %7601 = vmatprep.subr.bf16.mxu1 %v9814_v40 }
 0x4a2   :  { %v7060_v15 = vpack.c.bf16 %v7055_v6, %v7055_v6  ;;  %v6767_v54 = vadd.f32 %v10430_v14, %v4892_v1  ;;  %v9874_v6 = vld [vmem:[#allocation7 + $0x214] ss:$8 sps:$4 sm:$0xff]   ;;  %v9883_v1 = vld [vmem:[#allocation9 + $0x28] sm:$0xff]  }
 0x4a4   :  { %7588 = vmatprep.mubr.bf16.mxu0 %v7060_v15  ;;  %7602 = vmatpush1.bf16.msra.mxu1 %v9812_v7 }
 0x4a5   :  { %7589 = vmatmul.mubr.bf16.vlgmr.msra.gmra.mxu0 %v7059_v56  ;;  %7603 = vmatprep.subr.bf16.mxu1 %v9817_v3  ;;  %v9872_v3 = vld [vmem:[#allocation7 + $0x210] ss:$8 sps:$4 sm:$0xff]  }
 0x4a6   :  { %7670 = vmatprep.mubr.bf16.mxu0 %v10103_v0  ;;  %v9835_v0 = vld [vmem:[#allocation7 + $0x1e4] ss:$8 sps:$4 sm:$0xff]   ;;  %7639 = vmatpush1.bf16.msra.mxu0 %v9854_v42 }
 0x4a7   :  { %7640 = vmatprep.subr.bf16.mxu0 %v9859_v48 }
 0x4a8   :  { %7604 = vmatpush1.bf16.msra.mxu1 %v9815_v47  ;;  %v9877_v47 = vld [vmem:[#allocation7 + $0x204] ss:$8 sps:$4 sm:$0xff]  }
 0x4a9   :  { %7605 = vmatprep.subr.bf16.mxu1 %v9820_v16 }
 0x4aa   :  { %7641 = vmatpush1.bf16.msra.mxu0 %v9857_v49 }
 0x4ab   :  { %7642 = vmatprep.subr.bf16.mxu0 %v9862_v38 }
 0x4ac   :  { %7606 = vmatpush1.bf16.msra.mxu1 %v9818_v52 }
 0x4ad   :  { %7607 = vmatprep.subr.bf16.mxu1 %v9823_v22 }
 0x4ae   :  { %7643 = vmatpush1.bf16.msra.mxu0 %v9860_v53 }
 0x4af   :  { %7644 = vmatprep.subr.bf16.mxu0 %v9865_v12 }
 0x4b0   :  { %7608 = vmatpush1.bf16.msra.mxu1 %v9821_v9 }
 0x4b1   :  { %7609 = vmatprep.subr.bf16.mxu1 %v9826_v44 }
 0x4b2   :  { %7645 = vmatpush1.bf16.msra.mxu0 %v9863_v31 }
 0x4b3   :  { %7646 = vmatprep.subr.bf16.mxu0 %v9868_v24 }
 0x4b4   :  { %7610 = vmatpush1.bf16.msra.mxu1 %v9824_v19 }
 0x4b5   :  { %7611 = vmatprep.subr.bf16.mxu1 %v9829_v21 }
 0x4b6   :  { %7647 = vmatpush1.bf16.msra.mxu0 %v9866_v60 }
 0x4b7   :  { %7648 = vmatprep.subr.bf16.mxu0 %v9871_v61 }
 0x4b8   :  { %7612 = vmatpush1.bf16.msra.mxu1 %v9827_v51 }
 0x4b9   :  { %7613 = vmatprep.subr.bf16.mxu1 %v9832_v32 }
 0x4ba   :  { %7649 = vmatpush1.bf16.msra.mxu0 %v9869_v2  ;;  %v9880_v2 = vld [vmem:[#allocation9 + $0x70] sm:$0xff]  }
 0x4bb   :  { %7650 = vmatprep.subr.bf16.mxu0 %v9874_v6  ;;  %v9889_v6 = vld [vmem:[#allocation9 + $0x10] sm:$0xff]  }
 0x4bc   :  { %7614 = vmatpush2.bf16.msra.mxu1 %v9830_v27 }
 0x4bd   :  { %7615 = vmatprep.subr.bf16.mxu1 %v9835_v0 }
 0x4be   :  { %7651 = vmatpush1.bf16.msra.mxu0 %v9872_v3  ;;  %v9892_v3 = vld [vmem:[#allocation9 + $0x40] sm:$0xff]  }
 0x4bf   :  { %7652 = vmatprep.subr.bf16.mxu0 %v9877_v47  ;;  %v9895_v47 = vld [vmem:[#allocation10 + $0x30] sm:$0xff]  }
 0x4c0   :  { %7616 = vmatpush2.bf16.msra.mxu1 %v9833_v34 }
 0x4c1   :  { %7617 = vmatprep.subr.bf16.mxu1 %v9838_v25 }
 0x4c2   :  { %7653 = vmatpush1.bf16.msra.mxu0 %v9875_v23  ;;  %v9896_v23 = vld [vmem:[#allocation10 + $0x28] sm:$0xff]  }
 0x4c4   :  { %7618 = vmatpush2.bf16.msra.mxu1 %v9836_v33 }
 0x4c5   :  { %7619 = vmatprep.subr.bf16.mxu1 %v9841_v39 }
 0x4c8   :  { %7620 = vmatpush2.bf16.msra.mxu1 %v9839_v58  ;;  %v4896_v58 = vrot.slane %v10401_v43, %v1237_v29 }
 0x4c9   :  { %7621 = vmatprep.subr.bf16.mxu1 %v9844_v50 }
 0x4cc   :  { %7622 = vmatpush2.bf16.msra.mxu1 %v9842_v41 }
 0x4cd   :  { %7623 = vmatprep.subr.bf16.mxu1 %v9847_v35 }
 0x4d0   :  { %v6846_v57 = vpop.f32.mrf.mxu0  ;;  %7624 = vmatpush2.bf16.msra.mxu1 %v9845_v36 }
 0x4d1   :  { %7625 = vmatprep.subr.bf16.mxu1 %v9850_v28 }
 0x4d2   :  { %v6848_v30 = vpop.f32.mrf.mxu0 }
 0x4d4   :  { %v6850_v55 = vpop.f32.mrf.mxu0  ;;  %7626 = vmatpush2.bf16.msra.mxu1 %v9848_v59 }
 0x4d5   :  { %7627 = vmatprep.subr.bf16.mxu1 %v9853_v63  ;;  %v9878_v55 = vld [vmem:[#allocation9 + $0x78] sm:$0xff]  }
 0x4d6   :  { %v6851_v62 = vpop.f32.mrf.mxu0 }
 0x4d7   :  { %v9882_v62 = vld [vmem:[#allocation9 + $0x68] sm:$0xff]  }
 0x4d8   :  { %7628 = vmatpush2.bf16.msra.mxu1 %v9851_v26  ;;  %v9879_v26 = vld [vmem:[#allocation9 + $0x38] sm:$0xff]  }
 0x4d9   :  { %9211 = vmatprep.subr.bf16.mxu1 %v9878_v55  ;;  %v9105_v55 = vld [vmem:[#allocation13 + $0x10] ss:$0 sm:$0xff] }
 0x4db   :  { %v6805_v40 = vpop.f32.mrf.mxu1 }
 0x4dc   :  { %v6806_v8 = vadd.f32 %v6805_v40, %v6765_v13  ;;  %v9884_v13 = vld [vmem:[#allocation9 + $0x60] sm:$0xff]  }
 0x4dd   :  { %v6807_v5 = vpop.f32.mrf.mxu1  ;;  %v9885_v40 = vld [vmem:[#allocation9 + $0x20] sm:$0xff]  }
 0x4de   :  { %v6808_v7 = vadd.f32 %v6807_v5, %v6767_v54  ;;  %v6847_v11 = vadd.f32 %v6846_v57, %v6806_v8  ;;  %v9886_v54 = vld [vmem:[#allocation9 + $0x58] sm:$0xff]   ;;  %v9888_v5 = vld [vmem:[#allocation9 + $0x50] sm:$0xff]  }
 0x4df   :  { %v6809_v15 = vpop.f32.mrf.mxu1  ;;  %v9887_v8 = vld [vmem:[#allocation9 + $0x18] sm:$0xff]  }
 0x4e0   :  { %v6849_v18 = vadd.f32 %v6848_v30, %v6808_v7  ;;  %v9890_v7 = vld [vmem:[#allocation9 + $0x48] sm:$0xff]   ;;  %v9893_v15 = vld [vmem:[#allocation9] sm:$0xff]  }
 0x4e1   :  { %v6810_v56 = vpop.f32.mrf.mxu1 }
 0x4e2   :  { %v10104_v56 = vmov 0.0  }
 0x4e3   :  { %9251 = vmatprep.subr.bf16.mxu0 %v10104_v56 }
 0x4f0   :  { %v9139_v16 = vpop.f32.mrf.mxu0 }
 0x4f2   :  { %v9140_v17 = vpop.f32.mrf.mxu0 }
 0x4f3   :  { %v9141_v52 = vadd.f32 %v9140_v17, %v9139_v16  ;;  %v9897_v16 = vld [vmem:[#allocation10 + $0x20] sm:$0xff]   ;;  %v9898_v17 = vld [vmem:[#allocation10 + $0x18] sm:$0xff]  }
 0x4f4   :  { %v9142_v22 = vpop.f32.mrf.mxu0 }
 0x4f5   :  { %v6929_v38 = vadd.f32 %v9141_v52, %v4896_v58  ;;  %v7144_v52 = vld [vmem:[#allocation13 + $0xd] sm:$0x3] }
 0x4f6   :  { %v9143_v14 = vpop.f32.mrf.mxu0  ;;  %v7149_v22 = vrot.slane %v7144_v52, %v10270_v37 }
 0x510   :  { %v9183_v9 = vpop.f32.mrf.mxu0 }
 0x512   :  { %v9184_v44 = vpop.f32.mrf.mxu0 }
 0x513   :  { %v9185_v19 = vadd.f32 %v9184_v44, %v9183_v9 }
 0x514   :  { %v9186_v21 = vpop.f32.mrf.mxu0 }
 0x516   :  { %v9187_v51 = vpop.f32.mrf.mxu0 }
 0x51b   :  { %v6887_v32 = vpop.f32.mrf.mxu1 }
 0x51c   :  { %v6888_v27 = vadd.f32 %v6887_v32, %v6847_v11  ;;  %v9891_v11 = vld [vmem:[#allocation9 + $0x8] sm:$0xff]   ;;  %v7153_v32 = vrot.slane %v7144_v52, %v10275_v45  ;;  %v9901_v45 = vld [vmem:[#allocation10] sm:$0xff]  }
 0x51d   :  { %v6889_v0 = vpop.f32.mrf.mxu1 }
 0x51e   :  { %v6890_v34 = vadd.f32 %v6889_v0, %v6849_v18  ;;  %v7056_v25 = vmax.f32 %v6888_v27, 0.0  ;;  %v9894_v18 = vld [vmem:[#allocation10 + $0x38] sm:$0xff]  }
 0x51f   :  { %v6891_v33 = vpop.f32.mrf.mxu1 }
 0x520   :  { %v7057_v39 = vmax.f32 %v6890_v34, 0.0  ;;  %v7061_v48 = vpack.c.bf16 %v7056_v25, %v7056_v25 }
 0x521   :  { %v6892_v42 = vpop.f32.mrf.mxu1 }
 0x522   :  { %v7062_v46 = vpack.c.bf16 %v7057_v39, %v7057_v39 }
 0x524   :  { %7629 = vmatprep.mubr.bf16.mxu1 %v7062_v46 }
 0x525   :  { %7630 = vmatmul.mubr.bf16.vlgmr.msra.gmra.mxu1 %v7061_v48 }
 0x526   :  { %9212 = vmatpush3.bf16.msra.mxu1 %v9879_v26 }
 0x527   :  { %9213 = vmatprep.subr.bf16.mxu1 %v9880_v2 }
 0x52a   :  { %9214 = vmatpush3.bf16.msra.mxu1 %v9881_v4 }
 0x52b   :  { %9215 = vmatprep.subr.bf16.mxu1 %v9882_v62 }
 0x52e   :  { %9216 = vmatpush3.bf16.msra.mxu1 %v9883_v1 }
 0x52f   :  { %9217 = vmatprep.subr.bf16.mxu1 %v9884_v13 }
 0x532   :  { %9218 = vmatpush3.bf16.msra.mxu1 %v9885_v40 }
 0x533   :  { %9219 = vmatprep.subr.bf16.mxu1 %v9886_v54  ;;  %v8085_v54 = vand.u32 127, %v1219_v10 }
 0x535   :  { %vm8086_vm1 = vcmp.lt.s32.totalorder %v8085_v54, 65  ;;  %vm8099_vm2 = vcmp.eq.s32.totalorder %v8085_v54, 65 }
 0x536   :  { %9220 = vmatpush3.bf16.msra.mxu1 %v9887_v8  ;;  %v9114_v8 = vld [vmem:[#allocation13 + $0x11] ss:$0 sm:$0xff] }
 0x537   :  { %9221 = vmatprep.subr.bf16.mxu1 %v9888_v5 }
 0x53a   :  { %9222 = vmatpush3.bf16.msra.mxu1 %v9889_v6 }
 0x53b   :  { %v9161_v49 = vpop.f32.mrf.mxu1  ;;  %9223 = vmatprep.subr.bf16.mxu1 %v9890_v7 }
 0x53d   :  { %v9162_v50 = vpop.f32.mrf.mxu1 }
 0x53e   :  { %v9163_v41 = vadd.f32 %v9162_v50, %v9161_v49  ;;  %9224 = vmatpush3.bf16.msra.mxu1 %v9891_v11  ;;  %v9899_v50 = vld [vmem:[#allocation10 + $0x10] sm:$0xff]  }
 0x53f   :  { %v9164_v53 = vpop.f32.mrf.mxu1  ;;  %9225 = vmatprep.subr.bf16.mxu1 %v9892_v3 }
 0x540   :  { %v6969_v35 = vadd.f32 %v9163_v41, %v6929_v38  ;;  %v9900_v38 = vld [vmem:[#allocation10 + $0x8] sm:$0xff]   ;;  %v9902_v41 = vld [vmem:[#allocation12 + $0x38] sm:$0xff]   ;;  %v9903_v53 = vld [vmem:[#allocation12 + $0x30] sm:$0xff]  }
 0x541   :  { %v9165_v12 = vpop.f32.mrf.mxu1 }
 0x542   :  { %v7009_v36 = vadd.f32 %v9185_v19, %v6969_v35  ;;  %9226 = vmatpush3.bf16.msra.mxu1 %v9893_v15  ;;  %v9904_v35 = vld [vmem:[#allocation12 + $0x28] sm:$0xff]   ;;  %v9905_v12 = vld [vmem:[#allocation12 + $0x20] sm:$0xff]  }
 0x543   :  { %9271 = vmatprep.subr.bf16.mxu1 %v10104_v56 }
 0x55b   :  { %v9205_v31 = vpop.f32.mrf.mxu1 }
 0x55d   :  { %v9206_v28 = vpop.f32.mrf.mxu1 }
 0x55e   :  { %v9207_v24 = vadd.f32 %v9206_v28, %v9205_v31  ;;  %v9907_v31 = vld [vmem:[#allocation12 + $0x10] sm:$0xff]  }
 0x55f   :  { %v9208_v57 = vpop.f32.mrf.mxu1 }
 0x560   :  { %v7049_v59 = vadd.f32 %v9207_v24, %v7009_v36  ;;  %v9906_v36 = vld [vmem:[#allocation12 + $0x18] sm:$0xff]   ;;  %v9088_v24 = vld [vmem:[#allocation13 + $0xf] ss:$0 sm:$0xff] }
 0x561   :  { %v9209_v60 = vpop.f32.mrf.mxu1 }
 0x562   :  { %v7058_v63 = vmax.f32 %v7049_v59, 0.0 }
 0x564   :  { %v7063_v61 = vpack.c.bf16 %v7058_v63, %v7058_v63 }
 0x565   :  { %v7590_v30 = vpop.f32.mrf.mxu0 }
 0x566   :  { %7671 = vmatmul.mubr.bf16.vlgmr.msra.gmra.mxu0 %v7063_v61  ;;  %v7591_v14 = vadd.f32 %v7590_v30, %v7149_v22 }
 0x567   :  { %v7592_v20 = vpop.f32.mrf.mxu0  ;;  %9252 = vmatpush3.bf16.msra.mxu0 %v9894_v18  ;;  %9267 = vmatprep.mubr.msk.bf16.mxu0 %vm10105_vm0, %v10104_v56 }
 0x568   :  { %9253 = vmatprep.subr.bf16.mxu0 %v10104_v56  ;;  %v7593_v27 = vadd.f32 %v7592_v20, %v7153_v32 }
 0x569   :  { %v7594_v29 = vpop.f32.mrf.mxu0 }
 0x56a   :  { %v9908_v29 = vld [vmem:[#allocation12 + $0x8] sm:$0xff]  }
 0x56b   :  { %v7595_v43 = vpop.f32.mrf.mxu0  ;;  %9254 = vmatpush3.bf16.msra.mxu0 %v9895_v47 }
 0x56c   :  { %9255 = vmatprep.subr.bf16.mxu0 %v10104_v56  ;;  %v9909_v43 = vld [vmem:[#allocation12] sm:$0xff]  }
 0x56f   :  { %9256 = vmatpush3.bf16.msra.mxu0 %v9896_v23 }
 0x570   :  { %9257 = vmatprep.subr.bf16.mxu0 %v10104_v56 }
 0x573   :  { %9258 = vmatpush3.bf16.msra.mxu0 %v9897_v16 }
 0x574   :  { %9259 = vmatprep.subr.bf16.mxu0 %v10104_v56 }
 0x577   :  { %9260 = vmatpush3.bf16.msra.mxu0 %v9898_v17 }
 0x578   :  { %9261 = vmatprep.subr.bf16.mxu0 %v10104_v56 }
 0x57b   :  { %9262 = vmatpush3.bf16.msra.mxu0 %v9899_v50 }
 0x57c   :  { %9263 = vmatprep.subr.bf16.mxu0 %v10104_v56 }
 0x57f   :  { %9264 = vmatpush3.bf16.msra.mxu0 %v9900_v38 }
 0x580   :  { %9265 = vmatprep.subr.bf16.mxu0 %v10104_v56 }
 0x583   :  { %9266 = vmatpush3.bf16.msra.mxu0 %v9901_v45 }
 0x5e5   :  { %v7631_v9 = vpop.f32.mrf.mxu1 }
 0x5e6   :  { %v7632_v44 = vadd.f32 %v7631_v9, %v7591_v14 }
 0x5e7   :  { %v7633_v19 = vpop.f32.mrf.mxu1 }
 0x5e8   :  { %v7634_v34 = vadd.f32 %v7633_v19, %v7593_v27 }
 0x5e9   :  { %v7635_v21 = vpop.f32.mrf.mxu1 }
 0x5eb   :  { %v7636_v51 = vpop.f32.mrf.mxu1 }
 0x626   :  { %v7672_v0 = vpop.f32.mrf.mxu0 }
 0x627   :  { %v7673_v25 = vadd.f32 %v7672_v0, %v7632_v44 }
 0x628   :  { %v7674_v33 = vpop.f32.mrf.mxu0 }
 0x629   :  { %v7675_v39 = vadd.f32 %v7674_v33, %v7634_v34  ;;  %v7679_v42 = vmax.f32 %v7673_v25, 0.0 }
 0x62a   :  { %v7676_v46 = vpop.f32.mrf.mxu0 }
 0x62b   :  { %v7680_v48 = vmax.f32 %v7675_v39, 0.0  ;;  %v7681_v37 = vpack.c.bf16 %v7679_v42, %v7679_v42 }
 0x62c   :  { %v7677_v58 = vpop.f32.mrf.mxu0 }
 0x62d   :  { %v7682_v49 = vpack.c.bf16 %v7680_v48, %v7680_v48 }
 0x62f   :  { %7850 = vmatprep.mubr.bf16.mxu1 %v7682_v49 }
 0x630   :  { %7851 = vmatmul.mubr.bf16.vlgmr.msra.gmra.mxu1 %v7681_v37 }
 0x631   :  { %9287 = vmatprep.mubr.msk.bf16.mxu1 %vm10105_vm0, %v10104_v56  ;;  %9272 = vmatpush3.bf16.msra.mxu1 %v9902_v41 }
 0x632   :  { %9273 = vmatprep.subr.bf16.mxu1 %v10104_v56 }
 0x635   :  { %9274 = vmatpush3.bf16.msra.mxu1 %v9903_v53 }
 0x636   :  { %9275 = vmatprep.subr.bf16.mxu1 %v10104_v56 }
 0x639   :  { %9276 = vmatpush3.bf16.msra.mxu1 %v9904_v35 }
 0x63a   :  { %9277 = vmatprep.subr.bf16.mxu1 %v10104_v56 }
 0x63d   :  { %9278 = vmatpush3.bf16.msra.mxu1 %v9905_v12 }
 0x63e   :  { %9279 = vmatprep.subr.bf16.mxu1 %v10104_v56 }
 0x641   :  { %9280 = vmatpush3.bf16.msra.mxu1 %v9906_v36 }
 0x642   :  { %9281 = vmatprep.subr.bf16.mxu1 %v10104_v56 }
 0x645   :  { %9282 = vmatpush3.bf16.msra.mxu1 %v9907_v31 }
 0x646   :  { %9283 = vmatprep.subr.bf16.mxu1 %v10104_v56 }
 0x649   :  { %9284 = vmatpush3.bf16.msra.mxu1 %v9908_v29 }
 0x64a   :  { %9285 = vmatprep.subr.bf16.mxu1 %v10104_v56 }
 0x64d   :  { %9286 = vmatpush3.bf16.msra.mxu1 %v9909_v43 }
 0x6f0   :  { %v9227_v28 = vpop.f32.mrf.mxu1 }
 0x6f2   :  { %v9228_v57 = vpop.f32.mrf.mxu1 }
 0x6f3   :  { %v9229_v59 = vadd.f32 %v9228_v57, %v9227_v28 }
 0x6f4   :  { %v9230_v60 = vpop.f32.mrf.mxu1 }
 0x6f5   :  { %v7853_v63 = vadd.f32 %v9229_v59, %v9088_v24 }
 0x6f6   :  { %v9231_v61 = vpop.f32.mrf.mxu1 }
 0x6f7   :  { %v7858_v30 = vmax.f32 %v7853_v63, 0.0 }
 0x6f9   :  { %v7859_v20 = vpack.c.bf16 %v7858_v30, %v7858_v30 }
 0x6fb   :  { %9268 = vmatmul.mubr.bf16.vlgmr.msra.gmra.mxu0 %v7859_v20 }
 0x7bb   :  { %v7965_v26 = vpop.f32.mrf.mxu0 }
 0x7bc   :  { %v7966_v2 = vadd.f32 %v9105_v55, %v7965_v26 }
 0x7bd   :  { %v9269_v4 = vpop.f32.mrf.mxu0 }
 0x7be   :  { %v7971_v62 = vmax.f32 %v7966_v2, 0.0 }
 0x7bf   :  { %v7968_v1 = vpop.f32.mrf.mxu0 }
 0x7c0   :  { %v7972_v13 = vpack.c.bf16 %v7971_v62, %v7971_v62 }
 0x7c1   :  { %v9270_v40 = vpop.f32.mrf.mxu0 }
 0x7c2   :  { %9288 = vmatmul.mubr.bf16.vlgmr.msra.gmra.mxu1 %v7972_v13 }
 0x882   :  { %v8078_v5 = vpop.f32.mrf.mxu1 }
 0x883   :  { %v8079_v6 = vadd.f32 %v9114_v8, %v8078_v5 }
 0x884   :  { %v9289_v7 = vpop.f32.mrf.mxu1 }
 0x885   :  { %9910 = vtanh.f32 %v8079_v6  ;;  %v8087_v11 = vsel %vm8086_vm1, %v8079_v6, -1e+30 }
 0x886   :  { %8088 = vmax.xlane.f32.xlu0 %v8087_v11  ;;  %v8081_v3 = vpop.f32.mrf.mxu1 }
 0x888   :  { %v9290_v15 = vpop.f32.mrf.mxu1 }
 0x892   :  { %v9911_v18 = vpop.eup %9910 }
 0x893   :  { %v8100_v56 = vsel %vm8099_vm2, %v9911_v18, 0.0 }
 0x90f   :  { %v8089_v47 = vpop.xlane.xlu0 %8088 }
 0x910   :  { %v8090_v23 = vsub.f32 %v8087_v11, %v8089_v47 }
 0x912   :  { %v8091_v16 = vmul.f32 1.442695, %v8090_v23 }
 0x914   :  { %9912 = vpow2.f32 %v8091_v16 }
 0x921   :  { %v9913_v17 = vpop.eup %9912 }
 0x922   :  { %8093 = vadd.xlane.f32.xlu0 %v9913_v17 }
 0x9ab   :  { %v8094_v10 = vpop.xlane.xlu0 %8093 }
 0x9ac   :  { %9914 = vlog2.f32 %v8094_v10 }
 0x9b9   :  { %v9915_v52 = vpop.eup %9914 }
 0x9ba   :  { %v8096_v22 = vmul.f32 0.6931472, %v9915_v52 }
 0x9bc   :  { %v8097_v14 = vsub.f32 %v8090_v23, %v8096_v22 }
 0x9be   :  { %v8101_v9 = vsel %vm8086_vm1, %v8097_v14, %v8100_v56 }
 0x9bf   :  { %8102 = vst [vmem:[%s10482_s9] sm:$0xff] %v8101_v9 }
 0x9c0   :  { %8107 = vsyncpa [#allocation3], 1 }
 0x9c1   :  { %8108 = vsyncpa [#allocation5], 1 }
 0x9c2   :  { %8109 = vsyncpa [#allocation8], 1 }
 0x9c3   :  { %8110 = vsyncpa [#allocation11], 1 }
 0x9c4   :  { %8111 = vsyncpa [#allocation14], 1 }

</bundles_post_ra>
